<compile_context>
chip_gen: v6e
topology: v6e:2x2x1
jax: 0.10.0
libtpu: 0.0.40
codegen_flags: <defaults>
</compile_context>

<pallas_src>
import math
from functools import partial

import numpy as np

import jax
import jax.numpy as jnp
from jax.experimental import pallas as pl
from jax.experimental.pallas import tpu as pltpu


def _round_up(x, m):
    return (x + m - 1) // m * m


def _vfe_kernel(feat_ref, sel_ref, inv_ref, expand_ref, out_ref, *, mm_precision):
    # feat_ref:   (tile_rows, G*P*C_total)   packed voxel features (native dtype)
    # sel_ref:    (G*P*C_total, G*C_in)      constant 0/1 selection matrix (resident)
    # inv_ref:    (tile_rows, G)             packed 1/num_voxels (float32)
    # expand_ref: (G, G*C_in)                constant 0/1 lane-expansion matrix (resident)
    # out_ref:    (tile_rows, G*C_in)        packed per-voxel means
    sums = jnp.dot(
        feat_ref[...],
        sel_ref[...],
        preferred_element_type=jnp.float32,
        precision=mm_precision,           # HIGHEST only for fp32 inputs
    )
    # Lane-expand 1/n from G lanes to G*C_in lanes on the idle MXU (exact:
    # expansion matrix is 0/1, HIGHEST keeps full fp32 on this tiny matmul).
    inv = jnp.dot(
        inv_ref[...],
        expand_ref[...],
        preferred_element_type=jnp.float32,
        precision=jax.lax.Precision.HIGHEST,
    )
    out_ref[...] = (sums * inv).astype(out_ref.dtype)


def voxel_feature_extractor_v3(features, num_voxels, num_input_features=4,
                               tile_rows=1024):
    """features: (V, P, C_total); num_voxels: (V,) -> (V, num_input_features).

    Notes:
      * Zero-count voxels return 0 (counts clamped to >= 1), whereas the
        PyTorch module would return inf/NaN for them.
      * For a zero-copy fast path, preallocate V (max_voxels) as a multiple of
        G = lcm(num_input_features, 128) // num_input_features (32 for C_in=4);
        otherwise a small pad of the feature tensor up to the next multiple of
        G is materialized.
    """
    features = jnp.asarray(features)
    num_voxels = jnp.asarray(num_voxels)
    V, P, C_total = features.shape
    C_in = int(num_input_features)
    assert 1 <= C_in <= C_total

    # --- packing geometry ---------------------------------------------------
    lane_out = (128 * C_in) // math.gcd(128, C_in)   # lcm(C_in, 128): lane-dense
    G = lane_out // C_in                             # voxels packed per row
    K = G * P * C_total                              # packed row width
    itemsize = features.dtype.itemsize

    V_g = _round_up(V, G)                            # pad voxel count to G only
    rows = V_g // G

    # --- tile sizing ----------------------------------------------------------
    tile_rows = max(8, _round_up(int(tile_rows), 8))               # default 1024
    max_rows_vmem = max(8, ((6 << 20) // (K * itemsize)) // 8 * 8)  # ~6 MiB LHS/step
    tile_rows = min(tile_rows, max_rows_vmem)
    # v7x megacore: aim for >=4 grid steps so the "parallel" axis spans both
    # TensorCores, but never shrink below 256 rows (v5e/v6e overhead regime).
    steps_cap = max(_round_up(pl.cdiv(rows, 4), 8), 256)
    tile_rows = min(tile_rows, steps_cap)
    tile_rows = min(tile_rows, _round_up(rows, 8))
    grid = (pl.cdiv(rows, tile_rows),)               # ragged last block is fine

    # --- wrapper-side packing (contiguous reshapes; pad only V -> V_g) -------
    feats2d = features.reshape(V, P * C_total)
    if V_g != V:
        feats2d = jnp.pad(feats2d, ((0, V_g - V), (0, 0)))
    feats_packed = feats2d.reshape(rows, K)

    n = num_voxels.reshape(V).astype(jnp.float32)
    if V_g != V:
        n = jnp.pad(n, (0, V_g - V), constant_values=1.0)
    inv_packed = (1.0 / jnp.maximum(n, 1.0)).reshape(rows, G)   # (rows, G) float32

    # --- constant 0/1 matrices (numpy -> compile-time constants) -------------
    # sel[k, j] = 1 iff packed voxel index of k == packed voxel index of j
    #             and channel of k == channel of j (< C_in): sums over the P
    #             point rows and keeps only the first C_in channels.
    k_idx = np.arange(K)
    g_k = k_idx // (P * C_total)
    c_k = k_idx % C_total
    j_idx = np.arange(lane_out)
    g_j = j_idx // C_in
    c_j = j_idx % C_in
    sel = jnp.asarray(
        (g_k[:, None] == g_j[None, :]) & (c_k[:, None] == c_j[None, :]),
        dtype=features.dtype)                                   # (K, lane_out)
    # expand[g, j] = 1 iff j // C_in == g  (g-major, c-minor, matches output).
    expand = jnp.asarray(j_idx[None, :] // C_in == np.arange(G)[:, None],
                         dtype=jnp.float32)                     # (G, lane_out)

    mm_precision = (jax.lax.Precision.HIGHEST
                    if features.dtype == jnp.float32 else None)

    out_packed = pl.pallas_call(
        partial(_vfe_kernel, mm_precision=mm_precision),
        out_shape=jax.ShapeDtypeStruct((rows, lane_out), features.dtype),
        grid=grid,
        in_specs=[
            pl.BlockSpec((tile_rows, K), lambda i: (i, 0)),
            pl.BlockSpec((K, lane_out), lambda i: (0, 0)),     # resident constant
            pl.BlockSpec((tile_rows, G), lambda i: (i, 0)),
            pl.BlockSpec((G, lane_out), lambda i: (0, 0)),     # resident constant
        ],
        out_specs=pl.BlockSpec((tile_rows, lane_out), lambda i: (i, 0)),
        compiler_params=pltpu.CompilerParams(
            dimension_semantics=("parallel",),
            vmem_limit_bytes=32 << 20,
        ),
    )(feats_packed, sel, inv_packed, expand)

    # (rows, G*C_in) -> (V_g, C_in) is a free contiguous reshape.
    return out_packed.reshape(V_g, C_in)[:V]


def _reference(features, num_voxels, num_input_features=4):
    s = jnp.sum(features[:, :, :num_input_features].astype(jnp.float32), axis=1)
    out = s / num_voxels.astype(jnp.float32).reshape(-1, 1)
    return out.astype(features.dtype)


if __name__ == "__main__":
    key = jax.random.PRNGKey(0)

    # Config 1: 200 voxels (not a multiple of G=32 -> exercises the G-pad and
    # the ragged last grid block), 8 points/voxel, 5 raw channels, 4 used.
    # Config 2: 96 voxels (multiple of G -> exercises the zero-copy no-pad path).
    for V in (200, 96):
        k1, k2 = jax.random.split(jax.random.fold_in(key, V))
        P, C_total, C_in = 8, 5, 4
        features = jax.random.normal(k1, (V, P, C_total), dtype=jnp.float32)
        num_voxels = jax.random.randint(k2, (V,), 1, P + 1, dtype=jnp.int32)

        out = voxel_feature_extractor_v3(features, num_voxels,
                                         num_input_features=C_in)
        out = jax.block_until_ready(out)

        ref = _reference(features, num_voxels, C_in)
        assert out.shape == (V, C_in)
        assert out.dtype == features.dtype
        max_err = jnp.max(jnp.abs(out - ref))
        assert jnp.allclose(out, ref, atol=1e-5, rtol=1e-5), \
            f"mismatch vs reference at V={V} (max abs err {max_err})"

    print("KERNEL_OK")
</pallas_src>

<mosaic_0001>
module attributes {stable_mosaic.version = 11 : i64} {
  func.func @_vfe_kernel(%arg0: i32, %arg1: memref<8x1280xf32, #tpu.memory_space<vmem>>, %arg2: memref<1280x128xf32, #tpu.memory_space<vmem>>, %arg3: memref<8x32xf32, #tpu.memory_space<vmem>>, %arg4: memref<32x128xf32, #tpu.memory_space<vmem>>, %arg5: memref<8x128xf32, #tpu.memory_space<vmem>>) attributes {dimension_semantics = [#tpu.dimension_semantics<parallel>], iteration_bounds = array<i64: 1>, scalar_prefetch = 0 : i64, scratch_operands = 0 : i64, tpu.core_type = #tpu.core_type<tc>, window_params = [{transform_indices = @transform_0, window_bounds = array<i64: 8, 1280>}, {pipeline_mode = #tpu.pipeline_mode<synchronous>, transform_indices = @transform_1, window_bounds = array<i64: 1280, 128>}, {transform_indices = @transform_2, window_bounds = array<i64: 8, 32>}, {pipeline_mode = #tpu.pipeline_mode<synchronous>, transform_indices = @transform_3, window_bounds = array<i64: 32, 128>}, {transform_indices = @transform_4, window_bounds = array<i64: 8, 128>}]} {
    %c0 = arith.constant 0 : index
    %c0_0 = arith.constant 0 : index
    %0 = vector.load %arg1[%c0, %c0_0] : memref<8x1280xf32, #tpu.memory_space<vmem>>, vector<8x1280xf32>
    %c0_1 = arith.constant 0 : index
    %c0_2 = arith.constant 0 : index
    %1 = vector.load %arg2[%c0_1, %c0_2] : memref<1280x128xf32, #tpu.memory_space<vmem>>, vector<1280x128xf32>
    %cst = arith.constant dense<0.000000e+00> : vector<8x128xf32>
    %2 = tpu.matmul %0, %1, %cst {dimension_numbers = #tpu.dot_dimension_numbers<[1], [0], [0], [1], [0, 0, 1, 1], [], []>, precision = #tpu.contract_precision<fp32>} : vector<8x1280xf32>, vector<1280x128xf32>, vector<8x128xf32> -> vector<8x128xf32>
    %c0_3 = arith.constant 0 : index
    %c0_4 = arith.constant 0 : index
    %3 = vector.load %arg3[%c0_3, %c0_4] : memref<8x32xf32, #tpu.memory_space<vmem>>, vector<8x32xf32>
    %c0_5 = arith.constant 0 : index
    %c0_6 = arith.constant 0 : index
    %4 = vector.load %arg4[%c0_5, %c0_6] : memref<32x128xf32, #tpu.memory_space<vmem>>, vector<32x128xf32>
    %cst_7 = arith.constant dense<0.000000e+00> : vector<8x128xf32>
    %5 = tpu.matmul %3, %4, %cst_7 {dimension_numbers = #tpu.dot_dimension_numbers<[1], [0], [0], [1], [0, 0, 1, 1], [], []>, precision = #tpu.contract_precision<fp32>} : vector<8x32xf32>, vector<32x128xf32>, vector<8x128xf32> -> vector<8x128xf32>
    %6 = arith.mulf %2, %5 : vector<8x128xf32>
    %c0_8 = arith.constant 0 : index
    %c0_9 = arith.constant 0 : index
    %7 = vector.load %arg5[%c0_8, %c0_9] : memref<8x128xf32, #tpu.memory_space<vmem>>, vector<8x128xf32>
    tpu.vector_store %arg5[%c0_8, %c0_9], %6 {strides = array<i32>} : memref<8x128xf32, #tpu.memory_space<vmem>>, vector<8x128xf32>,
    return
  }
  func.func @transform_0(%arg0: i32) -> (i32, i32) {
    %c0_i32 = arith.constant 0 : i32
    %c0_i32_0 = arith.constant 0 : i32
    return %arg0, %c0_i32 : i32, i32
  }
  func.func @transform_1(%arg0: i32) -> (i32, i32) {
    %c0_i32 = arith.constant 0 : i32
    %c0_i32_0 = arith.constant 0 : i32
    %c0_i32_1 = arith.constant 0 : i32
    return %c0_i32, %c0_i32_0 : i32, i32
  }
  func.func @transform_2(%arg0: i32) -> (i32, i32) {
    %c0_i32 = arith.constant 0 : i32
    %c0_i32_0 = arith.constant 0 : i32
    return %arg0, %c0_i32 : i32, i32
  }
  func.func @transform_3(%arg0: i32) -> (i32, i32) {
    %c0_i32 = arith.constant 0 : i32
    %c0_i32_0 = arith.constant 0 : i32
    %c0_i32_1 = arith.constant 0 : i32
    return %c0_i32, %c0_i32_0 : i32, i32
  }
  func.func @transform_4(%arg0: i32) -> (i32, i32) {
    %c0_i32 = arith.constant 0 : i32
    %c0_i32_0 = arith.constant 0 : i32
    return %arg0, %c0_i32 : i32, i32
  }
}

</mosaic_0001>

<bundles_post_ra>
// kernel: tpu_custom_call.1
= control target key start
LH: loop header
LB: loop body
LE: loop exit
PB: predicated region body
PF: predicated region fallthrough
CT: control target
= control target key end

     0   :  { %9 = vsyncpa [#allocation3], 0  ;;  %s9384_s0 = inlined_call_operand.hbm [shape: f32[7,1280], index: 0, kind: input, shape index: {}]   ;;  %s9385_s1 = inlined_call_operand.hbm [shape: f32[1280,128], index: 1, kind: input, shape index: {}]   ;;  %s9386_s2 = inlined_call_operand.hbm [shape: f32[7,32], index: 2, kind: input, shape index: {}]   ;;  %s9387_s3 = inlined_call_operand.hbm [shape: f32[32,128], index: 3, kind: input, shape index: {}]   ;;  %s9388_s4 = inlined_call_operand.hbm [shape: f32[7,128], index: 4, kind: output, shape index: {}]  }
   0x1   :  { %10 = vsyncpa [#allocation6], 0 }
   0x2   :  { %11 = vsyncpa [#allocation9], 0 }
   0x3   :  { %12 = vsyncpa [#allocation4], 0  ;;  %s6325_s15 = smov [#allocation5]  }
   0x4   :  { %s28_s16 = sshll.u32 %s6325_s15, 4  ;;  %s29_s16 = int_to_ptr.vmem [resolvable:$true] %s28_s16 }
   0x5   :  { %s6225_s17 = scalar_lea.vmem %s29_s16, 20480  ;;  %p6230_p1 = scmp.lt.s32.totalorder %s29_s16, %s29_s16 }
   0x6   :  { %p6226_p0 = scmp.ne.s32.totalorder %s29_s16, %s6225_s17  ;;  %p6231_p2 = scmp.lt.s32.totalorder %s6225_s17, %s6225_s17 }
   0x8   :  { %p6232_p3 = por %p6231_p2, %p6230_p1 }
   0xa   :  { %p6233_p4 = pnand %p6232_p3, %p6226_p0 }
   0xc   :  { %6236 = shalt.err (!%p6233_p4)
}
   0xd   :  { %s6326_s18 = smov 128   ;;  %s6327_s19 = smov 8  }
   0xe   :  { %34 = dma.hbm_to_vmem [thread:$0]  %s9385_s1, 20480, %s29_s16, [#allocation6], %s6326_s18, %s6326_s18, %s6327_s19  }
   0xf   :  { %s6328_s22 = smov [#allocation2]   ;;  %s6329_s24 = smov [#allocation7]  }
  0x10   :  { %s19_s23 = sshll.u32 %s6328_s22, 4  ;;  %s41_s25 = sshll.u32 %s6329_s24, 4  ;;  %s20_s23 = int_to_ptr.vmem [resolvable:$true] %s19_s23  ;;  %s42_s25 = int_to_ptr.vmem [resolvable:$true] %s41_s25 }
  0x11   :  { %s6245_s26 = scalar_lea.vmem %s20_s23, 1280  ;;  %p6250_p6 = scmp.lt.s32.totalorder %s20_s23, %s20_s23 }
  0x12   :  { %p6246_p5 = scmp.ne.s32.totalorder %s20_s23, %s6245_s26  ;;  %p6251_p7 = scmp.lt.s32.totalorder %s6245_s26, %s6245_s26 }
  0x14   :  { %p6252_p8 = por %p6251_p7, %p6250_p6 }
  0x16   :  { %p6253_p9 = pnand %p6252_p8, %p6246_p5 }
  0x18   :  { %6256 = shalt.err (!%p6253_p9)
}
  0x19   :  { %22 = dma.hbm_to_vmem [thread:$0]  %s9384_s0, 1280, %s20_s23, [#allocation3]  }
  0x1a   :  { %s6265_s29 = scalar_lea.vmem %s42_s25, 128  ;;  %p6270_p11 = scmp.lt.s32.totalorder %s42_s25, %s42_s25 }
  0x1b   :  { %p6266_p10 = scmp.ne.s32.totalorder %s42_s25, %s6265_s29  ;;  %p6271_p12 = scmp.lt.s32.totalorder %s6265_s29, %s6265_s29 }
  0x1d   :  { %p6272_p13 = por %p6271_p12, %p6270_p11 }
  0x1f   :  { %p6273_p0 = pnand %p6272_p13, %p6266_p10 }
  0x21   :  { %6276 = shalt.err (!%p6273_p0)
}
  0x22   :  { %44 = dma.hbm_to_vmem [thread:$0]  %s9386_s2, 128, %s42_s25, [#allocation6]  }
  0x23   :  { %s6330_s5 = smov [#allocation8]  }
  0x24   :  { %s50_s6 = sshll.u32 %s6330_s5, 4  ;;  %s51_s6 = int_to_ptr.vmem [resolvable:$true] %s50_s6 }
  0x25   :  { %s6285_s7 = scalar_lea.vmem %s51_s6, 512  ;;  %p6290_p2 = scmp.lt.s32.totalorder %s51_s6, %s51_s6 }
  0x26   :  { %p6286_p1 = scmp.ne.s32.totalorder %s51_s6, %s6285_s7  ;;  %p6291_p3 = scmp.lt.s32.totalorder %s6285_s7, %s6285_s7 }
  0x28   :  { %p6292_p4 = por %p6291_p3, %p6290_p2 }
  0x2a   :  { %p6293_p5 = pnand %p6292_p4, %p6286_p1 }
  0x2c   :  { %6296 = shalt.err (!%p6293_p5)
}
  0x2d   :  { %56 = dma.hbm_to_vmem [thread:$0]  %s9387_s3, 512, %s51_s6, [#allocation9], %s6326_s18, %s6326_s18, %s6327_s19  }
  0x2e   :  { %6317 = dma.done.wait [#allocation3], 1280  }
  0x2f   :  { %6318 = vsyncadd [#allocation3], 4294966016 }
  0x30   :  { %6319 = dma.done.wait [#allocation6], 20608  }
  0x31   :  { %6320 = vsyncadd [#allocation6], 4294946688 }
  0x32   :  { %6321 = dma.done.wait [#allocation9], 512  }
  0x33   :  { %6322 = vsyncadd [#allocation9], 4294966784  ;;  %v110_v0 = vld [vmem:[#allocation5 + $0xf8] sm:$0xff]  ;;  %v109_v2 = vld [vmem:[#allocation5 + $0xf0] sm:$0xff]  ;;  %vm4554_vm0 = vcmask 261120   ;;  %vm6332_vm1 = vmmov 0  }
  0x34   :  { %v94_v1 = vld [vmem:[#allocation5 + $0x78] sm:$0xff]  ;;  %v6377_v3 = vand.u32 4294901760, %v110_v0  ;;  %v6381_v5 = vand.u32 4294901760, %v109_v2  ;;  %v93_v6 = vld [vmem:[#allocation5 + $0x70] sm:$0xff]  ;;  %v108_v7 = vld [vmem:[#allocation5 + $0xe8] sm:$0xff]  ;;  %s6333_s2 = smov [#allocation10]  }
  0x35   :  { %v6379_v4 = vand.u32 4294901760, %v94_v1  ;;  %v92_v8 = vld [vmem:[#allocation5 + $0x68] sm:$0xff]  ;;  %v6383_v9 = vand.u32 4294901760, %v93_v6  ;;  %v6385_v10 = vand.u32 4294901760, %v108_v7  ;;  %v107_v12 = vld [vmem:[#allocation5 + $0xe0] sm:$0xff]  ;;  %v106_v14 = vld [vmem:[#allocation5 + $0xd8] sm:$0xff] }
  0x36   :  { %v6387_v11 = vand.u32 4294901760, %v92_v8  ;;  %v91_v13 = vld [vmem:[#allocation5 + $0x60] sm:$0xff]  ;;  %5062 = vmatprep.subr.mxu0 %v6377_v3  ;;  %v6390_v15 = vand.u32 4294901760, %v107_v12  ;;  %v6394_v17 = vand.u32 4294901760, %v106_v14  ;;  %v6397_v18 = vsub.f32 %v110_v0, %v6377_v3  ;;  %v6399_v19 = vld [vmem:[#allocation5 + $0x58] sm:$0xff]  ;;  %v6401_v20 = vld [vmem:[#allocation5 + $0xd0] sm:$0xff] }
  0x37   :  { %v6392_v16 = vand.u32 4294901760, %v91_v13  ;;  %v6403_v21 = vld [vmem:[#allocation5 + $0x50] sm:$0xff]  ;;  %5063 = vmatpush3.msra.mxu0 %v6379_v4  ;;  %v6407_v22 = vand.u32 4294901760, %v6399_v19  ;;  %v6410_v23 = vsub.f32 %v94_v1, %v6379_v4  ;;  %v6413_v24 = vand.u32 4294901760, %v6401_v20  ;;  %v6418_v26 = vld [vmem:[#allocation5 + $0xc8] sm:$0xff]  ;;  %v6422_v28 = vld [vmem:[#allocation5 + $0xc0] sm:$0xff] }
  0x38   :  { %v6416_v25 = vsub.f32 %v109_v2, %v6381_v5  ;;  %v6420_v27 = vld [vmem:[#allocation5 + $0x48] sm:$0xff]  ;;  %5064 = vmatprep.subr.mxu0 %v6381_v5  ;;  %v9402_v29 = vand.u32 4294901760, %v6397_v18  ;;  %v6427_v30 = vand.u32 4294901760, %v6403_v21  ;;  %v6430_v31 = vsub.f32 %v93_v6, %v6383_v9  ;;  %v6444_v37 = vld [vmem:[#allocation5 + $0x40] sm:$0xff]  ;;  %v6468_v46 = vld [vmem:[#allocation5 + $0xb8] sm:$0xff]  ;;  %s5051_s3 = sshll.u32 %s6333_s2, 4  ;;  %s5052_s3 = int_to_ptr.vmem [resolvable:$true] %s5051_s3 }
  0x39   :  { %9725 = vst [vmem:[#allocation15_spill] sm:$0xff] %v6413_v24  ;;  %v6433_v32 = vand.u32 4294901760, %v6418_v26  ;;  %5065 = vmatpush3.msra.mxu0 %v6383_v9  ;;  %v9400_v33 = vand.u32 4294901760, %v6410_v23  ;;  %v6439_v35 = vsub.f32 %v108_v7, %v6385_v10  ;;  %v6442_v36 = vand.u32 4294901760, %v6420_v27  ;;  %v6478_v51 = vld [vmem:[#allocation5 + $0x38] sm:$0xff]  ;;  %v6485_v56 = vld [vmem:[#allocation5 + $0xb0] sm:$0xff]  ;;  %p6302_p7 = scmp.lt.s32.totalorder %s5052_s3, %s5052_s3 }
  0x3a   :  { %9726 = vst [vmem:[#allocation16_spill] sm:$0xff] %v6427_v30  ;;  %v9399_v34 = vand.u32 4294901760, %v6416_v25  ;;  %5066 = vmatprep.subr.mxu0 %v6385_v10  ;;  %v467_v38 = vsub.f32 %v6397_v18, %v9402_v29  ;;  %v9397_v39 = vand.u32 4294901760, %v6430_v31  ;;  %v6452_v40 = vsub.f32 %v92_v8, %v6387_v11  ;;  %v6497_v61 = vld [vmem:[#allocation5 + $0x30] sm:$0xff]  ;;  %v6509_v2 = vld [vmem:[#allocation5 + $0xa8] sm:$0xff]  ;;  %s6297_s9 = scalar_lea.vmem %s5052_s3, 128 }
  0x3b   :  { %9727 = vst [vmem:[#allocation17_spill] sm:$0xff] %v6433_v32  ;;  %9728 = vst [vmem:[#allocation18_spill] sm:$0xff] %v6442_v36  ;;  %v6455_v41 = vand.u32 4294901760, %v6422_v28  ;;  %5067 = vmatpush3.msra.mxu0 %v6387_v11  ;;  %v355_v42 = vsub.f32 %v6410_v23, %v9400_v33  ;;  %v9395_v44 = vand.u32 4294901760, %v6439_v35  ;;  %v6466_v45 = vsub.f32 %v107_v12, %v6390_v15  ;;  %p6298_p6 = scmp.ne.s32.totalorder %s5052_s3, %s6297_s9  ;;  %p6303_p8 = scmp.lt.s32.totalorder %s6297_s9, %s6297_s9 }
  0x3c   :  { %v474_v43 = vsub.f32 %v6416_v25, %v9399_v34  ;;  %5068 = vmatprep.subr.mxu0 %v6390_v15  ;;  %v468_v47 = vand.u32 4294901760, %v467_v38  ;;  %v362_v48 = vsub.f32 %v6430_v31, %v9397_v39  ;;  %v9394_v49 = vand.u32 4294901760, %v6452_v40  ;;  %v6600_v39 = vld [vmem:[#allocation5 + $0x90] sm:$0xff] }
  0x3d   :  { %9729 = vst [vmem:[#allocation19_spill] sm:$0xff] %v6455_v41  ;;  %v6476_v50 = vand.u32 4294901760, %v6444_v37  ;;  %5069 = vmatpush3.msra.mxu0 %v6392_v16  ;;  %v356_v52 = vand.u32 4294901760, %v355_v42  ;;  %v481_v54 = vsub.f32 %v6439_v35, %v9395_v44  ;;  %v9392_v55 = vand.u32 4294901760, %v6466_v45  ;;  %v6610_v34 = vld [vmem:[#allocation5 + $0x10] sm:$0xff]  ;;  %p6304_p9 = por %p6303_p8, %p6302_p7 }
  0x3e   :  { %v475_v53 = vand.u32 4294901760, %v474_v43  ;;  %5070 = vmatprep.subr.mxu0 %v6394_v17  ;;  %5097 = vmatprep.subr.mxu1 %v468_v47  ;;  %v363_v57 = vand.u32 4294901760, %v362_v48  ;;  %v369_v58 = vsub.f32 %v6452_v40, %v9394_v49  ;;  %v6492_v59 = vsub.f32 %v91_v13, %v6392_v16  ;;  %v6520_v13 = vld [vmem:[#allocation5 + $0x28] sm:$0xff]  ;;  %v6587_v49 = vld [vmem:[#allocation5 + $0x18] sm:$0xff] }
  0x3f   :  { %9730 = vst [vmem:[#allocation20_spill] sm:$0xff] %v6476_v50  ;;  %v6495_v60 = vand.u32 4294901760, %v6468_v46  ;;  %5071 = vmatpush3.msra.mxu0 %v6407_v22  ;;  %5098 = vmatpush3.msra.mxu1 %v356_v52  ;;  %v482_v62 = vand.u32 4294901760, %v481_v54  ;;  %v488_v63 = vsub.f32 %v6466_v45, %v9392_v55  ;;  %v6504_v0 = vsub.f32 %v106_v14, %v6394_v17  ;;  %p6305_p10 = pnand %p6304_p9, %p6298_p6 }
  0x40   :  { %v6507_v1 = vand.u32 4294901760, %v6478_v51  ;;  %5072 = vmatprep.subr.mxu0 %v6413_v24  ;;  %5099 = vmatprep.subr.mxu1 %v475_v53  ;;  %v370_v6 = vand.u32 4294901760, %v369_v58  ;;  %v9390_v7 = vand.u32 4294901760, %v6492_v59  ;;  %v6515_v8 = vsub.f32 %v6399_v19, %v6407_v22 }
  0x41   :  { %9731 = vst [vmem:[#allocation21_spill] sm:$0xff] %v6495_v60  ;;  %v6518_v12 = vand.u32 4294901760, %v6485_v56  ;;  %5073 = vmatpush3.msra.mxu0 %v6427_v30  ;;  %5100 = vmatpush3.msra.mxu1 %v363_v57  ;;  %v489_v14 = vand.u32 4294901760, %v488_v63  ;;  %v9389_v38 = vand.u32 4294901760, %v6504_v0  ;;  %v6526_v42 = vsub.f32 %v6401_v20, %v6413_v24  ;;  %v6543_v20 = vld [vmem:[#allocation5 + $0xa0] sm:$0xff] }
  0x42   :  { %9732 = vst [vmem:[#allocation22_spill] sm:$0xff] %v6507_v1  ;;  %v6529_v43 = vand.u32 4294901760, %v6497_v61  ;;  %5074 = vmatprep.subr.mxu0 %v6433_v32  ;;  %5101 = vmatprep.subr.mxu1 %v482_v62  ;;  %v376_v19 = vsub.f32 %v6492_v59, %v9390_v7  ;;  %v9391_v47 = vand.u32 4294901760, %v6515_v8  ;;  %v6538_v48 = vsub.f32 %v6403_v21, %v6427_v30 }
  0x43   :  { %9733 = vst [vmem:[#allocation23_spill] sm:$0xff] %v6518_v12  ;;  %v6541_v52 = vand.u32 4294901760, %v6509_v2  ;;  %5075 = vmatpush3.msra.mxu0 %v6442_v36  ;;  %5102 = vmatpush3.msra.mxu1 %v370_v6  ;;  %v495_v53 = vsub.f32 %v6504_v0, %v9389_v38  ;;  %v9393_v54 = vand.u32 4294901760, %v6526_v42  ;;  %v6552_v57 = vsub.f32 %v6418_v26, %v6433_v32  ;;  %v6566_v38 = vld [vmem:[#allocation5 + $0x20] sm:$0xff] }
  0x44   :  { %9734 = vst [vmem:[#allocation24_spill] sm:$0xff] %v6529_v43  ;;  %v6555_v21 = vand.u32 4294901760, %v6520_v13  ;;  %5076 = vmatprep.subr.mxu0 %v6455_v41  ;;  %5103 = vmatprep.subr.mxu1 %v489_v14  ;;  %v377_v58 = vand.u32 4294901760, %v376_v19  ;;  %v383_v62 = vsub.f32 %v6515_v8, %v9391_v47  ;;  %v9396_v63 = vand.u32 4294901760, %v6538_v48  ;;  %v6576_v47 = vld [vmem:[#allocation5 + $0x98] sm:$0xff] }
  0x45   :  { %9735 = vst [vmem:[#allocation25_spill] sm:$0xff] %v6541_v52  ;;  %v6564_v6 = vsub.f32 %v6420_v27, %v6442_v36  ;;  %5077 = vmatpush3.msra.mxu0 %v6476_v50  ;;  %v496_v26 = vand.u32 4294901760, %v495_v53  ;;  %v502_v14 = vsub.f32 %v6526_v42, %v9393_v54  ;;  %v9398_v19 = vand.u32 4294901760, %v6552_v57  ;;  %v70_v36 = vld [vmem:[#allocation2 + $0x8] sm:$0xff] }
  0x46   :  { %9736 = vst [vmem:[#allocation26_spill] sm:$0xff] %v6555_v21  ;;  %v6574_v7 = vand.u32 4294901760, %v6543_v20  ;;  %5104 = vmatpush3.msra.mxu1 %v377_v58  ;;  %5078 = vmatprep.subr.mxu0 %v6495_v60  ;;  %v384_v27 = vand.u32 4294901760, %v383_v62  ;;  %v390_v55 = vsub.f32 %v6538_v48, %v9396_v63  ;;  %v6585_v54 = vsub.f32 %v6422_v28, %v6455_v41 }
  0x47   :  { %v9401_v53 = vand.u32 4294901760, %v6564_v6  ;;  %5105 = vmatprep.subr.mxu1 %v496_v26  ;;  %5079 = vmatpush3.msra.mxu0 %v6507_v1  ;;  %v503_v44 = vand.u32 4294901760, %v502_v14  ;;  %v509_v58 = vsub.f32 %v6552_v57, %v9398_v19  ;;  %v6594_v62 = vand.u32 4294901760, %v6566_v38 }
  0x48   :  { %9737 = vst [vmem:[#allocation27_spill] sm:$0xff] %v6574_v7  ;;  %v6598_v63 = vsub.f32 %v6444_v37, %v6476_v50  ;;  %5106 = vmatpush3.msra.mxu1 %v384_v27  ;;  %5080 = vmatprep.subr.mxu0 %v6518_v12  ;;  %v391_v28 = vand.u32 4294901760, %v390_v55  ;;  %v9405_v14 = vand.u32 4294901760, %v6585_v54  ;;  %v6608_v19 = vand.u32 4294901760, %v6576_v47 }
  0x49   :  { %9738 = vst [vmem:[#allocation28_spill] sm:$0xff] %v6594_v62  ;;  %v397_v26 = vsub.f32 %v6564_v6, %v9401_v53  ;;  %5107 = vmatprep.subr.mxu1 %v503_v44  ;;  %5081 = vmatpush3.msra.mxu0 %v6529_v43  ;;  %v510_v37 = vand.u32 4294901760, %v509_v58  ;;  %v6616_v55 = vsub.f32 %v6468_v46, %v6495_v60  ;;  %v6619_v33 = vand.u32 4294901760, %v6587_v49  ;;  %v6621_v53 = vld [vmem:[#allocation5 + $0x88] sm:$0xff] }
  0x4a   :  { %v9408_v27 = vand.u32 4294901760, %v6598_v63  ;;  %5108 = vmatpush3.msra.mxu1 %v391_v28  ;;  %5082 = vmatprep.subr.mxu0 %v6541_v52  ;;  %v516_v44 = vsub.f32 %v6585_v54, %v9405_v14  ;;  %v6629_v58 = vsub.f32 %v6478_v51, %v6507_v1  ;;  %v6632_v46 = vand.u32 4294901760, %v6600_v39  ;;  %v6646_v51 = vld [vmem:[#allocation5 + $0x8] sm:$0xff] }
  0x4b   :  { %9739 = vst [vmem:[#allocation29_spill] sm:$0xff] %v6619_v33  ;;  %v398_v29 = vand.u32 4294901760, %v397_v26  ;;  %5109 = vmatprep.subr.mxu1 %v510_v37  ;;  %5083 = vmatpush3.msra.mxu0 %v6555_v21  ;;  %v6641_v60 = vsub.f32 %v6485_v56, %v6518_v12  ;;  %v6644_v14 = vand.u32 4294901760, %v6610_v34  ;;  %v6655_v26 = vand.u32 4294901760, %v6621_v53  ;;  %v6657_v56 = vld [vmem:[#allocation5 + $0x80] sm:$0xff] }
  0x4c   :  { %9740 = vst [vmem:[#allocation30_spill] sm:$0xff] %v6632_v46  ;;  %v404_v28 = vsub.f32 %v6598_v63, %v9408_v27  ;;  %5084 = vmatprep.subr.mxu0 %v6574_v7  ;;  %v517_v37 = vand.u32 4294901760, %v516_v44  ;;  %v6652_v27 = vsub.f32 %v6497_v61, %v6529_v43  ;;  %v9743_v50 = vand.u32 4294901760, %v6616_v55  ;;  %v6680_v44 = vld [vmem:[#allocation5] sm:$0xff] }
  0x4d   :  { %9741 = vst [vmem:[#allocation31_spill] sm:$0xff] %v6644_v14  ;;  %5110 = vmatpush3.msra.mxu1 %v398_v29  ;;  %9742 = vst [vmem:[#allocation32_spill] sm:$0xff] %v6655_v26  ;;  %5085 = vmatpush3.msra.mxu0 %v6594_v62  ;;  %v6666_v1 = vsub.f32 %v6509_v2, %v6541_v52  ;;  %v9745_v61 = vand.u32 4294901760, %v6629_v58  ;;  %v6688_v41 = vand.u32 4294901760, %v6657_v56  ;;  %v6704_v24 = vand.u32 4294901760, %v6680_v44 }
  0x4e   :  { %v405_v12 = vand.u32 4294901760, %v404_v28  ;;  %v523_v29 = vsub.f32 %v6616_v55, %v9743_v50  ;;  %5111 = vmatprep.subr.mxu1 %v517_v37  ;;  %5086 = vmatprep.subr.mxu0 %v6608_v19  ;;  %v6674_v28 = vand.u32 4294901760, %v6646_v51  ;;  %v6678_v50 = vsub.f32 %v6520_v13, %v6555_v21 }
  0x4f   :  { %9744 = vst [vmem:[#allocation33_spill] sm:$0xff] %v6666_v1  ;;  %v411_v43 = vsub.f32 %v6629_v58, %v9745_v61  ;;  %5087 = vmatpush3.msra.mxu0 %v6619_v33  ;;  %v9746_v37 = vand.u32 4294901760, %v6641_v60  ;;  %v9747_v13 = vand.u32 4294901760, %v6652_v27  ;;  %v6697_v21 = vsub.f32 %v6543_v20, %v6574_v7 }
  0x50   :  { %5112 = vmatpush3.msra.mxu1 %v405_v12  ;;  %v524_v2 = vand.u32 4294901760, %v523_v29  ;;  %5088 = vmatprep.subr.mxu0 %v6632_v46  ;;  %v9748_v30 = vand.u32 4294901760, %v6666_v1  ;;  %v9749_v20 = vand.u32 4294901760, %v6678_v50  ;;  %v6715_v7 = vand.u32 4294901760, %v70_v36 }
  0x51   :  { %v530_v52 = vsub.f32 %v6641_v60, %v9746_v37  ;;  %v412_v32 = vand.u32 4294901760, %v411_v43  ;;  %v418_v12 = vsub.f32 %v6652_v27, %v9747_v13  ;;  %v69_v37 = vld [vmem:[#allocation2] sm:$0xff]  ;;  %5089 = vmatpush3.msra.mxu0 %v6644_v14  ;;  %v6708_v13 = vsub.f32 %v6566_v38, %v6594_v62 }
  0x52   :  { %5113 = vmatprep.subr.mxu1 %v524_v2  ;;  %v537_v43 = vsub.f32 %v6666_v1, %v9748_v30  ;;  %5090 = vmatprep.subr.mxu0 %v6655_v26  ;;  %v9433_v2 = vand.u32 4294901760, %v6697_v21  ;;  %9750 = vst [vmem:[#allocation34_spill] sm:$0xff] %v6715_v7  ;;  %v6723_v38 = vand.u32 4294901760, %v69_v37 }
  0x53   :  { %v531_v61 = vand.u32 4294901760, %v530_v52  ;;  %5114 = vmatpush3.msra.mxu1 %v412_v32  ;;  %v419_v29 = vand.u32 4294901760, %v418_v12  ;;  %v425_v52 = vsub.f32 %v6678_v50, %v9749_v20  ;;  %5091 = vmatpush3.msra.mxu0 %v6674_v28  ;;  %v9434_v1 = vand.u32 4294901760, %v6708_v13 }
  0x54   :  { %v538_v30 = vand.u32 4294901760, %v537_v43  ;;  %v6721_v32 = vsub.f32 %v6576_v47, %v6608_v19  ;;  %9751 = vst [vmem:[#allocation35_spill] sm:$0xff] %v6723_v38  ;;  %5092 = vmatprep.subr.mxu0 %v6688_v41  ;;  %v544_v20 = vsub.f32 %v6697_v21, %v9433_v2  ;;  %v6734_v43 = vsub.f32 %v6587_v49, %v6619_v33 }
  0x55   :  { %5115 = vmatprep.subr.mxu1 %v531_v61  ;;  %v426_v12 = vand.u32 4294901760, %v425_v52  ;;  %v6730_v61 = vsub.f32 %v70_v36, %v6715_v7  ;;  %5093 = vmatpush3.msra.mxu0 %v6704_v24  ;;  %v432_v47 = vsub.f32 %v6708_v13, %v9434_v1  ;;  %v6742_v52 = vsub.f32 %v69_v37, %v6723_v38 }
  0x56   :  { %5116 = vmatpush3.msra.mxu1 %v419_v29  ;;  %v6746_v36 = vsub.f32 %v6600_v39, %v6632_v46  ;;  %v545_v2 = vand.u32 4294901760, %v544_v20  ;;  %5132 = vmatprep.subr.mxu0 %v6397_v18  ;;  %v6753_v1 = vsub.f32 %v6610_v34, %v6644_v14  ;;  %v9752_v37 = vand.u32 4294901760, %v6721_v32 }
  0x57   :  { %5117 = vmatprep.subr.mxu1 %v538_v30  ;;  %v9439_v49 = vand.u32 4294901760, %v6730_v61  ;;  %v9442_v30 = vand.u32 4294901760, %v6734_v43  ;;  %v433_v29 = vand.u32 4294901760, %v432_v47  ;;  %576 = vmatprep.mubr.f32.mxu1 %v6715_v7  ;;  %v6780_v14 = vsub.f32 %v6646_v51, %v6674_v28 }
  0x58   :  { %5118 = vmatpush3.msra.mxu1 %v426_v12  ;;  %v551_v33 = vsub.f32 %v6721_v32, %v9752_v37  ;;  %v6770_v37 = vsub.f32 %v6621_v53, %v6655_v26  ;;  %v9753_v12 = vand.u32 4294901760, %v6742_v52  ;;  %v9754_v7 = vand.u32 4294901760, %v6746_v36 }
  0x59   :  { %5119 = vmatprep.subr.mxu1 %v545_v2  ;;  %v338_v20 = vsub.f32 %v6730_v61, %v9439_v49  ;;  %v439_v34 = vsub.f32 %v6734_v43, %v9442_v30  ;;  %9755 = vst [vmem:[#allocation36_spill] sm:$0xff] %v6780_v14  ;;  %v9756_v46 = vand.u32 4294901760, %v6753_v1 }
  0x5a   :  { %5120 = vmatpush3.msra.mxu1 %v433_v29  ;;  %v552_v39 = vand.u32 4294901760, %v551_v33  ;;  %v344_v2 = vsub.f32 %v6742_v52, %v9753_v12  ;;  %v558_v49 = vsub.f32 %v6746_v36, %v9754_v7  ;;  %v9450_v33 = vand.u32 4294901760, %v6770_v37 }
  0x5b   :  { %v339_v30 = vand.u32 4294901760, %v338_v20  ;;  %v440_v47 = vand.u32 4294901760, %v439_v34  ;;  %v446_v53 = vsub.f32 %v6753_v1, %v9756_v46  ;;  %v9449_v12 = vand.u32 4294901760, %v6780_v14 }
  0x5c   :  { %5121 = vmatprep.subr.mxu1 %v552_v39  ;;  %v345_v29 = vand.u32 4294901760, %v344_v2  ;;  %v559_v26 = vand.u32 4294901760, %v558_v49  ;;  %v6789_v7 = vsub.f32 %v6657_v56, %v6688_v41  ;;  %v565_v20 = vsub.f32 %v6770_v37, %v9450_v33 }
  0x5d   :  { %340 = vmatprep.mubr.f32.mxu0 %v339_v30  ;;  %5122 = vmatpush3.msra.mxu1 %v440_v47  ;;  %v447_v51 = vand.u32 4294901760, %v446_v53  ;;  %v6796_v46 = vsub.f32 %v6680_v44, %v6704_v24  ;;  %v453_v49 = vsub.f32 %v6780_v14, %v9449_v12  ;;  %v9759_v53 = vld [vmem:[#allocation15_spill] sm:$0xff]  ;;  %v9773_v33 = vand.u32 4294901760, %v6397_v18 }
  0x5e   :  { %9757 = vst [vmem:[#allocation37_spill] sm:$0xff] %v6789_v7  ;;  %346 = vmatmul.mubr.f32.vlgmr.msra.gmra.mxu0 %v345_v29  ;;  %5123 = vmatprep.subr.mxu1 %v559_v26  ;;  %v9448_v56 = vand.u32 4294901760, %v6789_v7  ;;  %v566_v30 = vand.u32 4294901760, %v565_v20  ;;  %v9760_v29 = vld [vmem:[#allocation16_spill] sm:$0xff]  ;;  %v9762_v20 = vld [vmem:[#allocation17_spill] sm:$0xff]  ;;  %v9772_v12 = vld [vmem:[#allocation27_spill] sm:$0xff] }
  0x5f   :  { %9758 = vst [vmem:[#allocation38_spill] sm:$0xff] %v6796_v46  ;;  %5133 = vmatpush3.msra.mxu0 %v6410_v23  ;;  %5124 = vmatpush3.msra.mxu1 %v447_v51  ;;  %v9447_v39 = vand.u32 4294901760, %v6796_v46  ;;  %v454_v34 = vand.u32 4294901760, %v453_v49  ;;  %v9761_v51 = vld [vmem:[#allocation33_spill] sm:$0xff]  ;;  %v9763_v49 = vld [vmem:[#allocation18_spill] sm:$0xff]  ;;  %v9781_v18 = vand.u32 4294901760, %v6439_v35 }
  0x60   :  { %5134 = vmatprep.subr.mxu0 %v6416_v25  ;;  %v572_v44 = vsub.f32 %v6789_v7, %v9448_v56  ;;  %713 = vmatprep.mubr.f32.mxu0 %v6730_v61  ;;  %v9771_v56 = vld [vmem:[#allocation26_spill] sm:$0xff] }
  0x61   :  { %5135 = vmatpush3.msra.mxu0 %v6430_v31  ;;  %5125 = vmatprep.subr.mxu1 %v566_v30  ;;  %v460_v26 = vsub.f32 %v6796_v46, %v9447_v39  ;;  %v9764_v30 = vld [vmem:[#allocation19_spill] sm:$0xff]  ;;  %v9770_v39 = vld [vmem:[#allocation25_spill] sm:$0xff] }
  0x62   :  { %5136 = vmatprep.subr.mxu0 %v6439_v35  ;;  %5126 = vmatpush3.msra.mxu1 %v454_v34  ;;  %v573_v47 = vand.u32 4294901760, %v572_v44  ;;  %v9765_v34 = vld [vmem:[#allocation20_spill] sm:$0xff]  ;;  %v9766_v44 = vld [vmem:[#allocation21_spill] sm:$0xff]  ;;  %v9786_v35 = vand.u32 4294901760, %v6742_v52 }
  0x63   :  { %5137 = vmatpush3.msra.mxu0 %v6452_v40  ;;  %v461_v2 = vand.u32 4294901760, %v460_v26  ;;  %v9767_v26 = vld [vmem:[#allocation22_spill] sm:$0xff] }
  0x64   :  { %5127 = vmatprep.subr.mxu1 %v573_v47  ;;  %5138 = vmatprep.subr.mxu0 %v6466_v45  ;;  %v9768_v47 = vld [vmem:[#allocation23_spill] sm:$0xff] }
  0x65   :  { %5128 = vmatpush3.msra.mxu1 %v461_v2  ;;  %5139 = vmatpush3.msra.mxu0 %v6492_v59  ;;  %v9769_v2 = vld [vmem:[#allocation24_spill] sm:$0xff] }
  0x66   :  { %578 = vmatmul.mubr.f32.vlgmr.msra.gmra.mxu1 %v6723_v38  ;;  %5140 = vmatprep.subr.mxu0 %v6504_v0  ;;  %v9774_v38 = vld [vmem:[#allocation29_spill] sm:$0xff] }
  0x67   :  { %5167 = vmatprep.subr.mxu1 %v6377_v3  ;;  %5141 = vmatpush3.msra.mxu0 %v6515_v8 }
  0x68   :  { %5168 = vmatpush3.msra.mxu1 %v6379_v4  ;;  %5142 = vmatprep.subr.mxu0 %v6526_v42 }
  0x69   :  { %5169 = vmatprep.subr.mxu1 %v6381_v5  ;;  %5143 = vmatpush3.msra.mxu0 %v6538_v48 }
  0x6a   :  { %5170 = vmatpush3.msra.mxu1 %v6383_v9  ;;  %5144 = vmatprep.subr.mxu0 %v6552_v57 }
  0x6b   :  { %5171 = vmatprep.subr.mxu1 %v6385_v10  ;;  %5145 = vmatpush3.msra.mxu0 %v6564_v6 }
  0x6c   :  { %5172 = vmatpush3.msra.mxu1 %v6387_v11  ;;  %5146 = vmatprep.subr.mxu0 %v6585_v54 }
  0x6d   :  { %5173 = vmatprep.subr.mxu1 %v6390_v15  ;;  %5147 = vmatpush3.msra.mxu0 %v6598_v63 }
  0x6e   :  { %5174 = vmatpush3.msra.mxu1 %v6392_v16  ;;  %5148 = vmatprep.subr.mxu0 %v6616_v55 }
  0x6f   :  { %5175 = vmatprep.subr.mxu1 %v6394_v17  ;;  %5149 = vmatpush3.msra.mxu0 %v6629_v58 }
  0x70   :  { %5176 = vmatpush3.msra.mxu1 %v6407_v22  ;;  %5150 = vmatprep.subr.mxu0 %v6641_v60 }
  0x71   :  { %5177 = vmatprep.subr.mxu1 %v9759_v53  ;;  %5151 = vmatpush3.msra.mxu0 %v6652_v27 }
  0x72   :  { %5178 = vmatpush3.msra.mxu1 %v9760_v29  ;;  %5152 = vmatprep.subr.mxu0 %v9761_v51 }
  0x73   :  { %5179 = vmatprep.subr.mxu1 %v9762_v20  ;;  %5153 = vmatpush3.msra.mxu0 %v6678_v50 }
  0x74   :  { %5180 = vmatpush3.msra.mxu1 %v9763_v49  ;;  %5154 = vmatprep.subr.mxu0 %v6697_v21 }
  0x75   :  { %5181 = vmatprep.subr.mxu1 %v9764_v30  ;;  %5155 = vmatpush3.msra.mxu0 %v6708_v13 }
  0x76   :  { %5182 = vmatpush3.msra.mxu1 %v9765_v34  ;;  %5156 = vmatprep.subr.mxu0 %v6721_v32 }
  0x77   :  { %5183 = vmatprep.subr.mxu1 %v9766_v44  ;;  %5157 = vmatpush3.msra.mxu0 %v6734_v43 }
  0x78   :  { %5184 = vmatpush3.msra.mxu1 %v9767_v26  ;;  %5158 = vmatprep.subr.mxu0 %v6746_v36 }
  0x79   :  { %5185 = vmatprep.subr.mxu1 %v9768_v47  ;;  %5159 = vmatpush3.msra.mxu0 %v6753_v1 }
  0x7a   :  { %5186 = vmatpush3.msra.mxu1 %v9769_v2  ;;  %5160 = vmatprep.subr.mxu0 %v6770_v37 }
  0x7b   :  { %5187 = vmatprep.subr.mxu1 %v9770_v39  ;;  %5161 = vmatpush3.msra.mxu0 %v6780_v14  ;;  %v9775_v14 = vand.u32 4294901760, %v6410_v23  ;;  %v9782_v23 = vand.u32 4294901760, %v6452_v40  ;;  %v9788_v40 = vand.u32 4294901760, %v6515_v8  ;;  %v126_v8 = vld [vmem:[#allocation5 + $0x178] sm:$0xff] }
  0x7c   :  { %5188 = vmatpush3.msra.mxu1 %v9771_v56  ;;  %5162 = vmatprep.subr.mxu0 %v6789_v7  ;;  %v9776_v56 = vld [vmem:[#allocation30_spill] sm:$0xff]  ;;  %v9780_v7 = vld [vmem:[#allocation32_spill] sm:$0xff] }
  0x7d   :  { %5189 = vmatprep.subr.mxu1 %v9772_v12  ;;  %5163 = vmatpush3.msra.mxu0 %v6796_v46  ;;  %v9777_v12 = vand.u32 4294901760, %v6416_v25  ;;  %v9778_v46 = vld [vmem:[#allocation31_spill] sm:$0xff]  ;;  %v9783_v25 = vand.u32 4294901760, %v6466_v45  ;;  %v9789_v45 = vand.u32 4294901760, %v6526_v42  ;;  %v9793_v42 = vand.u32 4294901760, %v6585_v54  ;;  %v124_v54 = vld [vmem:[#allocation5 + $0x168] sm:$0xff] }
  0x7e   :  { %5190 = vmatpush3.msra.mxu1 %v6594_v62  ;;  %716 = vmatmul.mubr.f32.vlgmr.msra.gmra.mxu0 %v6742_v52  ;;  %v9779_v62 = vand.u32 4294901760, %v6430_v31  ;;  %v9784_v31 = vand.u32 4294901760, %v6730_v61  ;;  %v6939_v61 = vand.u32 4294901760, %v124_v54 }
  0x7f   :  { %5191 = vmatprep.subr.mxu1 %v6608_v19  ;;  %5202 = vmatprep.subr.mxu0 %v9773_v33  ;;  %v9802_v33 = vand.u32 4294901760, %v6678_v50 }
  0x80   :  { %5192 = vmatpush3.msra.mxu1 %v9774_v38  ;;  %5203 = vmatpush3.msra.mxu0 %v9775_v14  ;;  %v9787_v14 = vand.u32 4294901760, %v6504_v0  ;;  %v9791_v0 = vand.u32 4294901760, %v6552_v57  ;;  %v141_v57 = vld [vmem:[#allocation5 + $0x1f0] sm:$0xff]  ;;  %9799 = vst [vmem:[#allocation15_spill] sm:$0xff] %v6939_v61  ;;  %v6967_v50 = vsub.f32 %v124_v54, %v6939_v61 }
  0x81   :  { %5193 = vmatprep.subr.mxu1 %v9776_v56  ;;  %5204 = vmatprep.subr.mxu0 %v9777_v12  ;;  %v9821_v54 = vld [vmem:[#allocation27_spill] sm:$0xff] }
  0x82   :  { %5194 = vmatpush3.msra.mxu1 %v9778_v46  ;;  %5205 = vmatpush3.msra.mxu0 %v9779_v62  ;;  %v9785_v62 = vand.u32 4294901760, %v6492_v59  ;;  %v9790_v59 = vand.u32 4294901760, %v6538_v48 }
  0x83   :  { %5195 = vmatprep.subr.mxu1 %v9780_v7  ;;  %5206 = vmatprep.subr.mxu0 %v9781_v18  ;;  %v122_v18 = vld [vmem:[#allocation5 + $0x158] sm:$0xff] }
  0x84   :  { %5196 = vmatpush3.msra.mxu1 %v6674_v28  ;;  %5207 = vmatpush3.msra.mxu0 %v9782_v23 }
  0x85   :  { %5197 = vmatprep.subr.mxu1 %v6688_v41  ;;  %5208 = vmatprep.subr.mxu0 %v9783_v25  ;;  %v121_v25 = vld [vmem:[#allocation5 + $0x150] sm:$0xff] }
  0x86   :  { %5198 = vmatpush3.msra.mxu1 %v6704_v24  ;;  %820 = vmatprep.mubr.f32.mxu1 %v9784_v31  ;;  %v9807_v31 = vand.u32 4294901760, %v6734_v43  ;;  %v9812_v43 = vand.u32 4294901760, %v6753_v1 }
  0x87   :  { %5209 = vmatpush3.msra.mxu0 %v9785_v62  ;;  %824 = vmatmul.mubr.f32.vlgmr.msra.gmra.mxu1 %v9786_v35  ;;  %v137_v35 = vld [vmem:[#allocation5 + $0x1d0] sm:$0xff] }
  0x88   :  { %5210 = vmatprep.subr.mxu0 %v9787_v14  ;;  %5237 = vmatprep.subr.mxu1 %v6377_v3  ;;  %v9792_v3 = vand.u32 4294901760, %v6564_v6  ;;  %v9796_v6 = vand.u32 4294901760, %v6629_v58  ;;  %v123_v58 = vld [vmem:[#allocation5 + $0x160] sm:$0xff] }
  0x89   :  { %5211 = vmatpush3.msra.mxu0 %v9788_v40  ;;  %5238 = vmatpush3.msra.mxu1 %v6379_v4  ;;  %v142_v4 = vld [vmem:[#allocation5 + $0x1f8] sm:$0xff] }
  0x8a   :  { %5212 = vmatprep.subr.mxu0 %v9789_v45  ;;  %5239 = vmatprep.subr.mxu1 %v6381_v5  ;;  %v125_v5 = vld [vmem:[#allocation5 + $0x170] sm:$0xff]  ;;  %v6922_v48 = vand.u32 4294901760, %v142_v4  ;;  %v6994_v45 = vand.u32 4294901760, %v122_v18 }
  0x8b   :  { %5213 = vmatpush3.msra.mxu0 %v9790_v59  ;;  %5240 = vmatpush3.msra.mxu1 %v6383_v9  ;;  %v9794_v9 = vand.u32 4294901760, %v6598_v63  ;;  %v140_v63 = vld [vmem:[#allocation5 + $0x1e8] sm:$0xff]  ;;  %v7000_v59 = vand.u32 4294901760, %v121_v25 }
  0x8c   :  { %5214 = vmatprep.subr.mxu0 %v9791_v0  ;;  %5241 = vmatprep.subr.mxu1 %v6385_v10  ;;  %v9795_v10 = vand.u32 4294901760, %v6616_v55  ;;  %v6937_v55 = vand.u32 4294901760, %v141_v57  ;;  %v6947_v52 = vand.u32 4294901760, %v140_v63  ;;  %9811 = vst [vmem:[#allocation19_spill] sm:$0xff] %v6994_v45  ;;  %v9457_v0 = vand.u32 4294901760, %v6967_v50 }
  0x8d   :  { %5215 = vmatpush3.msra.mxu0 %v9792_v3  ;;  %5242 = vmatpush3.msra.mxu1 %v6387_v11  ;;  %v6924_v11 = vand.u32 4294901760, %v126_v8  ;;  %9813 = vst [vmem:[#allocation20_spill] sm:$0xff] %v7000_v59 }
  0x8e   :  { %5216 = vmatprep.subr.mxu0 %v9793_v42  ;;  %5243 = vmatprep.subr.mxu1 %v6390_v15  ;;  %v6929_v15 = vand.u32 4294901760, %v125_v5  ;;  %9801 = vst [vmem:[#allocation16_spill] sm:$0xff] %v6947_v52  ;;  %v6970_v23 = vsub.f32 %v141_v57, %v6937_v55  ;;  %v9816_v42 = vld [vmem:[#allocation36_spill] sm:$0xff] }
  0x8f   :  { %5217 = vmatpush3.msra.mxu0 %v9794_v9  ;;  %5244 = vmatpush3.msra.mxu1 %v6392_v16  ;;  %v9797_v16 = vand.u32 4294901760, %v6641_v60  ;;  %v6945_v60 = vsub.f32 %v126_v8, %v6924_v11 }
  0x90   :  { %5218 = vmatprep.subr.mxu0 %v9795_v10  ;;  %5245 = vmatprep.subr.mxu1 %v6394_v17  ;;  %v9798_v17 = vand.u32 4294901760, %v6652_v27  ;;  %v6950_v27 = vsub.f32 %v142_v4, %v6922_v48  ;;  %v6956_v12 = vsub.f32 %v125_v5, %v6929_v15  ;;  %v136_v4 = vld [vmem:[#allocation5 + $0x1c8] sm:$0xff]  ;;  %v9819_v10 = vld [vmem:[#allocation37_spill] sm:$0xff] }
  0x91   :  { %5219 = vmatpush3.msra.mxu0 %v9796_v6  ;;  %5246 = vmatpush3.msra.mxu1 %v6407_v22  ;;  %v9800_v22 = vand.u32 4294901760, %v9761_v51  ;;  %v6961_v51 = vand.u32 4294901760, %v123_v58  ;;  %v9818_v5 = vld [vmem:[#allocation26_spill] sm:$0xff]  ;;  %v9820_v57 = vand.u32 4294901760, %v9819_v10  ;;  %v7034_v6 = vsub.f32 %v122_v18, %v6994_v45 }
  0x92   :  { %5220 = vmatprep.subr.mxu0 %v9797_v16  ;;  %5247 = vmatprep.subr.mxu1 %v9759_v53  ;;  %v9803_v53 = vand.u32 4294901760, %v6697_v21  ;;  %v9806_v21 = vand.u32 4294901760, %v6721_v32  ;;  %v9459_v32 = vand.u32 4294901760, %v6956_v12  ;;  %v135_v16 = vld [vmem:[#allocation5 + $0x1c0] sm:$0xff]  ;;  %v7051_v18 = vsub.f32 %v121_v25, %v7000_v59 }
  0x93   :  { %5221 = vmatpush3.msra.mxu0 %v9798_v17  ;;  %5248 = vmatpush3.msra.mxu1 %v9760_v29  ;;  %v139_v29 = vld [vmem:[#allocation5 + $0x1e0] sm:$0xff]  ;;  %9804 = vst [vmem:[#allocation33_spill] sm:$0xff] %v6961_v51  ;;  %v6990_v14 = vsub.f32 %v123_v58, %v6961_v51 }
  0x94   :  { %5222 = vmatprep.subr.mxu0 %v9800_v22  ;;  %5249 = vmatprep.subr.mxu1 %v9762_v20  ;;  %v9805_v20 = vand.u32 4294901760, %v6708_v13  ;;  %v9462_v13 = vand.u32 4294901760, %v6945_v60  ;;  %v6983_v62 = vand.u32 4294901760, %v139_v29  ;;  %v119_v17 = vld [vmem:[#allocation5 + $0x140] sm:$0xff] }
  0x95   :  { %5223 = vmatpush3.msra.mxu0 %v9802_v33  ;;  %5250 = vmatpush3.msra.mxu1 %v9763_v49  ;;  %v138_v49 = vld [vmem:[#allocation5 + $0x1d8] sm:$0xff]  ;;  %v9460_v58 = vand.u32 4294901760, %v6990_v14  ;;  %v9823_v33 = vld [vmem:[#allocation38_spill] sm:$0xff] }
  0x96   :  { %5224 = vmatprep.subr.mxu0 %v9803_v53  ;;  %5251 = vmatprep.subr.mxu1 %v9764_v30  ;;  %v9463_v30 = vand.u32 4294901760, %v6950_v27  ;;  %9808 = vst [vmem:[#allocation17_spill] sm:$0xff] %v6983_v62  ;;  %v6992_v40 = vand.u32 4294901760, %v138_v49  ;;  %v7014_v1 = vsub.f32 %v6945_v60, %v9462_v13  ;;  %v7028_v9 = vsub.f32 %v139_v29, %v6983_v62  ;;  %v9825_v29 = vld [vmem:[#allocation34_spill] sm:$0xff] }
  0x97   :  { %5225 = vmatpush3.msra.mxu0 %v9805_v20  ;;  %5252 = vmatpush3.msra.mxu1 %v9765_v34  ;;  %v6978_v34 = vsub.f32 %v140_v63, %v6947_v52  ;;  %v9824_v53 = vand.u32 4294901760, %v9823_v33  ;;  %v118_v33 = vld [vmem:[#allocation5 + $0x138] sm:$0xff] }
  0x98   :  { %5226 = vmatprep.subr.mxu0 %v9806_v21  ;;  %5253 = vmatprep.subr.mxu1 %v9766_v44  ;;  %v9809_v44 = vand.u32 4294901760, %v6746_v36  ;;  %9810 = vst [vmem:[#allocation18_spill] sm:$0xff] %v6992_v40  ;;  %v120_v36 = vld [vmem:[#allocation5 + $0x148] sm:$0xff]  ;;  %v7009_v3 = vsub.f32 %v6950_v27, %v9463_v30  ;;  %v7040_v22 = vsub.f32 %v138_v49, %v6992_v40  ;;  %v7053_v21 = vand.u32 4294901760, %v136_v4 }
  0x99   :  { %5227 = vmatpush3.msra.mxu0 %v9807_v31  ;;  %5254 = vmatpush3.msra.mxu1 %v9767_v26  ;;  %v9461_v26 = vand.u32 4294901760, %v6970_v23  ;;  %v9458_v8 = vand.u32 4294901760, %v6978_v34  ;;  %v7036_v63 = vand.u32 4294901760, %v120_v36  ;;  %v7058_v49 = vsub.f32 %v6967_v50, %v9457_v0  ;;  %v9827_v31 = vld [vmem:[#allocation28_spill] sm:$0xff]  ;;  %v117_v0 = vld [vmem:[#allocation5 + $0x130] sm:$0xff]  ;;  %v116_v30 = vld [vmem:[#allocation5 + $0x128] sm:$0xff] }
  0x9a   :  { %5228 = vmatprep.subr.mxu0 %v9809_v44  ;;  %5255 = vmatprep.subr.mxu1 %v9768_v47  ;;  %v9814_v47 = vand.u32 4294901760, %v6770_v37  ;;  %v9817_v37 = vand.u32 4294901760, %v9816_v42  ;;  %9826 = vst [vmem:[#allocation23_spill] sm:$0xff] %v7053_v21  ;;  %v9828_v44 = vld [vmem:[#allocation35_spill] sm:$0xff]  ;;  %v9464_v10 = vand.u32 4294901760, %v7028_v9  ;;  %v7107_v13 = vand.u32 4294901760, %v118_v33 }
  0x9b   :  { %5229 = vmatpush3.msra.mxu0 %v9812_v43  ;;  %5256 = vmatpush3.msra.mxu1 %v9769_v2  ;;  %v7016_v2 = vand.u32 4294901760, %v137_v35  ;;  %9822 = vst [vmem:[#allocation22_spill] sm:$0xff] %v7036_v63  ;;  %v7048_v20 = vsub.f32 %v6970_v23, %v9461_v26  ;;  %v7067_v25 = vsub.f32 %v6978_v34, %v9458_v8  ;;  %v7120_v8 = vand.u32 4294901760, %v117_v0  ;;  %v131_v43 = vld [vmem:[#allocation5 + $0x1a0] sm:$0xff] }
  0x9c   :  { %5230 = vmatprep.subr.mxu0 %v9814_v47  ;;  %5257 = vmatprep.subr.mxu1 %v9770_v39  ;;  %v7025_v39 = vsub.f32 %v6956_v12, %v9459_v32  ;;  %v9467_v32 = vand.u32 4294901760, %v7051_v18  ;;  %9833 = vst [vmem:[#allocation31_spill] sm:$0xff] %v7107_v13  ;;  %v7149_v47 = vand.u32 4294901760, %v116_v30 }
  0x9d   :  { %9815 = vst [vmem:[#allocation21_spill] sm:$0xff] %v7016_v2  ;;  %5231 = vmatpush3.msra.mxu0 %v9817_v37  ;;  %5258 = vmatpush3.msra.mxu1 %v9818_v5  ;;  %v7070_v42 = vsub.f32 %v137_v35, %v7016_v2  ;;  %v7075_v5 = vand.u32 4294901760, %v135_v16  ;;  %v7083_v35 = vsub.f32 %v120_v36, %v7036_v63  ;;  %v7096_v36 = vld [vmem:[#allocation5 + $0x1b0] sm:$0xff]  ;;  %9835 = vst [vmem:[#allocation36_spill] sm:$0xff] %v7120_v8  ;;  %v115_v37 = vld [vmem:[#allocation5 + $0x120] sm:$0xff] }
  0x9e   :  { %5232 = vmatprep.subr.mxu0 %v9820_v57  ;;  %5259 = vmatprep.subr.mxu1 %v9821_v54  ;;  %v7078_v57 = vand.u32 4294901760, %v119_v17  ;;  %v134_v54 = vld [vmem:[#allocation5 + $0x1b8] sm:$0xff]  ;;  %9838 = vst [vmem:[#allocation27_spill] sm:$0xff] %v7149_v47 }
  0x9f   :  { %5233 = vmatpush3.msra.mxu0 %v9824_v53  ;;  %990 = vmatprep.mubr.f32.mxu0 %v9825_v29  ;;  %9829 = vst [vmem:[#allocation24_spill] sm:$0xff] %v7075_v5  ;;  %9831 = vst [vmem:[#allocation29_spill] sm:$0xff] %v7083_v35  ;;  %v9465_v53 = vand.u32 4294901760, %v7040_v22  ;;  %v7123_v26 = vsub.f32 %v135_v16, %v7075_v5  ;;  %v7139_v16 = vand.u32 4294901760, %v7096_v36 }
  0xa0   :  { %5260 = vmatpush3.msra.mxu1 %v9827_v31  ;;  %992 = vmatmul.mubr.f32.vlgmr.msra.gmra.mxu0 %v9828_v44  ;;  %9830 = vst [vmem:[#allocation25_spill] sm:$0xff] %v7078_v57  ;;  %v9466_v31 = vand.u32 4294901760, %v7034_v6 }
  0xa1   :  { %5261 = vmatprep.subr.mxu1 %v6608_v19  ;;  %5272 = vmatprep.subr.mxu0 %v6922_v48  ;;  %v7088_v19 = vsub.f32 %v6990_v14, %v9460_v58  ;;  %v7100_v58 = vsub.f32 %v136_v4, %v7053_v21  ;;  %v7115_v4 = vsub.f32 %v7028_v9, %v9464_v10 }
  0xa2   :  { %5262 = vmatpush3.msra.mxu1 %v9774_v38  ;;  %5273 = vmatpush3.msra.mxu0 %v6924_v11  ;;  %v1337_v38 = vand.u32 4294901760, %v7048_v20  ;;  %v9470_v20 = vand.u32 4294901760, %v7070_v42  ;;  %9836 = vst [vmem:[#allocation26_spill] sm:$0xff] %v7123_v26  ;;  %v7131_v10 = vsub.f32 %v7040_v22, %v9465_v53  ;;  %9837 = vst [vmem:[#allocation37_spill] sm:$0xff] %v7139_v16 }
  0xa3   :  { %5263 = vmatprep.subr.mxu1 %v9776_v56  ;;  %5274 = vmatprep.subr.mxu0 %v6937_v55  ;;  %v7105_v56 = vand.u32 4294901760, %v134_v54 }
  0xa4   :  { %5264 = vmatpush3.msra.mxu1 %v9778_v46  ;;  %5275 = vmatpush3.msra.mxu0 %v6929_v15  ;;  %v7118_v46 = vsub.f32 %v119_v17, %v7078_v57  ;;  %v7136_v17 = vsub.f32 %v7034_v6, %v9466_v31 }
  0xa5   :  { %9832 = vst [vmem:[#allocation30_spill] sm:$0xff] %v7105_v56  ;;  %5265 = vmatprep.subr.mxu1 %v9780_v7  ;;  %5276 = vmatprep.subr.mxu0 %v6947_v52  ;;  %v132_v7 = vld [vmem:[#allocation5 + $0x1a8] sm:$0xff]  ;;  %v7165_v53 = vsub.f32 %v134_v54, %v7105_v56  ;;  %v1358_v54 = vand.u32 4294901760, %v7131_v10  ;;  %v7194_v10 = vsub.f32 %v116_v30, %v7149_v47  ;;  %v113_v52 = vld [vmem:[#allocation5 + $0x110] sm:$0xff] }
  0xa6   :  { %9834 = vst [vmem:[#allocation32_spill] sm:$0xff] %v7118_v46  ;;  %5266 = vmatpush3.msra.mxu1 %v6674_v28  ;;  %5277 = vmatpush3.msra.mxu0 %v6939_v61  ;;  %v7146_v28 = vsub.f32 %v7051_v18, %v9467_v32  ;;  %v7160_v32 = vsub.f32 %v7070_v42, %v9470_v20  ;;  %v9841_v20 = vand.u32 4294901760, %v7009_v3  ;;  %v7180_v61 = vand.u32 4294901760, %v132_v7 }
  0xa7   :  { %5267 = vmatprep.subr.mxu1 %v6688_v41  ;;  %5278 = vmatprep.subr.mxu0 %v6983_v62  ;;  %v7155_v41 = vsub.f32 %v118_v33, %v7107_v13  ;;  %v7162_v62 = vand.u32 4294901760, %v115_v37  ;;  %9840 = vst [vmem:[#allocation34_spill] sm:$0xff] %v7165_v53  ;;  %v9843_v33 = vand.u32 4294901760, %v7014_v1  ;;  %v9844_v3 = vand.u32 4294901760, %v7100_v58 }
  0xa8   :  { %5268 = vmatpush3.msra.mxu1 %v6704_v24  ;;  %1094 = vmatprep.mubr.f32.mxu1 %v9825_v29  ;;  %v1351_v24 = vand.u32 4294901760, %v7115_v4  ;;  %v7171_v29 = vsub.f32 %v117_v0, %v7120_v8  ;;  %9842 = vst [vmem:[#allocation28_spill] sm:$0xff] %v7180_v61  ;;  %v114_v4 = vld [vmem:[#allocation5 + $0x118] sm:$0xff]  ;;  %v72_v0 = vld [vmem:[#allocation2 + $0x18] sm:$0xff]  ;;  %v1365_v1 = vand.u32 4294901760, %v7160_v32  ;;  %v7209_v30 = vsub.f32 %v7096_v36, %v7139_v16 }
  0xa9   :  { %9839 = vst [vmem:[#allocation38_spill] sm:$0xff] %v7162_v62  ;;  %5279 = vmatpush3.msra.mxu0 %v6961_v51  ;;  %1096 = vmatmul.mubr.f32.vlgmr.msra.gmra.mxu1 %v9828_v44  ;;  %v1246_v51 = vand.u32 4294901760, %v7136_v17  ;;  %v7182_v44 = vand.u32 4294901760, %v131_v43  ;;  %v9845_v17 = vand.u32 4294901760, %v7083_v35  ;;  %v9849_v32 = vand.u32 4294901760, %v7118_v46 }
  0xaa   :  { %5280 = vmatprep.subr.mxu0 %v6992_v40  ;;  %5307 = vmatprep.subr.mxu1 %v9841_v20  ;;  %v7191_v20 = vsub.f32 %v7100_v58, %v9844_v3  ;;  %v130_v3 = vld [vmem:[#allocation5 + $0x198] sm:$0xff]  ;;  %v7224_v31 = vand.u32 4294901760, %v114_v4  ;;  %v7226_v36 = vand.u32 4294901760, %v72_v0 }
  0xab   :  { %5281 = vmatpush3.msra.mxu0 %v6994_v45  ;;  %5308 = vmatpush3.msra.mxu1 %v9843_v33  ;;  %v7199_v40 = vsub.f32 %v7083_v35, %v9845_v17  ;;  %v71_v45 = vld [vmem:[#allocation2 + $0x10] sm:$0xff]  ;;  %v7204_v33 = vsub.f32 %v115_v37, %v7162_v62  ;;  %v9847_v17 = vand.u32 4294901760, %v7025_v39  ;;  %v7222_v37 = vsub.f32 %v7118_v46, %v9849_v32  ;;  %v129_v35 = vld [vmem:[#allocation5 + $0x190] sm:$0xff] }
  0xac   :  { %5282 = vmatprep.subr.mxu0 %v7016_v2  ;;  %5309 = vmatprep.subr.mxu1 %v1337_v38  ;;  %v9848_v2 = vand.u32 4294901760, %v7123_v26  ;;  %9850 = vst [vmem:[#allocation39_spill] sm:$0xff] %v7226_v36  ;;  %v9851_v39 = vand.u32 4294901760, %v7067_v25  ;;  %v9853_v32 = vand.u32 4294901760, %v7058_v49  ;;  %v1372_v46 = vand.u32 4294901760, %v7191_v20 }
  0xad   :  { %9846 = vst [vmem:[#allocation35_spill] sm:$0xff] %v7204_v33  ;;  %5283 = vmatpush3.msra.mxu0 %v7000_v59  ;;  %5310 = vmatpush3.msra.mxu1 %v9847_v17  ;;  %v7232_v59 = vand.u32 4294901760, %v113_v52  ;;  %v7244_v25 = vand.u32 4294901760, %v130_v3  ;;  %v7257_v20 = vsub.f32 %v131_v43, %v7182_v44  ;;  %v9857_v43 = vand.u32 4294901760, %v7155_v41 }
  0xae   :  { %v7217_v38 = vsub.f32 %v7123_v26, %v9848_v2  ;;  %5284 = vmatprep.subr.mxu0 %v7053_v21  ;;  %5311 = vmatprep.subr.mxu1 %v9851_v39  ;;  %v7235_v2 = vsub.f32 %v132_v7, %v7180_v61  ;;  %v7237_v26 = vand.u32 4294901760, %v71_v45  ;;  %v1260_v21 = vand.u32 4294901760, %v7199_v40 }
  0xaf   :  { %5285 = vmatpush3.msra.mxu0 %v7036_v63  ;;  %5312 = vmatpush3.msra.mxu1 %v9853_v32  ;;  %v9854_v7 = vand.u32 4294901760, %v7165_v53  ;;  %v7253_v63 = vand.u32 4294901760, %v129_v35  ;;  %v128_v32 = vld [vmem:[#allocation5 + $0x188] sm:$0xff]  ;;  %v9856_v40 = vand.u32 4294901760, %v7088_v19  ;;  %v1267_v39 = vand.u32 4294901760, %v7222_v37  ;;  %v127_v37 = vld [vmem:[#allocation5 + $0x180] sm:$0xff] }
  0xb0   :  { %9852 = vst [vmem:[#allocation40_spill] sm:$0xff] %v7237_v26  ;;  %5286 = vmatprep.subr.mxu0 %v7075_v5  ;;  %5313 = vmatprep.subr.mxu1 %v1351_v24  ;;  %v1379_v24 = vand.u32 4294901760, %v7217_v38  ;;  %v112_v5 = vld [vmem:[#allocation5 + $0x108] sm:$0xff]  ;;  %v1273_v49 = vsub.f32 %v7155_v41, %v9857_v43  ;;  %v7275_v19 = vsub.f32 %v113_v52, %v7232_v59  ;;  %v9859_v38 = vand.u32 4294901760, %v7209_v30 }
  0xb1   :  { %v7251_v17 = vsub.f32 %v7165_v53, %v9854_v7  ;;  %9855 = vst [vmem:[#allocation41_spill] sm:$0xff] %v7253_v63  ;;  %5287 = vmatpush3.msra.mxu0 %v7078_v57  ;;  %5314 = vmatpush3.msra.mxu1 %v9856_v40  ;;  %v7265_v7 = vsub.f32 %v114_v4, %v7224_v31  ;;  %v111_v40 = vld [vmem:[#allocation5 + $0x100] sm:$0xff]  ;;  %v9860_v43 = vand.u32 4294901760, %v7146_v28  ;;  %v9511_v28 = vand.u32 4294901760, %v7204_v33 }
  0xb2   :  { %v7268_v53 = vsub.f32 %v72_v0, %v7226_v36  ;;  %5288 = vmatprep.subr.mxu0 %v7105_v56  ;;  %5315 = vmatprep.subr.mxu1 %v1358_v54  ;;  %v7279_v4 = vsub.f32 %v71_v45, %v7237_v26  ;;  %v9858_v0 = vand.u32 4294901760, %v7171_v29  ;;  %v7285_v56 = vand.u32 4294901760, %v128_v32 }
  0xb3   :  { %5289 = vmatpush3.msra.mxu0 %v7107_v13  ;;  %5316 = vmatpush3.msra.mxu1 %v1246_v51  ;;  %v7289_v52 = vsub.f32 %v130_v3, %v7244_v25  ;;  %v1386_v45 = vand.u32 4294901760, %v7251_v17  ;;  %v1392_v51 = vsub.f32 %v7209_v30, %v9859_v38  ;;  %v7296_v13 = vand.u32 4294901760, %v112_v5 }
  0xb4   :  { %v1280_v54 = vsub.f32 %v7171_v29, %v9858_v0  ;;  %5290 = vmatprep.subr.mxu0 %v7139_v16  ;;  %5317 = vmatprep.subr.mxu1 %v1365_v1  ;;  %v7302_v3 = vand.u32 4294901760, %v127_v37  ;;  %v7304_v57 = vand.u32 4294901760, %v111_v40  ;;  %v7308_v17 = vsub.f32 %v129_v35, %v7253_v63 }
  0xb5   :  { %5291 = vmatpush3.msra.mxu0 %v7120_v8  ;;  %5318 = vmatpush3.msra.mxu1 %v9860_v43  ;;  %v1274_v38 = vand.u32 4294901760, %v1273_v49  ;;  %v9861_v0 = vand.u32 4294901760, %v7235_v2  ;;  %v9862_v1 = vand.u32 4294901760, %v7194_v10  ;;  %v1393_v49 = vand.u32 4294901760, %v1392_v51 }
  0xb6   :  { %5292 = vmatprep.subr.mxu0 %v7180_v61  ;;  %5319 = vmatprep.subr.mxu1 %v1372_v46  ;;  %v1281_v16 = vand.u32 4294901760, %v1280_v54  ;;  %v7322_v46 = vsub.f32 %v128_v32, %v7285_v56  ;;  %v9863_v43 = vand.u32 4294901760, %v7257_v20  ;;  %v9865_v32 = vand.u32 4294901760, %v7268_v53 }
  0xb7   :  { %v1399_v8 = vsub.f32 %v7235_v2, %v9861_v0  ;;  %5293 = vmatpush3.msra.mxu0 %v7149_v47  ;;  %5320 = vmatpush3.msra.mxu1 %v1260_v21  ;;  %v1287_v35 = vsub.f32 %v7194_v10, %v9862_v1  ;;  %v7326_v0 = vsub.f32 %v112_v5, %v7296_v13 }
  0xb8   :  { %5294 = vmatprep.subr.mxu0 %v7182_v44  ;;  %5321 = vmatprep.subr.mxu1 %v1379_v24  ;;  %v1406_v21 = vsub.f32 %v7257_v20, %v9863_v43  ;;  %v7334_v1 = vsub.f32 %v111_v40, %v7304_v57  ;;  %v1200_v24 = vsub.f32 %v7268_v53, %v9865_v32  ;;  %v9867_v40 = vand.u32 4294901760, %v7279_v4 }
  0xb9   :  { %5295 = vmatpush3.msra.mxu0 %v7162_v62  ;;  %5322 = vmatpush3.msra.mxu1 %v1267_v39  ;;  %v7341_v5 = vsub.f32 %v127_v37, %v7302_v3  ;;  %v1400_v43 = vand.u32 4294901760, %v1399_v8  ;;  %v1294_v39 = vsub.f32 %v7204_v33, %v9511_v28  ;;  %v1288_v32 = vand.u32 4294901760, %v1287_v35 }
  0xba   :  { %9864 = vst [vmem:[#allocation42_spill] sm:$0xff] %v7334_v1  ;;  %5296 = vmatprep.subr.mxu0 %v7244_v25  ;;  %5323 = vmatprep.subr.mxu1 %v1386_v45  ;;  %v1206_v54 = vsub.f32 %v7279_v4, %v9867_v40  ;;  %v9868_v37 = vand.u32 4294901760, %v7289_v52  ;;  %v1407_v45 = vand.u32 4294901760, %v1406_v21  ;;  %v9869_v28 = vand.u32 4294901760, %v7265_v7 }
  0xbb   :  { %9866 = vst [vmem:[#allocation43_spill] sm:$0xff] %v7341_v5  ;;  %5297 = vmatpush3.msra.mxu0 %v7224_v31  ;;  %5324 = vmatpush3.msra.mxu1 %v1274_v38  ;;  %v1201_v38 = vand.u32 4294901760, %v1200_v24  ;;  %v9870_v35 = vand.u32 4294901760, %v7308_v17  ;;  %v9515_v8 = vand.u32 4294901760, %v7341_v5  ;;  %v9514_v61 = vand.u32 4294901760, %v7334_v1 }
  0xbc   :  { %v1413_v51 = vsub.f32 %v7289_v52, %v9868_v37  ;;  %5298 = vmatprep.subr.mxu0 %v7253_v63  ;;  %5325 = vmatprep.subr.mxu1 %v1393_v49  ;;  %v1301_v40 = vsub.f32 %v7265_v7, %v9869_v28  ;;  %v1295_v49 = vand.u32 4294901760, %v1294_v39  ;;  %v1207_v21 = vand.u32 4294901760, %v1206_v54 }
  0xbd   :  { %5299 = vmatpush3.msra.mxu0 %v7232_v59  ;;  %5326 = vmatpush3.msra.mxu1 %v1281_v16  ;;  %v1420_v37 = vsub.f32 %v7308_v17, %v9870_v35  ;;  %v9871_v63 = vand.u32 4294901760, %v7275_v19  ;;  %v9872_v24 = vand.u32 4294901760, %v7322_v46  ;;  %v9873_v54 = vand.u32 4294901760, %v7326_v0 }
  0xbe   :  { %5300 = vmatprep.subr.mxu0 %v7285_v56  ;;  %5327 = vmatprep.subr.mxu1 %v1400_v43  ;;  %v1414_v16 = vand.u32 4294901760, %v1413_v51  ;;  %v1302_v43 = vand.u32 4294901760, %v1301_v40  ;;  %v1434_v51 = vsub.f32 %v7341_v5, %v9515_v8  ;;  %v9891_v8 = vld [vmem:[#allocation31_spill] sm:$0xff] }
  0xbf   :  { %v1308_v28 = vsub.f32 %v7275_v19, %v9871_v63  ;;  %5301 = vmatpush3.msra.mxu0 %v7296_v13  ;;  %5328 = vmatpush3.msra.mxu1 %v1288_v32  ;;  %v1427_v35 = vsub.f32 %v7322_v46, %v9872_v24  ;;  %v1315_v39 = vsub.f32 %v7326_v0, %v9873_v54  ;;  %v1421_v63 = vand.u32 4294901760, %v1420_v37  ;;  %v9877_v24 = vld [vmem:[#allocation26_spill] sm:$0xff]  ;;  %v9880_v54 = vld [vmem:[#allocation33_spill] sm:$0xff] }
  0xc0   :  { %5302 = vmatprep.subr.mxu0 %v7302_v3  ;;  %5329 = vmatprep.subr.mxu1 %v1407_v45  ;;  %v1322_v45 = vsub.f32 %v7334_v1, %v9514_v61  ;;  %v1435_v37 = vand.u32 4294901760, %v1434_v51  ;;  %v9883_v51 = vld [vmem:[#allocation19_spill] sm:$0xff]  ;;  %v9890_v61 = vld [vmem:[#allocation30_spill] sm:$0xff] }
  0xc1   :  { %5303 = vmatpush3.msra.mxu0 %v7304_v57  ;;  %1202 = vmatprep.mubr.f32.mxu0 %v1201_v38  ;;  %v1309_v32 = vand.u32 4294901760, %v1308_v28  ;;  %v1428_v40 = vand.u32 4294901760, %v1427_v35  ;;  %v1316_v38 = vand.u32 4294901760, %v1315_v39  ;;  %v9875_v28 = vld [vmem:[#allocation29_spill] sm:$0xff]  ;;  %v9881_v39 = vld [vmem:[#allocation34_spill] sm:$0xff] }
  0xc2   :  { %5330 = vmatpush3.msra.mxu1 %v1295_v49  ;;  %1208 = vmatmul.mubr.f32.vlgmr.msra.gmra.mxu0 %v1207_v21  ;;  %v1323_v49 = vand.u32 4294901760, %v1322_v45  ;;  %v9874_v21 = vld [vmem:[#allocation16_spill] sm:$0xff]  ;;  %v9878_v35 = vld [vmem:[#allocation17_spill] sm:$0xff] }
  0xc3   :  { %5331 = vmatprep.subr.mxu1 %v1414_v16  ;;  %5342 = vmatprep.subr.mxu0 %v6950_v27  ;;  %v9876_v16 = vld [vmem:[#allocation15_spill] sm:$0xff]  ;;  %v9885_v45 = vld [vmem:[#allocation20_spill] sm:$0xff] }
  0xc4   :  { %5332 = vmatpush3.msra.mxu1 %v1302_v43  ;;  %5343 = vmatpush3.msra.mxu0 %v6945_v60  ;;  %v9879_v43 = vld [vmem:[#allocation32_spill] sm:$0xff] }
  0xc5   :  { %5333 = vmatprep.subr.mxu1 %v1421_v63  ;;  %5344 = vmatprep.subr.mxu0 %v6970_v23  ;;  %v9882_v63 = vld [vmem:[#allocation18_spill] sm:$0xff] }
  0xc6   :  { %5334 = vmatpush3.msra.mxu1 %v1309_v32  ;;  %5345 = vmatpush3.msra.mxu0 %v6956_v12  ;;  %v9884_v32 = vld [vmem:[#allocation21_spill] sm:$0xff] }
  0xc7   :  { %5335 = vmatprep.subr.mxu1 %v1428_v40  ;;  %5346 = vmatprep.subr.mxu0 %v6978_v34  ;;  %v9886_v40 = vld [vmem:[#allocation23_spill] sm:$0xff] }
  0xc8   :  { %5336 = vmatpush3.msra.mxu1 %v1316_v38  ;;  %5347 = vmatpush3.msra.mxu0 %v6967_v50  ;;  %v9887_v38 = vld [vmem:[#allocation22_spill] sm:$0xff] }
  0xc9   :  { %5337 = vmatprep.subr.mxu1 %v1435_v37  ;;  %5348 = vmatprep.subr.mxu0 %v7028_v9  ;;  %v9888_v37 = vld [vmem:[#allocation24_spill] sm:$0xff] }
  0xca   :  { %5338 = vmatpush3.msra.mxu1 %v1323_v49  ;;  %1438 = vmatprep.mubr.f32.mxu1 %v7226_v36  ;;  %v9889_v49 = vld [vmem:[#allocation25_spill] sm:$0xff]  ;;  %v9893_v36 = vld [vmem:[#allocation36_spill] sm:$0xff] }
  0xcb   :  { %5349 = vmatpush3.msra.mxu0 %v6990_v14  ;;  %1440 = vmatmul.mubr.f32.vlgmr.msra.gmra.mxu1 %v7237_v26  ;;  %v9892_v26 = vld [vmem:[#allocation37_spill] sm:$0xff] }
  0xcc   :  { %5350 = vmatprep.subr.mxu0 %v7040_v22  ;;  %5377 = vmatprep.subr.mxu1 %v6922_v48 }
  0xcd   :  { %5351 = vmatpush3.msra.mxu0 %v7034_v6  ;;  %5378 = vmatpush3.msra.mxu1 %v6924_v11 }
  0xce   :  { %5352 = vmatprep.subr.mxu0 %v7070_v42  ;;  %5379 = vmatprep.subr.mxu1 %v6937_v55 }
  0xcf   :  { %5353 = vmatpush3.msra.mxu0 %v7051_v18  ;;  %5380 = vmatpush3.msra.mxu1 %v6929_v15 }
  0xd0   :  { %5354 = vmatprep.subr.mxu0 %v7100_v58  ;;  %5381 = vmatprep.subr.mxu1 %v9874_v21 }
  0xd1   :  { %5355 = vmatpush3.msra.mxu0 %v9875_v28  ;;  %5382 = vmatpush3.msra.mxu1 %v9876_v16 }
  0xd2   :  { %5356 = vmatprep.subr.mxu0 %v9877_v24  ;;  %5383 = vmatprep.subr.mxu1 %v9878_v35 }
  0xd3   :  { %5357 = vmatpush3.msra.mxu0 %v9879_v43  ;;  %5384 = vmatpush3.msra.mxu1 %v9880_v54 }
  0xd4   :  { %5358 = vmatprep.subr.mxu0 %v9881_v39  ;;  %5385 = vmatprep.subr.mxu1 %v9882_v63 }
  0xd5   :  { %5359 = vmatpush3.msra.mxu0 %v7155_v41  ;;  %5386 = vmatpush3.msra.mxu1 %v9883_v51 }
  0xd6   :  { %5360 = vmatprep.subr.mxu0 %v7209_v30  ;;  %5387 = vmatprep.subr.mxu1 %v9884_v32 }
  0xd7   :  { %5361 = vmatpush3.msra.mxu0 %v7171_v29  ;;  %5388 = vmatpush3.msra.mxu1 %v9885_v45 }
  0xd8   :  { %5362 = vmatprep.subr.mxu0 %v7235_v2  ;;  %5389 = vmatprep.subr.mxu1 %v9886_v40 }
  0xd9   :  { %5363 = vmatpush3.msra.mxu0 %v7194_v10  ;;  %5390 = vmatpush3.msra.mxu1 %v9887_v38 }
  0xda   :  { %5364 = vmatprep.subr.mxu0 %v7257_v20  ;;  %5391 = vmatprep.subr.mxu1 %v9888_v37 }
  0xdb   :  { %5365 = vmatpush3.msra.mxu0 %v7204_v33  ;;  %5392 = vmatpush3.msra.mxu1 %v9889_v49  ;;  %v9894_v33 = vld [vmem:[#allocation28_spill] sm:$0xff] }
  0xdc   :  { %5366 = vmatprep.subr.mxu0 %v7289_v52  ;;  %5393 = vmatprep.subr.mxu1 %v9890_v61 }
  0xdd   :  { %5367 = vmatpush3.msra.mxu0 %v7265_v7  ;;  %5394 = vmatpush3.msra.mxu1 %v9891_v8 }
  0xde   :  { %5368 = vmatprep.subr.mxu0 %v7308_v17  ;;  %5395 = vmatprep.subr.mxu1 %v9892_v26 }
  0xdf   :  { %5369 = vmatpush3.msra.mxu0 %v7275_v19  ;;  %5396 = vmatpush3.msra.mxu1 %v9893_v36 }
  0xe0   :  { %5370 = vmatprep.subr.mxu0 %v7322_v46  ;;  %5397 = vmatprep.subr.mxu1 %v9894_v33  ;;  %v9895_v33 = vand.u32 4294901760, %v6950_v27  ;;  %v9900_v27 = vand.u32 4294901760, %v6978_v34  ;;  %v9905_v34 = vand.u32 4294901760, %v7279_v4 }
  0xe1   :  { %5371 = vmatpush3.msra.mxu0 %v7326_v0  ;;  %5398 = vmatpush3.msra.mxu1 %v7149_v47  ;;  %v9896_v47 = vand.u32 4294901760, %v6945_v60  ;;  %v9901_v60 = vand.u32 4294901760, %v6967_v50  ;;  %v9907_v50 = vand.u32 4294901760, %v7034_v6  ;;  %v9911_v6 = vand.u32 4294901760, %v9875_v28 }
  0xe2   :  { %5372 = vmatprep.subr.mxu0 %v7341_v5  ;;  %5399 = vmatprep.subr.mxu1 %v7182_v44  ;;  %v9897_v5 = vld [vmem:[#allocation41_spill] sm:$0xff] }
  0xe3   :  { %5373 = vmatpush3.msra.mxu0 %v7334_v1  ;;  %1575 = vmatprep.mubr.f32.mxu0 %v7268_v53  ;;  %v9898_v1 = vand.u32 4294901760, %v6970_v23  ;;  %v9902_v23 = vand.u32 4294901760, %v7028_v9  ;;  %v9908_v9 = vand.u32 4294901760, %v7070_v42  ;;  %v9914_v42 = vand.u32 4294901760, %v9881_v39 }
  0xe4   :  { %5400 = vmatpush3.msra.mxu1 %v7162_v62  ;;  %1578 = vmatmul.mubr.f32.vlgmr.msra.gmra.mxu0 %v7279_v4  ;;  %v9899_v62 = vand.u32 4294901760, %v6956_v12  ;;  %v9903_v12 = vand.u32 4294901760, %v7268_v53  ;;  %v173_v53 = vld [vmem:[#allocation5 + $0x2f0] sm:$0xff]  ;;  %v9920_v39 = vand.u32 4294901760, %v7194_v10  ;;  %v154_v10 = vld [vmem:[#allocation5 + $0x258] sm:$0xff] }
  0xe5   :  { %5401 = vmatprep.subr.mxu1 %v7244_v25  ;;  %5412 = vmatprep.subr.mxu0 %v9895_v33  ;;  %v9915_v33 = vand.u32 4294901760, %v7155_v41 }
  0xe6   :  { %5402 = vmatpush3.msra.mxu1 %v7224_v31  ;;  %5413 = vmatpush3.msra.mxu0 %v9896_v47  ;;  %v9906_v47 = vand.u32 4294901760, %v7040_v22  ;;  %v9910_v22 = vand.u32 4294901760, %v7100_v58  ;;  %v157_v58 = vld [vmem:[#allocation5 + $0x270] sm:$0xff] }
  0xe7   :  { %5403 = vmatprep.subr.mxu1 %v9897_v5  ;;  %5414 = vmatprep.subr.mxu0 %v9898_v1  ;;  %v172_v1 = vld [vmem:[#allocation5 + $0x2e8] sm:$0xff]  ;;  %v7511_v28 = vand.u32 4294901760, %v157_v58 }
  0xe8   :  { %5404 = vmatpush3.msra.mxu1 %v7232_v59  ;;  %5415 = vmatpush3.msra.mxu0 %v9899_v62  ;;  %v9904_v62 = vand.u32 4294901760, %v6990_v14  ;;  %v9909_v14 = vand.u32 4294901760, %v7051_v18  ;;  %v9913_v18 = vand.u32 4294901760, %v9879_v43  ;;  %v155_v43 = vld [vmem:[#allocation5 + $0x260] sm:$0xff] }
  0xe9   :  { %5405 = vmatprep.subr.mxu1 %v7285_v56  ;;  %5416 = vmatprep.subr.mxu0 %v9900_v27 }
  0xea   :  { %5406 = vmatpush3.msra.mxu1 %v7296_v13  ;;  %5417 = vmatpush3.msra.mxu0 %v9901_v60 }
  0xeb   :  { %5407 = vmatprep.subr.mxu1 %v7302_v3  ;;  %5418 = vmatprep.subr.mxu0 %v9902_v23 }
  0xec   :  { %5408 = vmatpush3.msra.mxu1 %v7304_v57  ;;  %1682 = vmatprep.mubr.f32.mxu1 %v9903_v12 }
  0xed   :  { %5419 = vmatpush3.msra.mxu0 %v9904_v62  ;;  %1686 = vmatmul.mubr.f32.vlgmr.msra.gmra.mxu1 %v9905_v34  ;;  %v9928_v62 = vand.u32 4294901760, %v7265_v7 }
  0xee   :  { %5420 = vmatprep.subr.mxu0 %v9906_v47  ;;  %5447 = vmatprep.subr.mxu1 %v6922_v48  ;;  %v158_v48 = vld [vmem:[#allocation5 + $0x278] sm:$0xff]  ;;  %v7564_v47 = vand.u32 4294901760, %v154_v10 }
  0xef   :  { %5421 = vmatpush3.msra.mxu0 %v9907_v50  ;;  %5448 = vmatpush3.msra.mxu1 %v6924_v11  ;;  %v9912_v11 = vand.u32 4294901760, %v9877_v24  ;;  %v9917_v24 = vand.u32 4294901760, %v7171_v29  ;;  %v153_v50 = vld [vmem:[#allocation5 + $0x250] sm:$0xff] }
  0xf0   :  { %5422 = vmatprep.subr.mxu0 %v9908_v9  ;;  %5449 = vmatprep.subr.mxu1 %v6937_v55  ;;  %v174_v55 = vld [vmem:[#allocation5 + $0x2f8] sm:$0xff]  ;;  %9929 = vst [vmem:[#allocation17_spill] sm:$0xff] %v7564_v47 }
  0xf1   :  { %5423 = vmatpush3.msra.mxu0 %v9909_v14  ;;  %5450 = vmatpush3.msra.mxu1 %v6929_v15  ;;  %v7498_v15 = vand.u32 4294901760, %v158_v48  ;;  %v7506_v4 = vand.u32 4294901760, %v174_v55  ;;  %v9932_v14 = vand.u32 4294901760, %v7275_v19  ;;  %v168_v19 = vld [vmem:[#allocation5 + $0x2c8] sm:$0xff] }
  0xf2   :  { %5424 = vmatprep.subr.mxu0 %v9910_v22  ;;  %5451 = vmatprep.subr.mxu1 %v9874_v21  ;;  %v9916_v21 = vand.u32 4294901760, %v7209_v30  ;;  %v7524_v30 = vand.u32 4294901760, %v172_v1 }
  0xf3   :  { %5425 = vmatpush3.msra.mxu0 %v9911_v6  ;;  %5452 = vmatpush3.msra.mxu1 %v9876_v16  ;;  %v156_v16 = vld [vmem:[#allocation5 + $0x268] sm:$0xff]  ;;  %v7517_v41 = vsub.f32 %v158_v48, %v7498_v15  ;;  %v9933_v48 = vand.u32 4294901760, %v7322_v46  ;;  %v9934_v6 = vld [vmem:[#allocation28_spill] sm:$0xff] }
  0xf4   :  { %5426 = vmatprep.subr.mxu0 %v9912_v11  ;;  %5453 = vmatprep.subr.mxu1 %v9878_v35  ;;  %v7519_v35 = vand.u32 4294901760, %v173_v53  ;;  %9919 = vst [vmem:[#allocation16_spill] sm:$0xff] %v7524_v30  ;;  %v7529_v29 = vand.u32 4294901760, %v156_v16  ;;  %v7555_v12 = vsub.f32 %v172_v1, %v7524_v30 }
  0xf5   :  { %5427 = vmatpush3.msra.mxu0 %v9913_v18  ;;  %5454 = vmatpush3.msra.mxu1 %v9880_v54  ;;  %v9918_v54 = vand.u32 4294901760, %v7235_v2  ;;  %v7538_v2 = vsub.f32 %v157_v58, %v7511_v28  ;;  %v9531_v60 = vand.u32 4294901760, %v7517_v41  ;;  %v151_v58 = vld [vmem:[#allocation5 + $0x240] sm:$0xff] }
  0xf6   :  { %5428 = vmatprep.subr.mxu0 %v9914_v42  ;;  %5455 = vmatprep.subr.mxu1 %v9882_v63  ;;  %9921 = vst [vmem:[#allocation29_spill] sm:$0xff] %v7529_v29  ;;  %v171_v63 = vld [vmem:[#allocation5 + $0x2e0] sm:$0xff]  ;;  %v7547_v23 = vsub.f32 %v173_v53, %v7519_v35  ;;  %v9937_v42 = vand.u32 4294901760, %v7326_v0  ;;  %v9938_v53 = vld [vmem:[#allocation27_spill] sm:$0xff] }
  0xf7   :  { %5429 = vmatpush3.msra.mxu0 %v9915_v33  ;;  %5456 = vmatpush3.msra.mxu1 %v9883_v51  ;;  %v7532_v51 = vsub.f32 %v174_v55, %v7506_v4  ;;  %v7581_v22 = vsub.f32 %v7517_v41, %v9531_v60  ;;  %v7589_v55 = vand.u32 4294901760, %v153_v50  ;;  %v7604_v33 = vsub.f32 %v154_v10, %v7564_v47  ;;  %v9944_v10 = vld [vmem:[#allocation39_spill] sm:$0xff] }
  0xf8   :  { %5430 = vmatprep.subr.mxu0 %v9916_v21  ;;  %5457 = vmatprep.subr.mxu1 %v9884_v32  ;;  %v9922_v32 = vand.u32 4294901760, %v7257_v20  ;;  %v9926_v20 = vand.u32 4294901760, %v7289_v52  ;;  %v169_v52 = vld [vmem:[#allocation5 + $0x2d0] sm:$0xff] }
  0xf9   :  { %5431 = vmatpush3.msra.mxu0 %v9917_v24  ;;  %5458 = vmatpush3.msra.mxu1 %v9885_v45  ;;  %v7540_v45 = vand.u32 4294901760, %v155_v43  ;;  %v9532_v34 = vand.u32 4294901760, %v7532_v51  ;;  %v7587_v11 = vand.u32 4294901760, %v169_v52  ;;  %9936 = vst [vmem:[#allocation34_spill] sm:$0xff] %v7589_v55  ;;  %v9939_v21 = vld [vmem:[#allocation43_spill] sm:$0xff] }
  0xfa   :  { %5432 = vmatprep.subr.mxu0 %v9918_v54  ;;  %5459 = vmatprep.subr.mxu1 %v9886_v40  ;;  %v9924_v40 = vld [vmem:[#allocation35_spill] sm:$0xff] }
  0xfb   :  { %5433 = vmatpush3.msra.mxu0 %v9920_v39  ;;  %5460 = vmatpush3.msra.mxu1 %v9887_v38  ;;  %9923 = vst [vmem:[#allocation15_spill] sm:$0xff] %v7540_v45  ;;  %v9925_v27 = vand.u32 4294901760, %v9924_v40  ;;  %v170_v38 = vld [vmem:[#allocation5 + $0x2d8] sm:$0xff]  ;;  %v7570_v9 = vsub.f32 %v155_v43, %v7540_v45  ;;  %9935 = vst [vmem:[#allocation33_spill] sm:$0xff] %v7587_v11  ;;  %v7601_v46 = vsub.f32 %v7532_v51, %v9532_v34  ;;  %v167_v43 = vld [vmem:[#allocation5 + $0x2c0] sm:$0xff] }
  0xfc   :  { %5434 = vmatprep.subr.mxu0 %v9922_v32  ;;  %5461 = vmatprep.subr.mxu1 %v9888_v37  ;;  %v7552_v37 = vand.u32 4294901760, %v171_v63  ;;  %v7572_v7 = vand.u32 4294901760, %v170_v38 }
  0xfd   :  { %5435 = vmatpush3.msra.mxu0 %v9925_v27  ;;  %5462 = vmatpush3.msra.mxu1 %v9889_v49  ;;  %v7561_v49 = vsub.f32 %v156_v16, %v7529_v29  ;;  %v9940_v16 = vand.u32 4294901760, %v9939_v21  ;;  %v9527_v54 = vand.u32 4294901760, %v7570_v9  ;;  %v7630_v27 = vand.u32 4294901760, %v168_v19 }
  0xfe   :  { %5436 = vmatprep.subr.mxu0 %v9926_v20  ;;  %5463 = vmatprep.subr.mxu1 %v9890_v61  ;;  %9927 = vst [vmem:[#allocation26_spill] sm:$0xff] %v7552_v37  ;;  %v9930_v61 = vand.u32 4294901760, %v7308_v17  ;;  %9931 = vst [vmem:[#allocation32_spill] sm:$0xff] %v7572_v7  ;;  %v9529_v17 = vand.u32 4294901760, %v7547_v23  ;;  %v7593_v18 = vsub.f32 %v171_v63, %v7552_v37  ;;  %v9942_v63 = vld [vmem:[#allocation42_spill] sm:$0xff]  ;;  %v7632_v20 = vand.u32 4294901760, %v151_v58 }
  0xff   :  { %5437 = vmatpush3.msra.mxu0 %v9928_v62  ;;  %5464 = vmatpush3.msra.mxu1 %v9891_v8  ;;  %v9528_v8 = vand.u32 4294901760, %v7538_v2  ;;  %v9525_v1 = vand.u32 4294901760, %v7561_v49  ;;  %v7619_v39 = vsub.f32 %v170_v38, %v7572_v7  ;;  %v9943_v32 = vand.u32 4294901760, %v9942_v63  ;;  %9945 = vst [vmem:[#allocation19_spill] sm:$0xff] %v7630_v27  ;;  %v9947_v62 = vld [vmem:[#allocation38_spill] sm:$0xff]  ;;  %v9948_v38 = vld [vmem:[#allocation40_spill] sm:$0xff] }
 0x100   :  { %5438 = vmatprep.subr.mxu0 %v9930_v61  ;;  %5465 = vmatprep.subr.mxu1 %v9892_v26  ;;  %v152_v26 = vld [vmem:[#allocation5 + $0x248] sm:$0xff]  ;;  %v7628_v40 = vsub.f32 %v7547_v23, %v9529_v17  ;;  %9946 = vst [vmem:[#allocation21_spill] sm:$0xff] %v7632_v20  ;;  %v7637_v61 = vsub.f32 %v153_v50, %v7589_v55  ;;  %v7656_v21 = vand.u32 4294901760, %v167_v43  ;;  %v166_v63 = vld [vmem:[#allocation5 + $0x2b8] sm:$0xff] }
 0x101   :  { %5439 = vmatpush3.msra.mxu0 %v9932_v14  ;;  %5466 = vmatpush3.msra.mxu1 %v9893_v36  ;;  %v9526_v36 = vand.u32 4294901760, %v7555_v12  ;;  %v7613_v0 = vsub.f32 %v7538_v2, %v9528_v8  ;;  %v7615_v24 = vand.u32 4294901760, %v152_v26  ;;  %v7654_v50 = vsub.f32 %v7561_v49, %v9525_v1 }
 0x102   :  { %5440 = vmatprep.subr.mxu0 %v9933_v48  ;;  %5467 = vmatprep.subr.mxu1 %v9934_v6  ;;  %v9530_v48 = vand.u32 4294901760, %v7593_v18  ;;  %v150_v6 = vld [vmem:[#allocation5 + $0x238] sm:$0xff]  ;;  %9949 = vst [vmem:[#allocation20_spill] sm:$0xff] %v7656_v21  ;;  %v9536_v8 = vand.u32 4294901760, %v7637_v61  ;;  %v7703_v60 = vsub.f32 %v167_v43, %v7656_v21 }
 0x103   :  { %5441 = vmatpush3.msra.mxu0 %v9937_v42  ;;  %5468 = vmatpush3.msra.mxu1 %v9938_v53  ;;  %9941 = vst [vmem:[#allocation18_spill] sm:$0xff] %v7615_v24  ;;  %v7642_v14 = vsub.f32 %v7555_v12, %v9526_v36  ;;  %v7646_v42 = vsub.f32 %v169_v52, %v7587_v11  ;;  %v2192_v53 = vand.u32 4294901760, %v7601_v46  ;;  %v7677_v1 = vand.u32 4294901760, %v150_v6  ;;  %v147_v52 = vld [vmem:[#allocation5 + $0x220] sm:$0xff] }
 0x104   :  { %5442 = vmatprep.subr.mxu0 %v9940_v16  ;;  %5469 = vmatprep.subr.mxu1 %v7182_v44  ;;  %v9533_v16 = vand.u32 4294901760, %v7604_v33  ;;  %v7668_v46 = vsub.f32 %v7570_v9, %v9527_v54  ;;  %v7680_v36 = vsub.f32 %v168_v19, %v7630_v27  ;;  %v7695_v19 = vand.u32 4294901760, %v166_v63  ;;  %9954 = vst [vmem:[#allocation30_spill] sm:$0xff] %v7703_v60  ;;  %v164_v54 = vld [vmem:[#allocation5 + $0x2a8] sm:$0xff] }
 0x105   :  { %5443 = vmatpush3.msra.mxu0 %v9943_v32  ;;  %1852 = vmatprep.mubr.f32.mxu0 %v9944_v10  ;;  %v9534_v32 = vand.u32 4294901760, %v7619_v39  ;;  %9952 = vst [vmem:[#allocation24_spill] sm:$0xff] %v7677_v1 }
 0x106   :  { %5470 = vmatpush3.msra.mxu1 %v9947_v62  ;;  %1854 = vmatmul.mubr.f32.vlgmr.msra.gmra.mxu0 %v9948_v38  ;;  %v7675_v62 = vsub.f32 %v151_v58, %v7632_v20  ;;  %v9535_v58 = vand.u32 4294901760, %v7646_v42  ;;  %9953 = vst [vmem:[#allocation25_spill] sm:$0xff] %v7695_v19  ;;  %v7700_v17 = vsub.f32 %v7604_v33, %v9533_v16 }
 0x107   :  { %5471 = vmatprep.subr.mxu1 %v7244_v25  ;;  %5482 = vmatprep.subr.mxu0 %v7506_v4  ;;  %v7663_v25 = vsub.f32 %v152_v26, %v7615_v24  ;;  %v149_v26 = vld [vmem:[#allocation5 + $0x230] sm:$0xff]  ;;  %v7711_v34 = vsub.f32 %v7619_v39, %v9534_v32 }
 0x108   :  { %5472 = vmatpush3.msra.mxu1 %v7224_v31  ;;  %5483 = vmatpush3.msra.mxu0 %v7498_v15  ;;  %v2199_v31 = vand.u32 4294901760, %v7628_v40  ;;  %9951 = vst [vmem:[#allocation22_spill] sm:$0xff] %v7675_v62  ;;  %v165_v40 = vld [vmem:[#allocation5 + $0x2b0] sm:$0xff] }
 0x109   :  { %9950 = vst [vmem:[#allocation23_spill] sm:$0xff] %v7663_v25  ;;  %5473 = vmatprep.subr.mxu1 %v9897_v5  ;;  %5484 = vmatprep.subr.mxu0 %v7519_v35  ;;  %v7688_v5 = vsub.f32 %v7593_v18, %v9530_v48  ;;  %v148_v48 = vld [vmem:[#allocation5 + $0x228] sm:$0xff]  ;;  %v7721_v43 = vand.u32 4294901760, %v165_v40 }
 0x10a   :  { %5474 = vmatpush3.msra.mxu1 %v7232_v59  ;;  %5485 = vmatpush3.msra.mxu0 %v7511_v28  ;;  %v7713_v59 = vand.u32 4294901760, %v149_v26  ;;  %v7738_v16 = vand.u32 4294901760, %v148_v48 }
 0x10b   :  { %5475 = vmatprep.subr.mxu1 %v7285_v56  ;;  %5486 = vmatprep.subr.mxu0 %v7524_v30  ;;  %9957 = vst [vmem:[#allocation36_spill] sm:$0xff] %v7721_v43  ;;  %v2213_v44 = vand.u32 4294901760, %v7688_v5  ;;  %v163_v56 = vld [vmem:[#allocation5 + $0x2a0] sm:$0xff]  ;;  %v74_v5 = vld [vmem:[#allocation2 + $0x28] sm:$0xff]  ;;  %v7784_v30 = vsub.f32 %v165_v40, %v7721_v43  ;;  %v9968_v40 = vand.u32 4294901760, %v7642_v14 }
 0x10c   :  { %5476 = vmatpush3.msra.mxu1 %v7296_v13  ;;  %5487 = vmatpush3.msra.mxu0 %v7529_v29  ;;  %9955 = vst [vmem:[#allocation31_spill] sm:$0xff] %v7713_v59  ;;  %v7719_v13 = vsub.f32 %v150_v6, %v7677_v1  ;;  %v7736_v6 = vsub.f32 %v7637_v61, %v9536_v8  ;;  %9958 = vst [vmem:[#allocation41_spill] sm:$0xff] %v7738_v16  ;;  %v2220_v8 = vand.u32 4294901760, %v7711_v34 }
 0x10d   :  { %5477 = vmatprep.subr.mxu1 %v7302_v3  ;;  %5488 = vmatprep.subr.mxu0 %v7552_v37  ;;  %v7731_v3 = vsub.f32 %v7646_v42, %v9535_v58  ;;  %v7746_v58 = vand.u32 4294901760, %v147_v52  ;;  %v7751_v32 = vsub.f32 %v149_v26, %v7713_v59  ;;  %v146_v37 = vld [vmem:[#allocation5 + $0x218] sm:$0xff]  ;;  %v9963_v34 = vand.u32 4294901760, %v7680_v36 }
 0x10e   :  { %9956 = vst [vmem:[#allocation37_spill] sm:$0xff] %v7719_v13  ;;  %5478 = vmatpush3.msra.mxu1 %v7304_v57  ;;  %1956 = vmatprep.mubr.f32.mxu1 %v9944_v10  ;;  %v7743_v10 = vand.u32 4294901760, %v164_v54  ;;  %v7759_v57 = vsub.f32 %v166_v63, %v7695_v19  ;;  %v7769_v26 = vand.u32 4294901760, %v163_v56  ;;  %v9966_v63 = vand.u32 4294901760, %v7703_v60 }
 0x10f   :  { %5489 = vmatpush3.msra.mxu0 %v7540_v45  ;;  %1958 = vmatmul.mubr.f32.vlgmr.msra.gmra.mxu1 %v9948_v38  ;;  %9960 = vst [vmem:[#allocation28_spill] sm:$0xff] %v7746_v58  ;;  %v9961_v45 = vand.u32 4294901760, %v7663_v25 }
 0x110   :  { %9959 = vst [vmem:[#allocation35_spill] sm:$0xff] %v7743_v10  ;;  %5490 = vmatprep.subr.mxu0 %v7572_v7  ;;  %5517 = vmatprep.subr.mxu1 %v2192_v53  ;;  %v9962_v7 = vand.u32 4294901760, %v7581_v22  ;;  %v7767_v53 = vsub.f32 %v7680_v36, %v9963_v34  ;;  %v2115_v22 = vand.u32 4294901760, %v7736_v6  ;;  %v7781_v34 = vsub.f32 %v148_v48, %v7738_v16  ;;  %v145_v48 = vld [vmem:[#allocation5 + $0x210] sm:$0xff] }
 0x111   :  { %v7756_v38 = vsub.f32 %v7663_v25, %v9961_v45  ;;  %5491 = vmatpush3.msra.mxu0 %v7564_v47  ;;  %v9964_v45 = vand.u32 4294901760, %v7675_v62  ;;  %v73_v25 = vld [vmem:[#allocation2 + $0x20] sm:$0xff]  ;;  %v162_v47 = vld [vmem:[#allocation5 + $0x298] sm:$0xff]  ;;  %v7797_v6 = vand.u32 4294901760, %v146_v37 }
 0x112   :  { %5518 = vmatpush3.msra.mxu1 %v9962_v7  ;;  %5492 = vmatprep.subr.mxu0 %v7587_v11  ;;  %v2227_v7 = vand.u32 4294901760, %v7731_v3  ;;  %v7795_v3 = vsub.f32 %v147_v52, %v7746_v58  ;;  %v7799_v11 = vand.u32 4294901760, %v74_v5  ;;  %v7809_v52 = vand.u32 4294901760, %v73_v25 }
 0x113   :  { %v7774_v29 = vsub.f32 %v7675_v62, %v9964_v45  ;;  %5519 = vmatprep.subr.mxu1 %v2199_v31  ;;  %5493 = vmatpush3.msra.mxu0 %v7589_v55  ;;  %v9965_v45 = vand.u32 4294901760, %v7613_v0  ;;  %v7792_v31 = vsub.f32 %v7703_v60, %v9966_v63  ;;  %v2122_v0 = vand.u32 4294901760, %v7756_v38  ;;  %v161_v55 = vld [vmem:[#allocation5 + $0x290] sm:$0xff] }
 0x114   :  { %9967 = vst [vmem:[#allocation27_spill] sm:$0xff] %v7799_v11  ;;  %5494 = vmatprep.subr.mxu0 %v7630_v27  ;;  %v7807_v63 = vsub.f32 %v164_v54, %v7743_v10  ;;  %9969 = vst [vmem:[#allocation43_spill] sm:$0xff] %v7809_v52  ;;  %v9970_v62 = vand.u32 4294901760, %v7654_v50  ;;  %v2234_v27 = vand.u32 4294901760, %v7767_v53  ;;  %v9971_v38 = vand.u32 4294901760, %v7719_v13  ;;  %v160_v54 = vld [vmem:[#allocation5 + $0x288] sm:$0xff]  ;;  %2300 = vmatprep.mubr.f32.mxu1 %v7799_v11 }
 0x115   :  { %5520 = vmatpush3.msra.mxu1 %v9965_v45  ;;  %5495 = vmatpush3.msra.mxu0 %v7615_v24  ;;  %v2129_v14 = vand.u32 4294901760, %v7774_v29  ;;  %v7825_v60 = vand.u32 4294901760, %v145_v48  ;;  %v7829_v29 = vsub.f32 %v163_v56, %v7769_v26  ;;  %v9972_v53 = vand.u32 4294901760, %v7668_v46 }
 0x116   :  { %5521 = vmatprep.subr.mxu1 %v9968_v40  ;;  %v7816_v40 = vand.u32 4294901760, %v162_v47  ;;  %v7821_v45 = vsub.f32 %v7719_v13, %v9971_v38  ;;  %5496 = vmatprep.subr.mxu0 %v7656_v21  ;;  %v2241_v38 = vand.u32 4294901760, %v7792_v31  ;;  %v7836_v21 = vsub.f32 %v146_v37, %v7797_v6  ;;  %v159_v31 = vld [vmem:[#allocation5 + $0x280] sm:$0xff] }
 0x117   :  { %5522 = vmatpush3.msra.mxu1 %v9970_v62  ;;  %v144_v62 = vld [vmem:[#allocation5 + $0x208] sm:$0xff]  ;;  %5497 = vmatpush3.msra.mxu0 %v7632_v20  ;;  %v7841_v24 = vsub.f32 %v74_v5, %v7799_v11  ;;  %v9974_v56 = vand.u32 4294901760, %v7759_v57  ;;  %v7847_v20 = vand.u32 4294901760, %v160_v54  ;;  %v7851_v37 = vsub.f32 %v73_v25, %v7809_v52  ;;  %v10011_v11 = vld [vmem:[#allocation35_spill] sm:$0xff] }
 0x118   :  { %5523 = vmatprep.subr.mxu1 %v2213_v44  ;;  %v7838_v44 = vand.u32 4294901760, %v161_v55  ;;  %5498 = vmatprep.subr.mxu0 %v7695_v19  ;;  %v9975_v5 = vand.u32 4294901760, %v7700_v17  ;;  %v7857_v19 = vand.u32 4294901760, %v144_v62  ;;  %v7861_v13 = vsub.f32 %v162_v47, %v7816_v40 }
 0x119   :  { %5524 = vmatpush3.msra.mxu1 %v9972_v53  ;;  %v2247_v50 = vsub.f32 %v7759_v57, %v9974_v56  ;;  %v143_v53 = vld [vmem:[#allocation5 + $0x200] sm:$0xff]  ;;  %5499 = vmatpush3.msra.mxu0 %v7677_v1  ;;  %v9976_v25 = vand.u32 4294901760, %v7784_v30  ;;  %v7868_v1 = vsub.f32 %v145_v48, %v7825_v60  ;;  %v9977_v17 = vand.u32 4294901760, %v7751_v32 }
 0x11a   :  { %9973 = vst [vmem:[#allocation42_spill] sm:$0xff] %v7838_v44  ;;  %5525 = vmatprep.subr.mxu1 %v2220_v8  ;;  %v2136_v8 = vand.u32 4294901760, %v7821_v45  ;;  %5500 = vmatprep.subr.mxu0 %v7721_v43  ;;  %v7875_v47 = vand.u32 4294901760, %v159_v31  ;;  %v7877_v56 = vand.u32 4294901760, %v143_v53 }
 0x11b   :  { %5526 = vmatpush3.msra.mxu1 %v9975_v5  ;;  %v2254_v46 = vsub.f32 %v7784_v30, %v9976_v25  ;;  %v2142_v45 = vsub.f32 %v7751_v32, %v9977_v17  ;;  %5501 = vmatpush3.msra.mxu0 %v7713_v59  ;;  %v7881_v25 = vsub.f32 %v161_v55, %v7838_v44  ;;  %v2248_v48 = vand.u32 4294901760, %v2247_v50 }
 0x11c   :  { %5527 = vmatprep.subr.mxu1 %v2227_v7  ;;  %5502 = vmatprep.subr.mxu0 %v7743_v10  ;;  %v9978_v17 = vand.u32 4294901760, %v7807_v63  ;;  %v7891_v7 = vsub.f32 %v144_v62, %v7857_v19  ;;  %v9979_v55 = vand.u32 4294901760, %v7781_v34  ;;  %v7898_v50 = vsub.f32 %v160_v54, %v7847_v20 }
 0x11d   :  { %5528 = vmatpush3.msra.mxu1 %v2115_v22  ;;  %5503 = vmatpush3.msra.mxu0 %v7738_v16  ;;  %v2143_v22 = vand.u32 4294901760, %v2142_v45  ;;  %v9980_v59 = vand.u32 4294901760, %v7829_v29  ;;  %v9982_v54 = vand.u32 4294901760, %v7841_v24  ;;  %v9984_v45 = vand.u32 4294901760, %v7795_v3 }
 0x11e   :  { %5529 = vmatprep.subr.mxu1 %v2234_v27  ;;  %v2261_v5 = vsub.f32 %v7807_v63, %v9978_v17  ;;  %v2149_v10 = vsub.f32 %v7781_v34, %v9979_v55  ;;  %5504 = vmatprep.subr.mxu0 %v7769_v26  ;;  %v2255_v17 = vand.u32 4294901760, %v2254_v46  ;;  %v7907_v55 = vsub.f32 %v143_v53, %v7877_v56 }
 0x11f   :  { %5530 = vmatpush3.msra.mxu1 %v2122_v0  ;;  %v2268_v0 = vsub.f32 %v7829_v29, %v9980_v59  ;;  %5505 = vmatpush3.msra.mxu0 %v7746_v58  ;;  %v2062_v27 = vsub.f32 %v7841_v24, %v9982_v54  ;;  %v7914_v46 = vsub.f32 %v159_v31, %v7875_v47  ;;  %v9985_v53 = vand.u32 4294901760, %v7851_v37 }
 0x120   :  { %5531 = vmatprep.subr.mxu1 %v2241_v38  ;;  %9981 = vst [vmem:[#allocation39_spill] sm:$0xff] %v7907_v55  ;;  %5506 = vmatprep.subr.mxu0 %v7816_v40  ;;  %v2262_v59 = vand.u32 4294901760, %v2261_v5  ;;  %v2150_v54 = vand.u32 4294901760, %v2149_v10  ;;  %v9986_v31 = vand.u32 4294901760, %v7861_v13  ;;  %v9581_v58 = vand.u32 4294901760, %v7907_v55 }
 0x121   :  { %5532 = vmatpush3.msra.mxu1 %v2129_v14  ;;  %9983 = vst [vmem:[#allocation38_spill] sm:$0xff] %v7914_v46  ;;  %v2156_v14 = vsub.f32 %v7795_v3, %v9984_v45  ;;  %v2068_v62 = vsub.f32 %v7851_v37, %v9985_v53  ;;  %5507 = vmatpush3.msra.mxu0 %v7797_v6  ;;  %v9987_v45 = vand.u32 4294901760, %v7836_v21  ;;  %v2063_v10 = vand.u32 4294901760, %v2062_v27 }
 0x122   :  { %5533 = vmatprep.subr.mxu1 %v2248_v48  ;;  %v2275_v38 = vsub.f32 %v7861_v13, %v9986_v31  ;;  %5508 = vmatprep.subr.mxu0 %v7838_v44  ;;  %v2269_v48 = vand.u32 4294901760, %v2268_v0  ;;  %v9582_v5 = vand.u32 4294901760, %v7914_v46  ;;  %v9989_v44 = vand.u32 4294901760, %v7868_v1 }
 0x123   :  { %5534 = vmatpush3.msra.mxu1 %v2136_v8  ;;  %v2163_v53 = vsub.f32 %v7836_v21, %v9987_v45  ;;  %5509 = vmatpush3.msra.mxu0 %v7825_v60  ;;  %v9988_v8 = vand.u32 4294901760, %v7881_v25  ;;  %v2069_v0 = vand.u32 4294901760, %v2068_v62  ;;  %v9990_v27 = vand.u32 4294901760, %v7898_v50 }
 0x124   :  { %5535 = vmatprep.subr.mxu1 %v2255_v17  ;;  %5510 = vmatprep.subr.mxu0 %v7847_v20  ;;  %v2157_v17 = vand.u32 4294901760, %v2156_v14  ;;  %v2170_v45 = vsub.f32 %v7868_v1, %v9989_v44  ;;  %v9991_v62 = vand.u32 4294901760, %v7891_v7 }
 0x125   :  { %5536 = vmatpush3.msra.mxu1 %v2143_v22  ;;  %v2282_v31 = vsub.f32 %v7881_v25, %v9988_v8  ;;  %5511 = vmatpush3.msra.mxu0 %v7857_v19  ;;  %v2276_v22 = vand.u32 4294901760, %v2275_v38  ;;  %v2289_v8 = vsub.f32 %v7898_v50, %v9990_v27  ;;  %v2296_v38 = vsub.f32 %v7914_v46, %v9582_v5  ;;  %v9995_v27 = vld [vmem:[#allocation30_spill] sm:$0xff]  ;;  %v10009_v5 = vld [vmem:[#allocation24_spill] sm:$0xff] }
 0x126   :  { %5537 = vmatprep.subr.mxu1 %v2262_v59  ;;  %5512 = vmatprep.subr.mxu0 %v7875_v47  ;;  %v2164_v59 = vand.u32 4294901760, %v2163_v53  ;;  %v2177_v14 = vsub.f32 %v7891_v7, %v9991_v62  ;;  %v9998_v62 = vld [vmem:[#allocation15_spill] sm:$0xff] }
 0x127   :  { %5538 = vmatpush3.msra.mxu1 %v2150_v54  ;;  %5513 = vmatpush3.msra.mxu0 %v7877_v56  ;;  %v2283_v44 = vand.u32 4294901760, %v2282_v31  ;;  %v2171_v54 = vand.u32 4294901760, %v2170_v45  ;;  %v2290_v53 = vand.u32 4294901760, %v2289_v8  ;;  %v2297_v31 = vand.u32 4294901760, %v2296_v38  ;;  %v9993_v45 = vld [vmem:[#allocation23_spill] sm:$0xff]  ;;  %v9996_v8 = vld [vmem:[#allocation26_spill] sm:$0xff] }
 0x128   :  { %5539 = vmatprep.subr.mxu1 %v2269_v48  ;;  %2064 = vmatprep.mubr.f32.mxu0 %v2063_v10  ;;  %v2184_v48 = vsub.f32 %v7907_v55, %v9581_v58  ;;  %v2178_v10 = vand.u32 4294901760, %v2177_v14  ;;  %v9999_v14 = vld [vmem:[#allocation32_spill] sm:$0xff]  ;;  %v10001_v38 = vld [vmem:[#allocation17_spill] sm:$0xff] }
 0x129   :  { %5540 = vmatpush3.msra.mxu1 %v2157_v17  ;;  %2070 = vmatmul.mubr.f32.vlgmr.msra.gmra.mxu0 %v2069_v0  ;;  %v9992_v0 = vld [vmem:[#allocation16_spill] sm:$0xff]  ;;  %v10008_v58 = vld [vmem:[#allocation25_spill] sm:$0xff] }
 0x12a   :  { %5541 = vmatprep.subr.mxu1 %v2276_v22  ;;  %5552 = vmatprep.subr.mxu0 %v7532_v51  ;;  %v2185_v17 = vand.u32 4294901760, %v2184_v48  ;;  %v9994_v22 = vld [vmem:[#allocation29_spill] sm:$0xff]  ;;  %v10003_v48 = vld [vmem:[#allocation34_spill] sm:$0xff] }
 0x12b   :  { %5542 = vmatpush3.msra.mxu1 %v2164_v59  ;;  %5553 = vmatpush3.msra.mxu0 %v7517_v41  ;;  %v9997_v59 = vld [vmem:[#allocation22_spill] sm:$0xff] }
 0x12c   :  { %5543 = vmatprep.subr.mxu1 %v2283_v44  ;;  %5554 = vmatprep.subr.mxu0 %v7547_v23  ;;  %v10000_v44 = vld [vmem:[#allocation37_spill] sm:$0xff] }
 0x12d   :  { %5544 = vmatpush3.msra.mxu1 %v2171_v54  ;;  %5555 = vmatpush3.msra.mxu0 %v7538_v2  ;;  %v10002_v54 = vld [vmem:[#allocation33_spill] sm:$0xff] }
 0x12e   :  { %5545 = vmatprep.subr.mxu1 %v2290_v53  ;;  %5556 = vmatprep.subr.mxu0 %v7555_v12  ;;  %v10004_v53 = vld [vmem:[#allocation19_spill] sm:$0xff] }
 0x12f   :  { %5546 = vmatpush3.msra.mxu1 %v2178_v10  ;;  %5557 = vmatpush3.msra.mxu0 %v7561_v49  ;;  %v10005_v10 = vld [vmem:[#allocation18_spill] sm:$0xff] }
 0x130   :  { %5547 = vmatprep.subr.mxu1 %v2297_v31  ;;  %5558 = vmatprep.subr.mxu0 %v7593_v18  ;;  %v10006_v31 = vld [vmem:[#allocation20_spill] sm:$0xff] }
 0x131   :  { %5548 = vmatpush3.msra.mxu1 %v2185_v17  ;;  %5559 = vmatpush3.msra.mxu0 %v7570_v9  ;;  %v10007_v17 = vld [vmem:[#allocation21_spill] sm:$0xff] }
 0x132   :  { %2302 = vmatmul.mubr.f32.vlgmr.msra.gmra.mxu1 %v7809_v52  ;;  %5560 = vmatprep.subr.mxu0 %v7619_v39  ;;  %v10010_v52 = vld [vmem:[#allocation31_spill] sm:$0xff] }
 0x133   :  { %5587 = vmatprep.subr.mxu1 %v7506_v4  ;;  %5561 = vmatpush3.msra.mxu0 %v7604_v33 }
 0x134   :  { %5588 = vmatpush3.msra.mxu1 %v7498_v15  ;;  %5562 = vmatprep.subr.mxu0 %v7646_v42 }
 0x135   :  { %5589 = vmatprep.subr.mxu1 %v7519_v35  ;;  %5563 = vmatpush3.msra.mxu0 %v7637_v61 }
 0x136   :  { %5590 = vmatpush3.msra.mxu1 %v7511_v28  ;;  %5564 = vmatprep.subr.mxu0 %v7680_v36 }
 0x137   :  { %5591 = vmatprep.subr.mxu1 %v9992_v0  ;;  %5565 = vmatpush3.msra.mxu0 %v9993_v45 }
 0x138   :  { %5592 = vmatpush3.msra.mxu1 %v9994_v22  ;;  %5566 = vmatprep.subr.mxu0 %v9995_v27 }
 0x139   :  { %5593 = vmatprep.subr.mxu1 %v9996_v8  ;;  %5567 = vmatpush3.msra.mxu0 %v9997_v59 }
 0x13a   :  { %5594 = vmatpush3.msra.mxu1 %v9998_v62  ;;  %5568 = vmatprep.subr.mxu0 %v7759_v57 }
 0x13b   :  { %5595 = vmatprep.subr.mxu1 %v9999_v14  ;;  %5569 = vmatpush3.msra.mxu0 %v10000_v44 }
 0x13c   :  { %5596 = vmatpush3.msra.mxu1 %v10001_v38  ;;  %5570 = vmatprep.subr.mxu0 %v7784_v30 }
 0x13d   :  { %5597 = vmatprep.subr.mxu1 %v10002_v54  ;;  %5571 = vmatpush3.msra.mxu0 %v7751_v32 }
 0x13e   :  { %5598 = vmatpush3.msra.mxu1 %v10003_v48  ;;  %5572 = vmatprep.subr.mxu0 %v7807_v63 }
 0x13f   :  { %5599 = vmatprep.subr.mxu1 %v10004_v53  ;;  %5573 = vmatpush3.msra.mxu0 %v7781_v34 }
 0x140   :  { %5600 = vmatpush3.msra.mxu1 %v10005_v10  ;;  %5574 = vmatprep.subr.mxu0 %v7829_v29 }
 0x141   :  { %5601 = vmatprep.subr.mxu1 %v10006_v31  ;;  %5575 = vmatpush3.msra.mxu0 %v7795_v3 }
 0x142   :  { %5602 = vmatpush3.msra.mxu1 %v10007_v17  ;;  %5576 = vmatprep.subr.mxu0 %v7861_v13 }
 0x143   :  { %5603 = vmatprep.subr.mxu1 %v10008_v58  ;;  %5577 = vmatpush3.msra.mxu0 %v7836_v21 }
 0x144   :  { %5604 = vmatpush3.msra.mxu1 %v10009_v5  ;;  %5578 = vmatprep.subr.mxu0 %v7881_v25 }
 0x145   :  { %5605 = vmatprep.subr.mxu1 %v7721_v43  ;;  %5579 = vmatpush3.msra.mxu0 %v7868_v1  ;;  %v10012_v43 = vld [vmem:[#allocation28_spill] sm:$0xff] }
 0x146   :  { %5606 = vmatpush3.msra.mxu1 %v10010_v52  ;;  %5580 = vmatprep.subr.mxu0 %v7898_v50 }
 0x147   :  { %5607 = vmatprep.subr.mxu1 %v10011_v11  ;;  %5581 = vmatpush3.msra.mxu0 %v7891_v7  ;;  %v10013_v11 = vand.u32 4294901760, %v7532_v51  ;;  %v10018_v51 = vand.u32 4294901760, %v7555_v12  ;;  %v10023_v12 = vand.u32 4294901760, %v7851_v37 }
 0x148   :  { %5608 = vmatpush3.msra.mxu1 %v7738_v16  ;;  %5582 = vmatprep.subr.mxu0 %v7914_v46  ;;  %v10014_v16 = vand.u32 4294901760, %v7517_v41  ;;  %v10015_v46 = vld [vmem:[#allocation42_spill] sm:$0xff]  ;;  %v10019_v41 = vand.u32 4294901760, %v7561_v49  ;;  %v10025_v49 = vand.u32 4294901760, %v7604_v33  ;;  %v10030_v33 = vand.u32 4294901760, %v9995_v27 }
 0x149   :  { %5609 = vmatprep.subr.mxu1 %v7769_v26  ;;  %5583 = vmatpush3.msra.mxu0 %v7907_v55  ;;  %v10016_v55 = vand.u32 4294901760, %v7547_v23  ;;  %v10020_v23 = vand.u32 4294901760, %v7593_v18  ;;  %v10026_v18 = vand.u32 4294901760, %v7646_v42  ;;  %v10033_v42 = vand.u32 4294901760, %v10000_v44 }
 0x14a   :  { %2437 = vmatprep.mubr.f32.mxu0 %v7841_v24  ;;  %5610 = vmatpush3.msra.mxu1 %v10012_v43  ;;  %v10017_v43 = vand.u32 4294901760, %v7538_v2  ;;  %v10021_v2 = vand.u32 4294901760, %v7841_v24  ;;  %v10028_v24 = vand.u32 4294901760, %v7680_v36  ;;  %v10032_v36 = vand.u32 4294901760, %v7759_v57 }
 0x14b   :  { %2440 = vmatmul.mubr.f32.vlgmr.msra.gmra.mxu0 %v7851_v37  ;;  %5611 = vmatprep.subr.mxu1 %v7816_v40  ;;  %v189_v37 = vld [vmem:[#allocation5 + $0x370] sm:$0xff]  ;;  %v10036_v27 = vand.u32 4294901760, %v7807_v63  ;;  %v10039_v63 = vand.u32 4294901760, %v7829_v29 }
 0x14c   :  { %5622 = vmatprep.subr.mxu0 %v10013_v11  ;;  %5612 = vmatpush3.msra.mxu1 %v7797_v6  ;;  %v10022_v11 = vand.u32 4294901760, %v7570_v9  ;;  %v10027_v9 = vand.u32 4294901760, %v7637_v61  ;;  %v185_v29 = vld [vmem:[#allocation5 + $0x350] sm:$0xff] }
 0x14d   :  { %5623 = vmatpush3.msra.mxu0 %v10014_v16  ;;  %5613 = vmatprep.subr.mxu1 %v10015_v46  ;;  %v10024_v16 = vand.u32 4294901760, %v7619_v39  ;;  %v10031_v39 = vand.u32 4294901760, %v9997_v59 }
 0x14e   :  { %5624 = vmatprep.subr.mxu0 %v10016_v55  ;;  %5614 = vmatpush3.msra.mxu1 %v7825_v60  ;;  %v204_v55 = vld [vmem:[#allocation5 + $0x3e8] sm:$0xff] }
 0x14f   :  { %5625 = vmatpush3.msra.mxu0 %v10017_v43  ;;  %5615 = vmatprep.subr.mxu1 %v7847_v20  ;;  %v8094_v59 = vand.u32 4294901760, %v204_v55 }
 0x150   :  { %5626 = vmatprep.subr.mxu0 %v10018_v51  ;;  %5616 = vmatpush3.msra.mxu1 %v7857_v19  ;;  %v186_v51 = vld [vmem:[#allocation5 + $0x358] sm:$0xff] }
 0x151   :  { %5627 = vmatpush3.msra.mxu0 %v10019_v41  ;;  %5617 = vmatprep.subr.mxu1 %v7875_v47  ;;  %10037 = vst [vmem:[#allocation40_spill] sm:$0xff] %v8094_v59  ;;  %v10044_v41 = vand.u32 4294901760, %v7861_v13 }
 0x152   :  { %5628 = vmatprep.subr.mxu0 %v10020_v23  ;;  %5618 = vmatpush3.msra.mxu1 %v7877_v56 }
 0x153   :  { %2544 = vmatprep.mubr.f32.mxu1 %v10021_v2  ;;  %5629 = vmatpush3.msra.mxu0 %v10022_v11  ;;  %v8128_v2 = vsub.f32 %v204_v55, %v8094_v59  ;;  %v10058_v55 = vld [vmem:[#allocation38_spill] sm:$0xff] }
 0x154   :  { %2548 = vmatmul.mubr.f32.vlgmr.msra.gmra.mxu1 %v10023_v12  ;;  %5630 = vmatprep.subr.mxu0 %v10024_v16  ;;  %v200_v12 = vld [vmem:[#allocation5 + $0x3c8] sm:$0xff]  ;;  %v10048_v16 = vld [vmem:[#allocation36_spill] sm:$0xff] }
 0x155   :  { %5657 = vmatprep.subr.mxu1 %v7506_v4  ;;  %5631 = vmatpush3.msra.mxu0 %v10025_v49  ;;  %v10029_v4 = vand.u32 4294901760, %v9993_v45  ;;  %v10035_v45 = vand.u32 4294901760, %v7751_v32  ;;  %v10038_v32 = vand.u32 4294901760, %v7781_v34 }
 0x156   :  { %5658 = vmatpush3.msra.mxu1 %v7498_v15  ;;  %5632 = vmatprep.subr.mxu0 %v10026_v18  ;;  %v206_v15 = vld [vmem:[#allocation5 + $0x3f8] sm:$0xff]  ;;  %v8142_v18 = vand.u32 4294901760, %v186_v51 }
 0x157   :  { %5659 = vmatprep.subr.mxu1 %v7519_v35  ;;  %5633 = vmatpush3.msra.mxu0 %v10027_v9  ;;  %v190_v35 = vld [vmem:[#allocation5 + $0x378] sm:$0xff]  ;;  %v8074_v61 = vand.u32 4294901760, %v206_v15  ;;  %v8145_v9 = vand.u32 4294901760, %v185_v29 }
 0x158   :  { %5660 = vmatpush3.msra.mxu1 %v7511_v28  ;;  %5634 = vmatprep.subr.mxu0 %v10028_v24  ;;  %v205_v28 = vld [vmem:[#allocation5 + $0x3f0] sm:$0xff]  ;;  %v8079_v43 = vand.u32 4294901760, %v190_v35  ;;  %10049 = vst [vmem:[#allocation26_spill] sm:$0xff] %v8142_v18 }
 0x159   :  { %5661 = vmatprep.subr.mxu1 %v9992_v0  ;;  %5635 = vmatpush3.msra.mxu0 %v10029_v4  ;;  %v10034_v0 = vand.u32 4294901760, %v7784_v30  ;;  %v8084_v57 = vand.u32 4294901760, %v205_v28  ;;  %v203_v30 = vld [vmem:[#allocation5 + $0x3e0] sm:$0xff]  ;;  %10050 = vst [vmem:[#allocation22_spill] sm:$0xff] %v8145_v9 }
 0x15a   :  { %5662 = vmatpush3.msra.mxu1 %v9994_v22  ;;  %5636 = vmatprep.subr.mxu0 %v10030_v33  ;;  %v188_v22 = vld [vmem:[#allocation5 + $0x368] sm:$0xff]  ;;  %v8103_v44 = vsub.f32 %v190_v35, %v8079_v43  ;;  %v8116_v34 = vand.u32 4294901760, %v203_v30  ;;  %v10054_v33 = vld [vmem:[#allocation35_spill] sm:$0xff]  ;;  %v8167_v35 = vand.u32 4294901760, %v200_v12 }
 0x15b   :  { %5663 = vmatprep.subr.mxu1 %v9996_v8  ;;  %5637 = vmatpush3.msra.mxu0 %v10031_v39  ;;  %v8092_v8 = vand.u32 4294901760, %v189_v37  ;;  %v9592_v39 = vand.u32 4294901760, %v8128_v2 }
 0x15c   :  { %5664 = vmatpush3.msra.mxu1 %v9998_v62  ;;  %5638 = vmatprep.subr.mxu0 %v10032_v36  ;;  %v187_v62 = vld [vmem:[#allocation5 + $0x360] sm:$0xff]  ;;  %10042 = vst [vmem:[#allocation23_spill] sm:$0xff] %v8116_v34  ;;  %v9597_v13 = vand.u32 4294901760, %v8103_v44  ;;  %v8156_v4 = vsub.f32 %v203_v30, %v8116_v34  ;;  %10055 = vst [vmem:[#allocation32_spill] sm:$0xff] %v8167_v35  ;;  %v10056_v36 = vand.u32 4294901760, %v7891_v7 }
 0x15d   :  { %5665 = vmatprep.subr.mxu1 %v9999_v14  ;;  %5639 = vmatpush3.msra.mxu0 %v10033_v42  ;;  %v8097_v14 = vsub.f32 %v206_v15, %v8074_v61  ;;  %v10053_v15 = vand.u32 4294901760, %v7898_v50  ;;  %v10057_v42 = vld [vmem:[#allocation41_spill] sm:$0xff] }
 0x15e   :  { %5666 = vmatpush3.msra.mxu1 %v10001_v38  ;;  %5640 = vmatprep.subr.mxu0 %v10034_v0  ;;  %v8108_v38 = vand.u32 4294901760, %v188_v22  ;;  %v8176_v50 = vsub.f32 %v8103_v44, %v9597_v13  ;;  %v10059_v0 = vand.u32 4294901760, %v10058_v55  ;;  %v199_v30 = vld [vmem:[#allocation5 + $0x3c0] sm:$0xff] }
 0x15f   :  { %5667 = vmatprep.subr.mxu1 %v10002_v54  ;;  %5641 = vmatpush3.msra.mxu0 %v10035_v45  ;;  %v202_v54 = vld [vmem:[#allocation5 + $0x3d8] sm:$0xff]  ;;  %v9598_v23 = vand.u32 4294901760, %v8097_v14  ;;  %v8185_v45 = vsub.f32 %v186_v51, %v8142_v18 }
 0x160   :  { %5668 = vmatpush3.msra.mxu1 %v10003_v48  ;;  %5642 = vmatprep.subr.mxu0 %v10036_v27  ;;  %10040 = vst [vmem:[#allocation16_spill] sm:$0xff] %v8108_v38  ;;  %v8111_v48 = vsub.f32 %v205_v28, %v8084_v57  ;;  %v8133_v11 = vand.u32 4294901760, %v202_v54  ;;  %v8140_v49 = vsub.f32 %v188_v22, %v8108_v38  ;;  %v184_v28 = vld [vmem:[#allocation5 + $0x348] sm:$0xff] }
 0x161   :  { %5669 = vmatprep.subr.mxu1 %v10004_v53  ;;  %5643 = vmatpush3.msra.mxu0 %v10038_v32  ;;  %v10041_v53 = vand.u32 4294901760, %v7795_v3  ;;  %v201_v3 = vld [vmem:[#allocation5 + $0x3d0] sm:$0xff]  ;;  %v8193_v22 = vsub.f32 %v185_v29, %v8145_v9  ;;  %v10064_v29 = vld [vmem:[#allocation28_spill] sm:$0xff] }
 0x162   :  { %5670 = vmatpush3.msra.mxu1 %v10005_v10  ;;  %5644 = vmatprep.subr.mxu0 %v10039_v63  ;;  %v8118_v10 = vand.u32 4294901760, %v187_v62  ;;  %10046 = vst [vmem:[#allocation30_spill] sm:$0xff] %v8133_v11  ;;  %v9591_v27 = vand.u32 4294901760, %v8140_v49  ;;  %v10060_v32 = vld [vmem:[#allocation39_spill] sm:$0xff] }
 0x163   :  { %5671 = vmatprep.subr.mxu1 %v10006_v31  ;;  %5645 = vmatpush3.msra.mxu0 %v10041_v53  ;;  %v8124_v31 = vsub.f32 %v189_v37, %v8092_v8  ;;  %v8179_v37 = vsub.f32 %v202_v54, %v8133_v11  ;;  %v10061_v63 = vand.u32 4294901760, %v10060_v32  ;;  %v10062_v54 = vld [vmem:[#allocation27_spill] sm:$0xff]  ;;  %v9595_v53 = vand.u32 4294901760, %v8156_v4 }
 0x164   :  { %5672 = vmatpush3.msra.mxu1 %v10007_v17  ;;  %10043 = vst [vmem:[#allocation29_spill] sm:$0xff] %v8118_v10  ;;  %5646 = vmatprep.subr.mxu0 %v10044_v41  ;;  %v10045_v17 = vand.u32 4294901760, %v7836_v21  ;;  %v9594_v21 = vand.u32 4294901760, %v8111_v48  ;;  %v8151_v24 = vsub.f32 %v187_v62, %v8118_v10  ;;  %v183_v62 = vld [vmem:[#allocation5 + $0x340] sm:$0xff]  ;;  %v9600_v32 = vand.u32 4294901760, %v8185_v45 }
 0x165   :  { %5673 = vmatprep.subr.mxu1 %v10008_v58  ;;  %v10047_v58 = vand.u32 4294901760, %v7881_v25  ;;  %v8153_v25 = vand.u32 4294901760, %v201_v3  ;;  %2714 = vmatprep.mubr.f32.mxu0 %v10062_v54  ;;  %v9599_v55 = vand.u32 4294901760, %v8179_v37 }
 0x166   :  { %5647 = vmatpush3.msra.mxu0 %v10045_v17  ;;  %5674 = vmatpush3.msra.mxu1 %v10009_v5  ;;  %v10051_v5 = vand.u32 4294901760, %v7868_v1  ;;  %v8164_v1 = vsub.f32 %v8097_v14, %v9598_v23  ;;  %v8190_v7 = vsub.f32 %v8111_v48, %v9594_v21  ;;  %v9596_v51 = vand.u32 4294901760, %v8151_v24  ;;  %v10065_v17 = vld [vmem:[#allocation43_spill] sm:$0xff]  ;;  %v180_v23 = vld [vmem:[#allocation5 + $0x328] sm:$0xff] }
 0x167   :  { %5648 = vmatprep.subr.mxu0 %v10047_v58  ;;  %5675 = vmatprep.subr.mxu1 %v10048_v16  ;;  %10052 = vst [vmem:[#allocation15_spill] sm:$0xff] %v8153_v25  ;;  %v8204_v41 = vsub.f32 %v201_v3, %v8153_v25  ;;  %v179_v58 = vld [vmem:[#allocation5 + $0x320] sm:$0xff] }
 0x168   :  { %5649 = vmatpush3.msra.mxu0 %v10051_v5  ;;  %5676 = vmatpush3.msra.mxu1 %v10010_v52  ;;  %v9593_v52 = vand.u32 4294901760, %v8124_v31  ;;  %v8217_v5 = vsub.f32 %v8128_v2, %v9592_v39 }
 0x169   :  { %5650 = vmatprep.subr.mxu0 %v10053_v15  ;;  %5677 = vmatprep.subr.mxu1 %v10054_v33  ;;  %v8220_v15 = vsub.f32 %v200_v12, %v8167_v35  ;;  %v8225_v33 = vand.u32 4294901760, %v199_v30  ;;  %v9602_v39 = vand.u32 4294901760, %v8204_v41 }
 0x16a   :  { %5651 = vmatpush3.msra.mxu0 %v10056_v36  ;;  %5678 = vmatpush3.msra.mxu1 %v10057_v42  ;;  %v8212_v16 = vsub.f32 %v8124_v31, %v9593_v52  ;;  %v8227_v36 = vand.u32 4294901760, %v183_v62  ;;  %v198_v42 = vld [vmem:[#allocation5 + $0x3b8] sm:$0xff]  ;;  %v181_v52 = vld [vmem:[#allocation5 + $0x330] sm:$0xff] }
 0x16b   :  { %5652 = vmatprep.subr.mxu0 %v10059_v0  ;;  %5679 = vmatprep.subr.mxu1 %v7769_v26  ;;  %v8199_v26 = vand.u32 4294901760, %v184_v28  ;;  %10066 = vst [vmem:[#allocation17_spill] sm:$0xff] %v8225_v33  ;;  %v182_v0 = vld [vmem:[#allocation5 + $0x338] sm:$0xff]  ;;  %v8260_v21 = vand.u32 4294901760, %v198_v42 }
 0x16c   :  { %5653 = vmatpush3.msra.mxu0 %v10061_v63  ;;  %5680 = vmatpush3.msra.mxu1 %v10064_v29  ;;  %10067 = vst [vmem:[#allocation33_spill] sm:$0xff] %v8227_v36  ;;  %v9601_v63 = vand.u32 4294901760, %v8193_v22  ;;  %v8248_v29 = vsub.f32 %v8156_v4, %v9595_v53  ;;  %v9603_v53 = vand.u32 4294901760, %v8220_v15  ;;  %v8273_v13 = vand.u32 4294901760, %v182_v0 }
 0x16d   :  { %10063 = vst [vmem:[#allocation37_spill] sm:$0xff] %v8199_v26  ;;  %2716 = vmatmul.mubr.f32.vlgmr.msra.gmra.mxu0 %v10065_v17  ;;  %5681 = vmatprep.subr.mxu1 %v7816_v40  ;;  %v8236_v40 = vsub.f32 %v8140_v49, %v9591_v27  ;;  %v8253_v27 = vsub.f32 %v8151_v24, %v9596_v51  ;;  %10069 = vst [vmem:[#allocation19_spill] sm:$0xff] %v8260_v21 }
 0x16e   :  { %5692 = vmatprep.subr.mxu0 %v8074_v61  ;;  %5682 = vmatpush3.msra.mxu1 %v7797_v6  ;;  %v8243_v6 = vsub.f32 %v184_v28, %v8199_v26  ;;  %v8266_v51 = vsub.f32 %v183_v62, %v8227_v36  ;;  %10071 = vst [vmem:[#allocation20_spill] sm:$0xff] %v8273_v13 }
 0x16f   :  { %5693 = vmatpush3.msra.mxu0 %v8079_v43  ;;  %5683 = vmatprep.subr.mxu1 %v10015_v46  ;;  %v2949_v46 = vand.u32 4294901760, %v8212_v16  ;;  %v197_v16 = vld [vmem:[#allocation5 + $0x3b0] sm:$0xff]  ;;  %v8276_v28 = vsub.f32 %v199_v30, %v8225_v33  ;;  %v8284_v62 = vsub.f32 %v8185_v45, %v9600_v32  ;;  %v8291_v12 = vsub.f32 %v8193_v22, %v9601_v63  ;;  %v196_v32 = vld [vmem:[#allocation5 + $0x3a8] sm:$0xff]  ;;  %v195_v30 = vld [vmem:[#allocation5 + $0x3a0] sm:$0xff] }
 0x170   :  { %5694 = vmatprep.subr.mxu0 %v8084_v57  ;;  %10068 = vst [vmem:[#allocation34_spill] sm:$0xff] %v8243_v6  ;;  %5684 = vmatpush3.msra.mxu1 %v7825_v60  ;;  %10070 = vst [vmem:[#allocation18_spill] sm:$0xff] %v8266_v51  ;;  %v8271_v60 = vsub.f32 %v8179_v37, %v9599_v55  ;;  %v8286_v55 = vand.u32 4294901760, %v181_v52  ;;  %v8305_v63 = vand.u32 4294901760, %v197_v16 }
 0x171   :  { %5695 = vmatpush3.msra.mxu0 %v8092_v8  ;;  %5685 = vmatprep.subr.mxu1 %v7847_v20  ;;  %10072 = vst [vmem:[#allocation21_spill] sm:$0xff] %v8276_v28  ;;  %v2956_v20 = vand.u32 4294901760, %v8236_v40  ;;  %v8300_v40 = vsub.f32 %v8204_v41, %v9602_v39  ;;  %v8315_v39 = vsub.f32 %v198_v42, %v8260_v21  ;;  %v2970_v42 = vand.u32 4294901760, %v8284_v62 }
 0x172   :  { %5696 = vmatprep.subr.mxu0 %v8094_v59  ;;  %5686 = vmatpush3.msra.mxu1 %v7857_v19  ;;  %10073 = vst [vmem:[#allocation25_spill] sm:$0xff] %v8286_v55  ;;  %v3075_v19 = vand.u32 4294901760, %v8248_v29  ;;  %10074 = vst [vmem:[#allocation24_spill] sm:$0xff] %v8305_v63  ;;  %v8312_v29 = vand.u32 4294901760, %v180_v23  ;;  %v8346_v62 = vand.u32 4294901760, %v179_v58  ;;  %v10083_v59 = vand.u32 4294901760, %v8276_v28 }
 0x173   :  { %5697 = vmatpush3.msra.mxu0 %v8108_v38  ;;  %5687 = vmatprep.subr.mxu1 %v7875_v47  ;;  %v8310_v47 = vsub.f32 %v8220_v15, %v9603_v53  ;;  %10076 = vst [vmem:[#allocation42_spill] sm:$0xff] %v8315_v39  ;;  %v76_v38 = vld [vmem:[#allocation2 + $0x38] sm:$0xff]  ;;  %v10079_v53 = vand.u32 4294901760, %v8176_v50  ;;  %v3089_v3 = vand.u32 4294901760, %v8300_v40  ;;  %v194_v40 = vld [vmem:[#allocation5 + $0x398] sm:$0xff]  ;;  %v193_v50 = vld [vmem:[#allocation5 + $0x390] sm:$0xff] }
 0x174   :  { %5698 = vmatprep.subr.mxu0 %v8116_v34  ;;  %5688 = vmatpush3.msra.mxu1 %v7877_v56  ;;  %10075 = vst [vmem:[#allocation31_spill] sm:$0xff] %v8312_v29  ;;  %v3082_v56 = vand.u32 4294901760, %v8271_v60  ;;  %v10077_v34 = vand.u32 4294901760, %v8164_v1  ;;  %v8333_v60 = vand.u32 4294901760, %v196_v32  ;;  %10081 = vst [vmem:[#allocation35_spill] sm:$0xff] %v8346_v62 }
 0x175   :  { %2818 = vmatprep.mubr.f32.mxu1 %v10062_v54  ;;  %5699 = vmatpush3.msra.mxu0 %v8118_v10  ;;  %v8321_v54 = vsub.f32 %v182_v0, %v8273_v13  ;;  %v8330_v10 = vsub.f32 %v181_v52, %v8286_v55  ;;  %v178_v0 = vld [vmem:[#allocation5 + $0x318] sm:$0xff]  ;;  %v8344_v52 = vand.u32 4294901760, %v195_v30 }
 0x176   :  { %2820 = vmatmul.mubr.f32.vlgmr.msra.gmra.mxu1 %v10065_v17  ;;  %5700 = vmatprep.subr.mxu0 %v8133_v11  ;;  %10078 = vst [vmem:[#allocation36_spill] sm:$0xff] %v8333_v60  ;;  %v177_v17 = vld [vmem:[#allocation5 + $0x310] sm:$0xff]  ;;  %v75_v11 = vld [vmem:[#allocation2 + $0x30] sm:$0xff] }
 0x177   :  { %5727 = vmatprep.subr.mxu1 %v10077_v34  ;;  %5701 = vmatpush3.msra.mxu0 %v8142_v18  ;;  %v10080_v34 = vand.u32 4294901760, %v8243_v6  ;;  %v10082_v18 = vand.u32 4294901760, %v8190_v7 }
 0x178   :  { %5728 = vmatpush3.msra.mxu1 %v10079_v53  ;;  %5702 = vmatprep.subr.mxu0 %v8153_v25  ;;  %v8353_v53 = vsub.f32 %v180_v23, %v8312_v29  ;;  %v8363_v25 = vsub.f32 %v8276_v28, %v10083_v59  ;;  %v8370_v23 = vand.u32 4294901760, %v178_v0  ;;  %v8381_v59 = vsub.f32 %v196_v32, %v8333_v60 }
 0x179   :  { %v8342_v1 = vsub.f32 %v8243_v6, %v10080_v34  ;;  %5729 = vmatprep.subr.mxu1 %v10082_v18  ;;  %v8357_v6 = vsub.f32 %v197_v16, %v8305_v63  ;;  %5703 = vmatpush3.msra.mxu0 %v8145_v9  ;;  %v10084_v18 = vand.u32 4294901760, %v8266_v51  ;;  %v8372_v34 = vand.u32 4294901760, %v76_v38 }
 0x17a   :  { %5730 = vmatpush3.msra.mxu1 %v2949_v46  ;;  %5704 = vmatprep.subr.mxu0 %v8167_v35  ;;  %v10086_v16 = vand.u32 4294901760, %v8217_v5  ;;  %v8378_v9 = vand.u32 4294901760, %v177_v17  ;;  %v8383_v28 = vand.u32 4294901760, %v75_v11  ;;  %v8390_v35 = vand.u32 4294901760, %v194_v40 }
 0x17b   :  { %v8368_v7 = vsub.f32 %v8266_v51, %v10084_v18  ;;  %10085 = vst [vmem:[#allocation41_spill] sm:$0xff] %v8372_v34  ;;  %5705 = vmatpush3.msra.mxu0 %v8199_v26  ;;  %v2984_v18 = vand.u32 4294901760, %v8342_v1  ;;  %v8388_v51 = vsub.f32 %v179_v58, %v8346_v62  ;;  %v10089_v32 = vand.u32 4294901760, %v8315_v39  ;;  %v192_v1 = vld [vmem:[#allocation5 + $0x388] sm:$0xff]  ;;  %3162 = vmatprep.mubr.f32.mxu1 %v8372_v34 }
 0x17c   :  { %5731 = vmatprep.subr.mxu1 %v10086_v16  ;;  %10087 = vst [vmem:[#allocation38_spill] sm:$0xff] %v8383_v28  ;;  %5706 = vmatprep.subr.mxu0 %v8225_v33  ;;  %v8399_v46 = vand.u32 4294901760, %v193_v50  ;;  %v8403_v58 = vsub.f32 %v195_v30, %v8344_v52  ;;  %v10091_v5 = vand.u32 4294901760, %v8253_v27  ;;  %v176_v26 = vld [vmem:[#allocation5 + $0x308] sm:$0xff]  ;;  %v10092_v30 = vand.u32 4294901760, %v8321_v54 }
 0x17d   :  { %5732 = vmatpush3.msra.mxu1 %v2956_v20  ;;  %10088 = vst [vmem:[#allocation39_spill] sm:$0xff] %v8388_v51  ;;  %v8397_v16 = vsub.f32 %v8315_v39, %v10089_v32  ;;  %5707 = vmatpush3.msra.mxu0 %v8227_v36  ;;  %v2991_v33 = vand.u32 4294901760, %v8368_v7  ;;  %v8411_v32 = vsub.f32 %v178_v0, %v8370_v23  ;;  %v191_v7 = vld [vmem:[#allocation5 + $0x380] sm:$0xff] }
 0x17e   :  { %5733 = vmatprep.subr.mxu1 %v3075_v19  ;;  %10090 = vst [vmem:[#allocation27_spill] sm:$0xff] %v8399_v46  ;;  %v3103_v19 = vand.u32 4294901760, %v8363_v25  ;;  %v8414_v39 = vsub.f32 %v76_v38, %v8372_v34  ;;  %5708 = vmatprep.subr.mxu0 %v8260_v21  ;;  %v2997_v20 = vsub.f32 %v8321_v54, %v10092_v30  ;;  %v10093_v38 = vand.u32 4294901760, %v8330_v10  ;;  %v10129_v34 = vld [vmem:[#allocation25_spill] sm:$0xff] }
 0x17f   :  { %5734 = vmatpush3.msra.mxu1 %v10091_v5  ;;  %v8421_v27 = vsub.f32 %v177_v17, %v8378_v9  ;;  %v175_v5 = vld [vmem:[#allocation5 + $0x300] sm:$0xff]  ;;  %v8425_v0 = vsub.f32 %v75_v11, %v8383_v28  ;;  %5709 = vmatpush3.msra.mxu0 %v8273_v13  ;;  %v8431_v21 = vand.u32 4294901760, %v192_v1  ;;  %v8435_v17 = vsub.f32 %v194_v40, %v8390_v35 }
 0x180   :  { %5735 = vmatprep.subr.mxu1 %v3082_v56  ;;  %v3004_v56 = vsub.f32 %v8330_v10, %v10093_v38  ;;  %5710 = vmatprep.subr.mxu0 %v8305_v63  ;;  %v3110_v11 = vand.u32 4294901760, %v8397_v16  ;;  %v10094_v25 = vand.u32 4294901760, %v8357_v6  ;;  %v8442_v13 = vand.u32 4294901760, %v176_v26 }
 0x181   :  { %5736 = vmatpush3.msra.mxu1 %v2970_v42  ;;  %5711 = vmatpush3.msra.mxu0 %v8286_v55  ;;  %v10095_v30 = vand.u32 4294901760, %v8291_v12  ;;  %v8448_v40 = vand.u32 4294901760, %v191_v7  ;;  %v8450_v36 = vand.u32 4294901760, %v175_v5  ;;  %v8454_v16 = vsub.f32 %v193_v50, %v8399_v46 }
 0x182   :  { %5737 = vmatprep.subr.mxu1 %v3089_v3  ;;  %v3116_v42 = vsub.f32 %v8357_v6, %v10094_v25  ;;  %5712 = vmatprep.subr.mxu0 %v8333_v60  ;;  %v10096_v25 = vand.u32 4294901760, %v8310_v47  ;;  %v2998_v38 = vand.u32 4294901760, %v2997_v20  ;;  %v10097_v55 = vand.u32 4294901760, %v8381_v59 }
 0x183   :  { %5738 = vmatpush3.msra.mxu1 %v10095_v30  ;;  %v9646_v30 = vand.u32 4294901760, %v8388_v51  ;;  %5713 = vmatpush3.msra.mxu0 %v8312_v29  ;;  %v3005_v3 = vand.u32 4294901760, %v3004_v56  ;;  %v10098_v50 = vand.u32 4294901760, %v8353_v53  ;;  %v8470_v20 = vsub.f32 %v192_v1, %v8431_v21 }
 0x184   :  { %5739 = vmatprep.subr.mxu1 %v10096_v25  ;;  %v3123_v12 = vsub.f32 %v8381_v59, %v10097_v55  ;;  %5714 = vmatprep.subr.mxu0 %v8344_v52  ;;  %v3117_v55 = vand.u32 4294901760, %v3116_v42  ;;  %v8474_v25 = vsub.f32 %v176_v26, %v8442_v13  ;;  %v10099_v63 = vand.u32 4294901760, %v8403_v58 }
 0x185   :  { %5740 = vmatpush3.msra.mxu1 %v2984_v18  ;;  %v3011_v60 = vsub.f32 %v8353_v53, %v10098_v50  ;;  %5715 = vmatpush3.msra.mxu0 %v8346_v62  ;;  %v8482_v50 = vsub.f32 %v175_v5, %v8450_v36  ;;  %v10101_v1 = vand.u32 4294901760, %v8414_v39  ;;  %v8489_v26 = vsub.f32 %v191_v7, %v8448_v40 }
 0x186   :  { %5741 = vmatprep.subr.mxu1 %v3103_v19  ;;  %v3130_v18 = vsub.f32 %v8403_v58, %v10099_v63  ;;  %5716 = vmatprep.subr.mxu0 %v8390_v35  ;;  %v3124_v63 = vand.u32 4294901760, %v3123_v12  ;;  %v10103_v5 = vand.u32 4294901760, %v8425_v0  ;;  %v10104_v7 = vand.u32 4294901760, %v8435_v17 }
 0x187   :  { %5742 = vmatpush3.msra.mxu1 %v2991_v33  ;;  %10100 = vst [vmem:[#allocation28_spill] sm:$0xff] %v8482_v50  ;;  %v2924_v19 = vsub.f32 %v8414_v39, %v10101_v1  ;;  %10102 = vst [vmem:[#allocation43_spill] sm:$0xff] %v8489_v26  ;;  %v3018_v33 = vsub.f32 %v8388_v51, %v9646_v30  ;;  %5717 = vmatpush3.msra.mxu0 %v8370_v23  ;;  %v3012_v1 = vand.u32 4294901760, %v3011_v60 }
 0x188   :  { %5743 = vmatprep.subr.mxu1 %v3110_v11  ;;  %v2930_v56 = vsub.f32 %v8425_v0, %v10103_v5  ;;  %v3137_v42 = vsub.f32 %v8435_v17, %v10104_v7  ;;  %5718 = vmatprep.subr.mxu0 %v8399_v46  ;;  %v3131_v12 = vand.u32 4294901760, %v3130_v18  ;;  %v10105_v30 = vand.u32 4294901760, %v8411_v32 }
 0x189   :  { %5744 = vmatpush3.msra.mxu1 %v2998_v38  ;;  %5719 = vmatpush3.msra.mxu0 %v8378_v9  ;;  %v2925_v60 = vand.u32 4294901760, %v2924_v19  ;;  %v10106_v38 = vand.u32 4294901760, %v8454_v16  ;;  %v9650_v11 = vand.u32 4294901760, %v8489_v26  ;;  %v10107_v46 = vand.u32 4294901760, %v8421_v27 }
 0x18a   :  { %5745 = vmatprep.subr.mxu1 %v3117_v55  ;;  %v3025_v5 = vsub.f32 %v8411_v32, %v10105_v30  ;;  %5720 = vmatprep.subr.mxu0 %v8431_v21  ;;  %v3019_v55 = vand.u32 4294901760, %v3018_v33  ;;  %v2931_v18 = vand.u32 4294901760, %v2930_v56  ;;  %v9649_v47 = vand.u32 4294901760, %v8482_v50 }
 0x18b   :  { %5746 = vmatpush3.msra.mxu1 %v3005_v3  ;;  %v3144_v7 = vsub.f32 %v8454_v16, %v10106_v38  ;;  %v3032_v30 = vsub.f32 %v8421_v27, %v10107_v46  ;;  %5721 = vmatpush3.msra.mxu0 %v8442_v13  ;;  %v3138_v3 = vand.u32 4294901760, %v3137_v42  ;;  %v10108_v19 = vand.u32 4294901760, %v8470_v20 }
 0x18c   :  { %5747 = vmatprep.subr.mxu1 %v3124_v63  ;;  %5722 = vmatprep.subr.mxu0 %v8448_v40  ;;  %v3026_v63 = vand.u32 4294901760, %v3025_v5  ;;  %v10109_v56 = vand.u32 4294901760, %v8474_v25  ;;  %v3158_v42 = vsub.f32 %v8489_v26, %v9650_v11  ;;  %v10127_v11 = vld [vmem:[#allocation20_spill] sm:$0xff] }
 0x18d   :  { %5748 = vmatpush3.msra.mxu1 %v3012_v1  ;;  %v3151_v38 = vsub.f32 %v8470_v20, %v10108_v19  ;;  %5723 = vmatpush3.msra.mxu0 %v8450_v36  ;;  %v3145_v46 = vand.u32 4294901760, %v3144_v7  ;;  %v3033_v1 = vand.u32 4294901760, %v3032_v30  ;;  %v10111_v30 = vld [vmem:[#allocation34_spill] sm:$0xff]  ;;  %v10113_v19 = vld [vmem:[#allocation21_spill] sm:$0xff] }
 0x18e   :  { %5749 = vmatprep.subr.mxu1 %v3131_v12  ;;  %v3039_v33 = vsub.f32 %v8474_v25, %v10109_v56  ;;  %2926 = vmatprep.mubr.f32.mxu0 %v2925_v60  ;;  %v3046_v12 = vsub.f32 %v8482_v50, %v9649_v47  ;;  %v3159_v7 = vand.u32 4294901760, %v3158_v42  ;;  %v10116_v56 = vld [vmem:[#allocation29_spill] sm:$0xff]  ;;  %v10119_v42 = vld [vmem:[#allocation26_spill] sm:$0xff]  ;;  %v10126_v47 = vld [vmem:[#allocation19_spill] sm:$0xff] }
 0x18f   :  { %5750 = vmatpush3.msra.mxu1 %v3019_v55  ;;  %2932 = vmatmul.mubr.f32.vlgmr.msra.gmra.mxu0 %v2931_v18  ;;  %v3152_v5 = vand.u32 4294901760, %v3151_v38  ;;  %v10110_v18 = vld [vmem:[#allocation40_spill] sm:$0xff]  ;;  %v10114_v38 = vld [vmem:[#allocation23_spill] sm:$0xff] }
 0x190   :  { %5751 = vmatprep.subr.mxu1 %v3138_v3  ;;  %5762 = vmatprep.subr.mxu0 %v8097_v14  ;;  %v3040_v60 = vand.u32 4294901760, %v3039_v33  ;;  %v3047_v55 = vand.u32 4294901760, %v3046_v12  ;;  %v10112_v3 = vld [vmem:[#allocation16_spill] sm:$0xff]  ;;  %v10117_v33 = vld [vmem:[#allocation42_spill] sm:$0xff] }
 0x191   :  { %5752 = vmatpush3.msra.mxu1 %v3026_v63  ;;  %5763 = vmatpush3.msra.mxu0 %v8103_v44  ;;  %v10115_v63 = vld [vmem:[#allocation18_spill] sm:$0xff] }
 0x192   :  { %5753 = vmatprep.subr.mxu1 %v3145_v46  ;;  %5764 = vmatprep.subr.mxu0 %v8111_v48  ;;  %v10118_v46 = vld [vmem:[#allocation30_spill] sm:$0xff] }
 0x193   :  { %5754 = vmatpush3.msra.mxu1 %v3033_v1  ;;  %5765 = vmatpush3.msra.mxu0 %v8124_v31  ;;  %v10120_v1 = vld [vmem:[#allocation15_spill] sm:$0xff]  ;;  %v10121_v12 = vld [vmem:[#allocation22_spill] sm:$0xff] }
 0x194   :  { %5755 = vmatprep.subr.mxu1 %v3152_v5  ;;  %5766 = vmatprep.subr.mxu0 %v8128_v2  ;;  %v10122_v5 = vld [vmem:[#allocation32_spill] sm:$0xff] }
 0x195   :  { %5756 = vmatpush3.msra.mxu1 %v3040_v60  ;;  %5767 = vmatpush3.msra.mxu0 %v8140_v49  ;;  %v10123_v60 = vld [vmem:[#allocation37_spill] sm:$0xff] }
 0x196   :  { %5757 = vmatprep.subr.mxu1 %v3159_v7  ;;  %5768 = vmatprep.subr.mxu0 %v8156_v4  ;;  %v10124_v7 = vld [vmem:[#allocation17_spill] sm:$0xff] }
 0x197   :  { %5758 = vmatpush3.msra.mxu1 %v3047_v55  ;;  %5769 = vmatpush3.msra.mxu0 %v8151_v24  ;;  %v10125_v55 = vld [vmem:[#allocation33_spill] sm:$0xff] }
 0x198   :  { %3164 = vmatmul.mubr.f32.vlgmr.msra.gmra.mxu1 %v8383_v28  ;;  %5770 = vmatprep.subr.mxu0 %v8179_v37  ;;  %v10128_v28 = vld [vmem:[#allocation24_spill] sm:$0xff] }
 0x199   :  { %5797 = vmatprep.subr.mxu1 %v8074_v61  ;;  %5771 = vmatpush3.msra.mxu0 %v8185_v45 }
 0x19a   :  { %5798 = vmatpush3.msra.mxu1 %v8079_v43  ;;  %5772 = vmatprep.subr.mxu0 %v8204_v41 }
 0x19b   :  { %5799 = vmatprep.subr.mxu1 %v8084_v57  ;;  %5773 = vmatpush3.msra.mxu0 %v8193_v22 }
 0x19c   :  { %5800 = vmatpush3.msra.mxu1 %v8092_v8  ;;  %5774 = vmatprep.subr.mxu0 %v8220_v15 }
 0x19d   :  { %5801 = vmatprep.subr.mxu1 %v10110_v18  ;;  %5775 = vmatpush3.msra.mxu0 %v10111_v30 }
 0x19e   :  { %5802 = vmatpush3.msra.mxu1 %v10112_v3  ;;  %5776 = vmatprep.subr.mxu0 %v10113_v19 }
 0x19f   :  { %5803 = vmatprep.subr.mxu1 %v10114_v38  ;;  %5777 = vmatpush3.msra.mxu0 %v10115_v63 }
 0x1a0   :  { %5804 = vmatpush3.msra.mxu1 %v10116_v56  ;;  %5778 = vmatprep.subr.mxu0 %v10117_v33 }
 0x1a1   :  { %5805 = vmatprep.subr.mxu1 %v10118_v46  ;;  %5779 = vmatpush3.msra.mxu0 %v8321_v54 }
 0x1a2   :  { %5806 = vmatpush3.msra.mxu1 %v10119_v42  ;;  %5780 = vmatprep.subr.mxu0 %v8357_v6 }
 0x1a3   :  { %5807 = vmatprep.subr.mxu1 %v10120_v1  ;;  %5781 = vmatpush3.msra.mxu0 %v8330_v10 }
 0x1a4   :  { %5808 = vmatpush3.msra.mxu1 %v10121_v12  ;;  %5782 = vmatprep.subr.mxu0 %v8381_v59 }
 0x1a5   :  { %5809 = vmatprep.subr.mxu1 %v10122_v5  ;;  %5783 = vmatpush3.msra.mxu0 %v8353_v53 }
 0x1a6   :  { %5810 = vmatpush3.msra.mxu1 %v10123_v60  ;;  %5784 = vmatprep.subr.mxu0 %v8403_v58 }
 0x1a7   :  { %5811 = vmatprep.subr.mxu1 %v10124_v7  ;;  %5785 = vmatpush3.msra.mxu0 %v8388_v51  ;;  %v10130_v51 = vld [vmem:[#allocation36_spill] sm:$0xff] }
 0x1a8   :  { %5812 = vmatpush3.msra.mxu1 %v10125_v55  ;;  %5786 = vmatprep.subr.mxu0 %v8435_v17 }
 0x1a9   :  { %5813 = vmatprep.subr.mxu1 %v10126_v47  ;;  %5787 = vmatpush3.msra.mxu0 %v8411_v32 }
 0x1aa   :  { %5814 = vmatpush3.msra.mxu1 %v10127_v11  ;;  %5788 = vmatprep.subr.mxu0 %v8454_v16 }
 0x1ab   :  { %5815 = vmatprep.subr.mxu1 %v10128_v28  ;;  %5789 = vmatpush3.msra.mxu0 %v8421_v27 }
 0x1ac   :  { %5816 = vmatpush3.msra.mxu1 %v10129_v34  ;;  %5790 = vmatprep.subr.mxu0 %v8470_v20 }
 0x1ad   :  { %5817 = vmatprep.subr.mxu1 %v10130_v51  ;;  %5791 = vmatpush3.msra.mxu0 %v8474_v25  ;;  %v10131_v51 = vand.u32 4294901760, %v8097_v14  ;;  %v10136_v14 = vand.u32 4294901760, %v8128_v2  ;;  %v10141_v2 = vand.u32 4294901760, %v8425_v0 }
 0x1ae   :  { %5818 = vmatpush3.msra.mxu1 %v8312_v29  ;;  %5792 = vmatprep.subr.mxu0 %v8489_v26  ;;  %v10132_v29 = vand.u32 4294901760, %v8103_v44  ;;  %v10133_v26 = vld [vmem:[#allocation27_spill] sm:$0xff]  ;;  %v10137_v44 = vand.u32 4294901760, %v8140_v49  ;;  %v10143_v49 = vand.u32 4294901760, %v8185_v45  ;;  %v10148_v45 = vand.u32 4294901760, %v10113_v19 }
 0x1af   :  { %5819 = vmatprep.subr.mxu1 %v8344_v52  ;;  %5793 = vmatpush3.msra.mxu0 %v8482_v50  ;;  %v10134_v50 = vand.u32 4294901760, %v8111_v48  ;;  %v10138_v48 = vand.u32 4294901760, %v8156_v4  ;;  %v10144_v4 = vand.u32 4294901760, %v8204_v41 }
 0x1b0   :  { %3299 = vmatprep.mubr.f32.mxu0 %v8414_v39  ;;  %5820 = vmatpush3.msra.mxu1 %v8346_v62  ;;  %v10135_v62 = vand.u32 4294901760, %v8124_v31  ;;  %v10139_v31 = vand.u32 4294901760, %v8414_v39  ;;  %v238_v39 = vld [vmem:[#allocation5 + $0x4f8] sm:$0xff] }
 0x1b1   :  { %3302 = vmatmul.mubr.f32.vlgmr.msra.gmra.mxu0 %v8425_v0  ;;  %5821 = vmatprep.subr.mxu1 %v8390_v35  ;;  %v221_v0 = vld [vmem:[#allocation5 + $0x470] sm:$0xff] }
 0x1b2   :  { %5832 = vmatprep.subr.mxu0 %v10131_v51  ;;  %5822 = vmatpush3.msra.mxu1 %v8370_v23  ;;  %v10140_v51 = vand.u32 4294901760, %v8151_v24  ;;  %v10145_v24 = vand.u32 4294901760, %v8193_v22  ;;  %v10150_v22 = vand.u32 4294901760, %v10117_v33  ;;  %v219_v33 = vld [vmem:[#allocation5 + $0x460] sm:$0xff] }
 0x1b3   :  { %5833 = vmatpush3.msra.mxu0 %v10132_v29  ;;  %5823 = vmatprep.subr.mxu1 %v10133_v26  ;;  %v10142_v29 = vand.u32 4294901760, %v8179_v37  ;;  %v10146_v37 = vand.u32 4294901760, %v8220_v15  ;;  %v237_v15 = vld [vmem:[#allocation5 + $0x4f0] sm:$0xff] }
 0x1b4   :  { %5834 = vmatprep.subr.mxu0 %v10134_v50  ;;  %5824 = vmatpush3.msra.mxu1 %v8378_v9  ;;  %v10152_v50 = vand.u32 4294901760, %v8357_v6  ;;  %v8665_v19 = vand.u32 4294901760, %v237_v15 }
 0x1b5   :  { %5835 = vmatpush3.msra.mxu0 %v10135_v62  ;;  %5825 = vmatprep.subr.mxu1 %v8431_v21  ;;  %v10151_v62 = vand.u32 4294901760, %v8321_v54  ;;  %v220_v54 = vld [vmem:[#allocation5 + $0x468] sm:$0xff] }
 0x1b6   :  { %5836 = vmatprep.subr.mxu0 %v10136_v14  ;;  %5826 = vmatpush3.msra.mxu1 %v8442_v13  ;;  %v218_v14 = vld [vmem:[#allocation5 + $0x458] sm:$0xff] }
 0x1b7   :  { %5837 = vmatpush3.msra.mxu0 %v10137_v44  ;;  %5827 = vmatprep.subr.mxu1 %v8448_v40  ;;  %v10159_v44 = vld [vmem:[#allocation39_spill] sm:$0xff] }
 0x1b8   :  { %5838 = vmatprep.subr.mxu0 %v10138_v48  ;;  %5828 = vmatpush3.msra.mxu1 %v8450_v36  ;;  %v233_v48 = vld [vmem:[#allocation5 + $0x4d0] sm:$0xff] }
 0x1b9   :  { %3406 = vmatprep.mubr.f32.mxu1 %v10139_v31  ;;  %5839 = vmatpush3.msra.mxu0 %v10140_v51 }
 0x1ba   :  { %3410 = vmatmul.mubr.f32.vlgmr.msra.gmra.mxu1 %v10141_v2  ;;  %5840 = vmatprep.subr.mxu0 %v10142_v29  ;;  %v8708_v29 = vand.u32 4294901760, %v218_v14 }
 0x1bb   :  { %5867 = vmatprep.subr.mxu1 %v8074_v61  ;;  %5841 = vmatpush3.msra.mxu0 %v10143_v49  ;;  %v10147_v61 = vand.u32 4294901760, %v10111_v30  ;;  %v217_v49 = vld [vmem:[#allocation5 + $0x450] sm:$0xff] }
 0x1bc   :  { %5868 = vmatpush3.msra.mxu1 %v8079_v43  ;;  %5842 = vmatprep.subr.mxu0 %v10144_v4  ;;  %v222_v43 = vld [vmem:[#allocation5 + $0x478] sm:$0xff]  ;;  %10165 = vst [vmem:[#allocation23_spill] sm:$0xff] %v8708_v29 }
 0x1bd   :  { %5869 = vmatprep.subr.mxu1 %v8084_v57  ;;  %5843 = vmatpush3.msra.mxu0 %v10145_v24  ;;  %v8643_v57 = vand.u32 4294901760, %v238_v39  ;;  %v8651_v41 = vand.u32 4294901760, %v222_v43 }
 0x1be   :  { %5870 = vmatpush3.msra.mxu1 %v8092_v8  ;;  %5844 = vmatprep.subr.mxu0 %v10146_v37  ;;  %v10149_v8 = vand.u32 4294901760, %v10115_v63  ;;  %v10154_v63 = vand.u32 4294901760, %v8381_v59  ;;  %v8683_v59 = vand.u32 4294901760, %v220_v54  ;;  %v10169_v37 = vand.u32 4294901760, %v8470_v20  ;;  %v10173_v20 = vld [vmem:[#allocation31_spill] sm:$0xff] }
 0x1bf   :  { %5871 = vmatprep.subr.mxu1 %v10110_v18  ;;  %5845 = vmatpush3.msra.mxu0 %v10147_v61  ;;  %v236_v18 = vld [vmem:[#allocation5 + $0x4e8] sm:$0xff]  ;;  %v8660_v30 = vsub.f32 %v238_v39, %v8643_v57  ;;  %v8671_v6 = vsub.f32 %v222_v43, %v8651_v41  ;;  %v10168_v39 = vand.u32 4294901760, %v8421_v27  ;;  %v10170_v61 = vld [vmem:[#allocation36_spill] sm:$0xff] }
 0x1c0   :  { %5872 = vmatpush3.msra.mxu1 %v10112_v3  ;;  %5846 = vmatprep.subr.mxu0 %v10148_v45  ;;  %v10153_v3 = vand.u32 4294901760, %v8330_v10  ;;  %v10155_v10 = vand.u32 4294901760, %v8353_v53  ;;  %10157 = vst [vmem:[#allocation40_spill] sm:$0xff] %v8683_v59  ;;  %v10160_v53 = vand.u32 4294901760, %v10159_v44  ;;  %v8717_v4 = vsub.f32 %v220_v54, %v8683_v59 }
 0x1c1   :  { %5873 = vmatprep.subr.mxu1 %v10114_v38  ;;  %5847 = vmatpush3.msra.mxu0 %v10149_v8  ;;  %v235_v38 = vld [vmem:[#allocation5 + $0x4e0] sm:$0xff]  ;;  %v9667_v2 = vand.u32 4294901760, %v8671_v6  ;;  %v8744_v45 = vand.u32 4294901760, %v217_v49  ;;  %v216_v8 = vld [vmem:[#allocation5 + $0x448] sm:$0xff] }
 0x1c2   :  { %5874 = vmatpush3.msra.mxu1 %v10116_v56  ;;  %5848 = vmatprep.subr.mxu0 %v10150_v22  ;;  %v8673_v56 = vand.u32 4294901760, %v221_v0  ;;  %v9661_v54 = vand.u32 4294901760, %v8717_v4  ;;  %v8776_v44 = vand.u32 4294901760, %v216_v8 }
 0x1c3   :  { %5875 = vmatprep.subr.mxu1 %v10118_v46  ;;  %5849 = vmatpush3.msra.mxu0 %v10151_v62  ;;  %v8678_v46 = vand.u32 4294901760, %v236_v18  ;;  %v8742_v43 = vsub.f32 %v8671_v6, %v9667_v2  ;;  %10171 = vst [vmem:[#allocation29_spill] sm:$0xff] %v8744_v45  ;;  %v8754_v62 = vsub.f32 %v218_v14, %v8708_v29  ;;  %v212_v2 = vld [vmem:[#allocation5 + $0x428] sm:$0xff] }
 0x1c4   :  { %5876 = vmatpush3.msra.mxu1 %v10119_v42  ;;  %5850 = vmatprep.subr.mxu0 %v10152_v50  ;;  %v234_v42 = vld [vmem:[#allocation5 + $0x4d8] sm:$0xff]  ;;  %v8700_v31 = vsub.f32 %v221_v0, %v8673_v56  ;;  %v10174_v50 = vld [vmem:[#allocation43_spill] sm:$0xff]  ;;  %10180 = vst [vmem:[#allocation30_spill] sm:$0xff] %v8776_v44 }
 0x1c5   :  { %5877 = vmatprep.subr.mxu1 %v10120_v1  ;;  %5851 = vmatpush3.msra.mxu0 %v10153_v3  ;;  %v10156_v1 = vand.u32 4294901760, %v8403_v58  ;;  %v8694_v58 = vsub.f32 %v237_v15, %v8665_v19  ;;  %v8702_v51 = vand.u32 4294901760, %v234_v42  ;;  %v10172_v15 = vand.u32 4294901760, %v8474_v25 }
 0x1c6   :  { %5878 = vmatpush3.msra.mxu1 %v10121_v12  ;;  %5852 = vmatprep.subr.mxu0 %v10154_v63  ;;  %v8685_v12 = vand.u32 4294901760, %v235_v38  ;;  %v9663_v27 = vand.u32 4294901760, %v8700_v31  ;;  %v215_v63 = vld [vmem:[#allocation5 + $0x440] sm:$0xff] }
 0x1c7   :  { %5879 = vmatprep.subr.mxu1 %v10122_v5  ;;  %5853 = vmatpush3.msra.mxu0 %v10155_v10  ;;  %v9669_v5 = vand.u32 4294901760, %v8660_v30  ;;  %10163 = vst [vmem:[#allocation21_spill] sm:$0xff] %v8702_v51  ;;  %v8748_v22 = vsub.f32 %v234_v42, %v8702_v51  ;;  %v10176_v10 = vld [vmem:[#allocation28_spill] sm:$0xff] }
 0x1c8   :  { %5880 = vmatpush3.msra.mxu1 %v10123_v60  ;;  %5854 = vmatprep.subr.mxu0 %v10156_v1  ;;  %10158 = vst [vmem:[#allocation34_spill] sm:$0xff] %v8685_v12  ;;  %v8691_v60 = vand.u32 4294901760, %v219_v33  ;;  %v8727_v24 = vsub.f32 %v235_v38, %v8685_v12  ;;  %v231_v38 = vld [vmem:[#allocation5 + $0x4c0] sm:$0xff]  ;;  %v10177_v42 = vand.u32 4294901760, %v10176_v10 }
 0x1c9   :  { %5881 = vmatprep.subr.mxu1 %v10124_v7  ;;  %5855 = vmatpush3.msra.mxu0 %v10160_v53  ;;  %v10162_v7 = vand.u32 4294901760, %v8435_v17  ;;  %v8711_v17 = vsub.f32 %v236_v18, %v8678_v46  ;;  %v10175_v18 = vand.u32 4294901760, %v10174_v50  ;;  %v10178_v1 = vld [vmem:[#allocation41_spill] sm:$0xff]  ;;  %v214_v50 = vld [vmem:[#allocation5 + $0x438] sm:$0xff] }
 0x1ca   :  { %5882 = vmatpush3.msra.mxu1 %v10125_v55  ;;  %10161 = vst [vmem:[#allocation16_spill] sm:$0xff] %v8691_v60  ;;  %v10164_v55 = vand.u32 4294901760, %v8411_v32  ;;  %v8722_v32 = vsub.f32 %v8660_v30, %v9669_v5  ;;  %v9662_v25 = vand.u32 4294901760, %v8727_v24  ;;  %3576 = vmatprep.mubr.f32.mxu0 %v10178_v1  ;;  %v210_v5 = vld [vmem:[#allocation5 + $0x418] sm:$0xff] }
 0x1cb   :  { %5856 = vmatprep.subr.mxu0 %v10162_v7  ;;  %5883 = vmatprep.subr.mxu1 %v10126_v47  ;;  %v10166_v47 = vand.u32 4294901760, %v8454_v16  ;;  %v9666_v16 = vand.u32 4294901760, %v8694_v58  ;;  %v9660_v0 = vand.u32 4294901760, %v8711_v17  ;;  %v230_v7 = vld [vmem:[#allocation5 + $0x4b8] sm:$0xff] }
 0x1cc   :  { %5857 = vmatpush3.msra.mxu0 %v10164_v55  ;;  %5884 = vmatpush3.msra.mxu1 %v10127_v11  ;;  %v8724_v11 = vand.u32 4294901760, %v233_v48  ;;  %v3916_v3 = vand.u32 4294901760, %v8722_v32  ;;  %v10181_v55 = vld [vmem:[#allocation35_spill] sm:$0xff]  ;;  %v8813_v10 = vsub.f32 %v8727_v24, %v9662_v25 }
 0x1cd   :  { %5858 = vmatprep.subr.mxu0 %v10166_v47  ;;  %5885 = vmatprep.subr.mxu1 %v10128_v28  ;;  %v8733_v28 = vsub.f32 %v219_v33, %v8691_v60  ;;  %v213_v25 = vld [vmem:[#allocation5 + $0x430] sm:$0xff] }
 0x1ce   :  { %10167 = vst [vmem:[#allocation18_spill] sm:$0xff] %v8724_v11  ;;  %5859 = vmatpush3.msra.mxu0 %v10168_v39  ;;  %5886 = vmatpush3.msra.mxu1 %v10129_v34  ;;  %v232_v34 = vld [vmem:[#allocation5 + $0x4c8] sm:$0xff]  ;;  %v8764_v33 = vsub.f32 %v233_v48, %v8724_v11  ;;  %v8783_v39 = vsub.f32 %v217_v49, %v8744_v45  ;;  %v8800_v49 = vand.u32 4294901760, %v215_v63 }
 0x1cf   :  { %5860 = vmatprep.subr.mxu0 %v10169_v37  ;;  %5887 = vmatprep.subr.mxu1 %v10170_v61  ;;  %v8774_v14 = vand.u32 4294901760, %v232_v34  ;;  %v9664_v53 = vand.u32 4294901760, %v8733_v28  ;;  %v10182_v48 = vld [vmem:[#allocation38_spill] sm:$0xff]  ;;  %v8788_v37 = vsub.f32 %v8700_v31, %v9663_v27  ;;  %v9665_v61 = vand.u32 4294901760, %v8748_v22 }
 0x1d0   :  { %5861 = vmatpush3.msra.mxu0 %v10172_v15  ;;  %5888 = vmatpush3.msra.mxu1 %v10173_v20  ;;  %v8796_v15 = vsub.f32 %v8711_v17, %v9660_v0  ;;  %v8798_v20 = vand.u32 4294901760, %v231_v38  ;;  %10184 = vst [vmem:[#allocation15_spill] sm:$0xff] %v8800_v49  ;;  %v8822_v0 = vsub.f32 %v216_v8, %v8776_v44 }
 0x1d1   :  { %5862 = vmatprep.subr.mxu0 %v10175_v18  ;;  %5889 = vmatprep.subr.mxu1 %v8344_v52  ;;  %v8772_v52 = vsub.f32 %v8694_v58, %v9666_v16  ;;  %10179 = vst [vmem:[#allocation42_spill] sm:$0xff] %v8774_v14  ;;  %v9668_v18 = vand.u32 4294901760, %v8754_v62  ;;  %v8830_v27 = vsub.f32 %v232_v34, %v8774_v14 }
 0x1d2   :  { %5863 = vmatpush3.msra.mxu0 %v10177_v42  ;;  %5890 = vmatpush3.msra.mxu1 %v10181_v55  ;;  %10183 = vst [vmem:[#allocation26_spill] sm:$0xff] %v8798_v20  ;;  %v8815_v42 = vand.u32 4294901760, %v230_v7  ;;  %v9670_v55 = vand.u32 4294901760, %v8764_v33  ;;  %10186 = vst [vmem:[#allocation32_spill] sm:$0xff] %v8822_v0  ;;  %v8838_v8 = vsub.f32 %v8748_v22, %v9665_v61  ;;  %v3930_v34 = vand.u32 4294901760, %v8796_v15  ;;  %v229_v61 = vld [vmem:[#allocation5 + $0x4b0] sm:$0xff] }
 0x1d3   :  { %3578 = vmatmul.mubr.f32.vlgmr.msra.gmra.mxu0 %v10182_v48  ;;  %5891 = vmatprep.subr.mxu1 %v8390_v35  ;;  %v8808_v35 = vsub.f32 %v8717_v4, %v9661_v54  ;;  %v8827_v54 = vsub.f32 %v8733_v28, %v9664_v53  ;;  %v9671_v53 = vand.u32 4294901760, %v8783_v39  ;;  %v8855_v16 = vsub.f32 %v231_v38, %v8798_v20  ;;  %v211_v38 = vld [vmem:[#allocation5 + $0x420] sm:$0xff] }
 0x1d4   :  { %5902 = vmatprep.subr.mxu0 %v8643_v57  ;;  %5892 = vmatpush3.msra.mxu1 %v8370_v23  ;;  %10185 = vst [vmem:[#allocation22_spill] sm:$0xff] %v8815_v42  ;;  %v3923_v23 = vand.u32 4294901760, %v8772_v52  ;;  %v8840_v52 = vand.u32 4294901760, %v214_v50  ;;  %v8865_v15 = vand.u32 4294901760, %v213_v25 }
 0x1d5   :  { %5903 = vmatpush3.msra.mxu0 %v8651_v41  ;;  %5893 = vmatprep.subr.mxu1 %v10133_v26  ;;  %v3811_v26 = vand.u32 4294901760, %v8788_v37  ;;  %v8852_v37 = vsub.f32 %v8754_v62, %v9668_v18  ;;  %10189 = vst [vmem:[#allocation33_spill] sm:$0xff] %v8855_v16  ;;  %v8868_v18 = vsub.f32 %v230_v7, %v8815_v42  ;;  %v227_v7 = vld [vmem:[#allocation5 + $0x4a0] sm:$0xff] }
 0x1d6   :  { %5904 = vmatprep.subr.mxu0 %v8665_v19  ;;  %5894 = vmatpush3.msra.mxu1 %v8378_v9  ;;  %10187 = vst [vmem:[#allocation37_spill] sm:$0xff] %v8840_v52  ;;  %v8847_v9 = vsub.f32 %v215_v63, %v8800_v49  ;;  %v8863_v63 = vsub.f32 %v8764_v33, %v9670_v55  ;;  %v10196_v55 = vand.u32 4294901760, %v8830_v27 }
 0x1d7   :  { %5905 = vmatpush3.msra.mxu0 %v8673_v56  ;;  %5895 = vmatprep.subr.mxu1 %v8431_v21  ;;  %v3818_v21 = vand.u32 4294901760, %v8808_v35  ;;  %10190 = vst [vmem:[#allocation19_spill] sm:$0xff] %v8868_v18  ;;  %v228_v35 = vld [vmem:[#allocation5 + $0x4a8] sm:$0xff]  ;;  %v8880_v47 = vsub.f32 %v214_v50, %v8840_v52  ;;  %v10195_v50 = vand.u32 4294901760, %v8742_v43 }
 0x1d8   :  { %5906 = vmatprep.subr.mxu0 %v8678_v46  ;;  %10188 = vst [vmem:[#allocation17_spill] sm:$0xff] %v8847_v9  ;;  %5896 = vmatpush3.msra.mxu1 %v8442_v13  ;;  %v3937_v13 = vand.u32 4294901760, %v8813_v10  ;;  %v8887_v10 = vsub.f32 %v8783_v39, %v9671_v53  ;;  %v8912_v32 = vsub.f32 %v8830_v27, %v10196_v55  ;;  %v8919_v53 = vand.u32 4294901760, %v211_v38 }
 0x1d9   :  { %5907 = vmatpush3.msra.mxu0 %v8683_v59  ;;  %5897 = vmatprep.subr.mxu1 %v8448_v40  ;;  %10191 = vst [vmem:[#allocation20_spill] sm:$0xff] %v8880_v47  ;;  %v8882_v40 = vand.u32 4294901760, %v229_v61  ;;  %v77_v59 = vld [vmem:[#allocation2 + $0x40] sm:$0xff] }
 0x1da   :  { %5908 = vmatprep.subr.mxu0 %v8685_v12  ;;  %5898 = vmatpush3.msra.mxu1 %v8450_v36  ;;  %v78_v12 = vld [vmem:[#allocation2 + $0x48] sm:$0xff]  ;;  %10198 = vst [vmem:[#allocation39_spill] sm:$0xff] %v8919_v53  ;;  %v8921_v36 = vand.u32 4294901760, %v210_v5  ;;  %v3839_v43 = vand.u32 4294901760, %v8887_v10 }
 0x1db   :  { %3680 = vmatprep.mubr.f32.mxu1 %v10178_v1  ;;  %10192 = vst [vmem:[#allocation24_spill] sm:$0xff] %v8882_v40  ;;  %5909 = vmatpush3.msra.mxu0 %v8691_v60  ;;  %v8892_v1 = vand.u32 4294901760, %v212_v2  ;;  %v8901_v60 = vsub.f32 %v213_v25, %v8865_v15  ;;  %v8945_v55 = vand.u32 4294901760, %v78_v12 }
 0x1dc   :  { %3682 = vmatmul.mubr.f32.vlgmr.msra.gmra.mxu1 %v10182_v48  ;;  %5910 = vmatprep.subr.mxu0 %v8702_v51  ;;  %v8903_v48 = vand.u32 4294901760, %v228_v35  ;;  %v226_v51 = vld [vmem:[#allocation5 + $0x498] sm:$0xff] }
 0x1dd   :  { %10193 = vst [vmem:[#allocation25_spill] sm:$0xff] %v8892_v1  ;;  %5937 = vmatprep.subr.mxu1 %v3916_v3  ;;  %5911 = vmatpush3.msra.mxu0 %v8708_v29  ;;  %v10197_v3 = vand.u32 4294901760, %v8822_v0  ;;  %v8929_v29 = vsub.f32 %v229_v61, %v8882_v40  ;;  %10201 = vst [vmem:[#allocation36_spill] sm:$0xff] %v8945_v55  ;;  %v8948_v61 = vand.u32 4294901760, %v226_v51 }
 0x1de   :  { %10194 = vst [vmem:[#allocation27_spill] sm:$0xff] %v8903_v48  ;;  %5938 = vmatpush3.msra.mxu1 %v10195_v50  ;;  %5912 = vmatprep.subr.mxu0 %v8724_v11  ;;  %v8925_v50 = vand.u32 4294901760, %v227_v7 }
 0x1df   :  { %v8917_v25 = vsub.f32 %v8822_v0, %v10197_v3  ;;  %5939 = vmatprep.subr.mxu1 %v3923_v23  ;;  %5913 = vmatpush3.msra.mxu0 %v8744_v45  ;;  %v8933_v3 = vsub.f32 %v212_v2, %v8892_v1  ;;  %v10199_v0 = vand.u32 4294901760, %v8855_v16  ;;  %v10200_v23 = vand.u32 4294901760, %v8847_v9  ;;  %v225_v45 = vld [vmem:[#allocation5 + $0x490] sm:$0xff] }
 0x1e0   :  { %5940 = vmatpush3.msra.mxu1 %v3811_v26  ;;  %5914 = vmatprep.subr.mxu0 %v8774_v14  ;;  %v10202_v2 = vand.u32 4294901760, %v8868_v18  ;;  %v8964_v14 = vsub.f32 %v211_v38, %v8919_v53  ;;  %v8978_v38 = vsub.f32 %v227_v7, %v8925_v50 }
 0x1e1   :  { %v8938_v11 = vsub.f32 %v8855_v16, %v10199_v0  ;;  %v8943_v10 = vsub.f32 %v8847_v9, %v10200_v23  ;;  %5941 = vmatprep.subr.mxu1 %v3930_v34  ;;  %v8956_v0 = vsub.f32 %v228_v35, %v8903_v48  ;;  %v8958_v16 = vand.u32 4294901760, %v77_v59  ;;  %5915 = vmatpush3.msra.mxu0 %v8776_v44  ;;  %v208_v44 = vld [vmem:[#allocation5 + $0x408] sm:$0xff] }
 0x1e2   :  { %v8953_v26 = vsub.f32 %v8868_v18, %v10202_v2  ;;  %5942 = vmatpush3.msra.mxu1 %v3818_v21  ;;  %v3958_v23 = vand.u32 4294901760, %v8912_v32  ;;  %v3846_v34 = vand.u32 4294901760, %v8917_v25  ;;  %v8967_v9 = vsub.f32 %v210_v5, %v8921_v36  ;;  %v209_v2 = vld [vmem:[#allocation5 + $0x410] sm:$0xff]  ;;  %5916 = vmatprep.subr.mxu0 %v8798_v20  ;;  %v224_v25 = vld [vmem:[#allocation5 + $0x488] sm:$0xff] }
 0x1e3   :  { %10203 = vst [vmem:[#allocation31_spill] sm:$0xff] %v8958_v16  ;;  %5943 = vmatprep.subr.mxu1 %v3937_v13  ;;  %v10204_v35 = vand.u32 4294901760, %v8880_v47  ;;  %5917 = vmatpush3.msra.mxu0 %v8800_v49  ;;  %v10205_v5 = vand.u32 4294901760, %v8827_v54  ;;  %v3965_v13 = vand.u32 4294901760, %v8938_v11  ;;  %v3853_v20 = vand.u32 4294901760, %v8943_v10  ;;  %v207_v11 = vld [vmem:[#allocation5 + $0x400] sm:$0xff] }
 0x1e4   :  { %v8988_v21 = vsub.f32 %v78_v12, %v8945_v55  ;;  %5918 = vmatprep.subr.mxu0 %v8815_v42  ;;  %v10207_v32 = vand.u32 4294901760, %v8838_v8  ;;  %v3972_v7 = vand.u32 4294901760, %v8953_v26  ;;  %v8994_v49 = vand.u32 4294901760, %v209_v2  ;;  %4024 = vmatprep.mubr.f32.mxu1 %v8945_v55 }
 0x1e5   :  { %v8973_v18 = vsub.f32 %v8880_v47, %v10204_v35  ;;  %5944 = vmatpush3.msra.mxu1 %v10205_v5  ;;  %v8985_v35 = vand.u32 4294901760, %v225_v45  ;;  %v223_v5 = vld [vmem:[#allocation5 + $0x480] sm:$0xff]  ;;  %v8998_v10 = vsub.f32 %v77_v59, %v8958_v16  ;;  %5919 = vmatpush3.msra.mxu0 %v8840_v52  ;;  %v10208_v12 = vand.u32 4294901760, %v8852_v37  ;;  %v10245_v55 = vld [vmem:[#allocation27_spill] sm:$0xff] }
 0x1e6   :  { %5945 = vmatprep.subr.mxu1 %v10207_v32  ;;  %v9003_v42 = vand.u32 4294901760, %v224_v25  ;;  %v9005_v8 = vand.u32 4294901760, %v208_v44  ;;  %v9009_v32 = vsub.f32 %v226_v51, %v8948_v61  ;;  %5920 = vmatprep.subr.mxu0 %v8882_v40  ;;  %v10209_v54 = vand.u32 4294901760, %v8863_v63 }
 0x1e7   :  { %10206 = vst [vmem:[#allocation43_spill] sm:$0xff] %v8985_v35  ;;  %5946 = vmatpush3.msra.mxu1 %v10208_v12  ;;  %v3860_v59 = vand.u32 4294901760, %v8973_v18  ;;  %v10210_v52 = vand.u32 4294901760, %v8929_v29  ;;  %v10211_v12 = vand.u32 4294901760, %v8901_v60  ;;  %5921 = vmatpush3.msra.mxu0 %v8865_v15  ;;  %v9023_v51 = vand.u32 4294901760, %v223_v5 }
 0x1e8   :  { %5947 = vmatprep.subr.mxu1 %v10209_v54  ;;  %v9025_v40 = vand.u32 4294901760, %v207_v11  ;;  %v9029_v18 = vsub.f32 %v225_v45, %v8985_v35  ;;  %5922 = vmatprep.subr.mxu0 %v8903_v48  ;;  %v10212_v54 = vand.u32 4294901760, %v8956_v0  ;;  %v9042_v45 = vsub.f32 %v208_v44, %v9005_v8 }
 0x1e9   :  { %v3978_v37 = vsub.f32 %v8929_v29, %v10210_v52  ;;  %v3866_v47 = vsub.f32 %v8901_v60, %v10211_v12  ;;  %5948 = vmatpush3.msra.mxu1 %v3839_v43  ;;  %v9033_v52 = vsub.f32 %v209_v2, %v8994_v49  ;;  %5923 = vmatpush3.msra.mxu0 %v8892_v1  ;;  %v10213_v63 = vand.u32 4294901760, %v8933_v3 }
 0x1ea   :  { %5949 = vmatprep.subr.mxu1 %v3958_v23  ;;  %v3985_v12 = vsub.f32 %v8956_v0, %v10212_v54  ;;  %v9049_v48 = vsub.f32 %v224_v25, %v9003_v42  ;;  %5924 = vmatprep.subr.mxu0 %v8925_v50  ;;  %v10214_v43 = vand.u32 4294901760, %v8978_v38  ;;  %v10216_v25 = vand.u32 4294901760, %v8988_v21 }
 0x1eb   :  { %5950 = vmatpush3.msra.mxu1 %v3846_v34  ;;  %v3873_v23 = vsub.f32 %v8933_v3, %v10213_v63  ;;  %v3979_v54 = vand.u32 4294901760, %v3978_v37  ;;  %v3867_v26 = vand.u32 4294901760, %v3866_v47  ;;  %5925 = vmatpush3.msra.mxu0 %v8919_v53  ;;  %v9058_v63 = vsub.f32 %v207_v11, %v9025_v40 }
 0x1ec   :  { %5951 = vmatprep.subr.mxu1 %v3965_v13  ;;  %v3992_v34 = vsub.f32 %v8978_v38, %v10214_v43  ;;  %v3786_v2 = vsub.f32 %v8988_v21, %v10216_v25  ;;  %v9065_v47 = vsub.f32 %v223_v5, %v9023_v51  ;;  %5926 = vmatprep.subr.mxu0 %v8948_v61  ;;  %v3986_v37 = vand.u32 4294901760, %v3985_v12 }
 0x1ed   :  { %5952 = vmatpush3.msra.mxu1 %v3853_v20  ;;  %10215 = vst [vmem:[#allocation28_spill] sm:$0xff] %v9058_v63  ;;  %v10218_v43 = vand.u32 4294901760, %v8964_v14  ;;  %v10219_v11 = vand.u32 4294901760, %v8998_v10  ;;  %5927 = vmatpush3.msra.mxu0 %v8921_v36  ;;  %v3874_v25 = vand.u32 4294901760, %v3873_v23  ;;  %v10220_v5 = vand.u32 4294901760, %v9009_v32 }
 0x1ee   :  { %10217 = vst [vmem:[#allocation41_spill] sm:$0xff] %v9065_v47  ;;  %5953 = vmatprep.subr.mxu1 %v3972_v7  ;;  %5928 = vmatprep.subr.mxu0 %v8985_v35  ;;  %v3993_v12 = vand.u32 4294901760, %v3992_v34  ;;  %v10222_v23 = vand.u32 4294901760, %v9029_v18  ;;  %v9717_v7 = vand.u32 4294901760, %v9065_v47  ;;  %v10223_v35 = vand.u32 4294901760, %v9033_v52 }
 0x1ef   :  { %v3880_v20 = vsub.f32 %v8964_v14, %v10218_v43  ;;  %v3792_v44 = vsub.f32 %v8998_v10, %v10219_v11  ;;  %5954 = vmatpush3.msra.mxu1 %v3860_v59  ;;  %v3999_v13 = vsub.f32 %v9009_v32, %v10220_v5  ;;  %v10221_v43 = vand.u32 4294901760, %v8967_v9  ;;  %5929 = vmatpush3.msra.mxu0 %v8994_v49 }
 0x1f0   :  { %5955 = vmatprep.subr.mxu1 %v3979_v54  ;;  %v3787_v59 = vand.u32 4294901760, %v3786_v2  ;;  %v4006_v5 = vsub.f32 %v9029_v18, %v10222_v23  ;;  %5930 = vmatprep.subr.mxu0 %v9003_v42  ;;  %v9716_v53 = vand.u32 4294901760, %v9058_v63  ;;  %v10224_v2 = vand.u32 4294901760, %v9049_v48 }
 0x1f1   :  { %v3887_v11 = vsub.f32 %v8967_v9, %v10221_v43  ;;  %5956 = vmatpush3.msra.mxu1 %v3867_v26  ;;  %v3881_v54 = vand.u32 4294901760, %v3880_v20  ;;  %v3793_v34 = vand.u32 4294901760, %v3792_v44  ;;  %v3894_v43 = vsub.f32 %v9033_v52, %v10223_v35  ;;  %5931 = vmatpush3.msra.mxu0 %v9005_v8 }
 0x1f2   :  { %5957 = vmatprep.subr.mxu1 %v3986_v37  ;;  %v4000_v26 = vand.u32 4294901760, %v3999_v13  ;;  %v4013_v23 = vsub.f32 %v9049_v48, %v10224_v2  ;;  %5932 = vmatprep.subr.mxu0 %v9023_v51  ;;  %v10225_v44 = vand.u32 4294901760, %v9042_v45  ;;  %v4007_v35 = vand.u32 4294901760, %v4006_v5  ;;  %v10229_v2 = vld [vmem:[#allocation34_spill] sm:$0xff] }
 0x1f3   :  { %5958 = vmatpush3.msra.mxu1 %v3874_v25  ;;  %v3888_v37 = vand.u32 4294901760, %v3887_v11  ;;  %5933 = vmatpush3.msra.mxu0 %v9025_v40  ;;  %v4020_v13 = vsub.f32 %v9065_v47, %v9717_v7  ;;  %v3895_v25 = vand.u32 4294901760, %v3894_v43  ;;  %v10227_v43 = vld [vmem:[#allocation40_spill] sm:$0xff]  ;;  %v10243_v7 = vld [vmem:[#allocation37_spill] sm:$0xff] }
 0x1f4   :  { %5959 = vmatprep.subr.mxu1 %v3993_v12  ;;  %v3901_v20 = vsub.f32 %v9042_v45, %v10225_v44  ;;  %3788 = vmatprep.mubr.f32.mxu0 %v3787_v59  ;;  %v3908_v12 = vsub.f32 %v9058_v63, %v9716_v53  ;;  %v4014_v11 = vand.u32 4294901760, %v4013_v23  ;;  %v10230_v23 = vld [vmem:[#allocation17_spill] sm:$0xff]  ;;  %v10232_v44 = vld [vmem:[#allocation19_spill] sm:$0xff]  ;;  %v10242_v53 = vld [vmem:[#allocation22_spill] sm:$0xff] }
 0x1f5   :  { %5960 = vmatpush3.msra.mxu1 %v3881_v54  ;;  %3794 = vmatmul.mubr.f32.vlgmr.msra.gmra.mxu0 %v3793_v34  ;;  %v4021_v5 = vand.u32 4294901760, %v4020_v13  ;;  %v10226_v34 = vld [vmem:[#allocation32_spill] sm:$0xff]  ;;  %v10235_v13 = vld [vmem:[#allocation23_spill] sm:$0xff] }
 0x1f6   :  { %5961 = vmatprep.subr.mxu1 %v4000_v26  ;;  %5972 = vmatprep.subr.mxu0 %v8660_v30  ;;  %v3902_v59 = vand.u32 4294901760, %v3901_v20  ;;  %v3909_v54 = vand.u32 4294901760, %v3908_v12  ;;  %v10228_v26 = vld [vmem:[#allocation33_spill] sm:$0xff] }
 0x1f7   :  { %5962 = vmatpush3.msra.mxu1 %v3888_v37  ;;  %5973 = vmatpush3.msra.mxu0 %v8671_v6  ;;  %v10231_v37 = vld [vmem:[#allocation16_spill] sm:$0xff]  ;;  %v10233_v20 = vld [vmem:[#allocation21_spill] sm:$0xff] }
 0x1f8   :  { %5963 = vmatprep.subr.mxu1 %v4007_v35  ;;  %5974 = vmatprep.subr.mxu0 %v8694_v58  ;;  %v10234_v35 = vld [vmem:[#allocation20_spill] sm:$0xff]  ;;  %v10237_v12 = vld [vmem:[#allocation29_spill] sm:$0xff] }
 0x1f9   :  { %5964 = vmatpush3.msra.mxu1 %v3895_v25  ;;  %5975 = vmatpush3.msra.mxu0 %v8700_v31  ;;  %v10236_v25 = vld [vmem:[#allocation18_spill] sm:$0xff] }
 0x1fa   :  { %5965 = vmatprep.subr.mxu1 %v4014_v11  ;;  %5976 = vmatprep.subr.mxu0 %v8711_v17  ;;  %v10238_v11 = vld [vmem:[#allocation42_spill] sm:$0xff] }
 0x1fb   :  { %5966 = vmatpush3.msra.mxu1 %v3902_v59  ;;  %5977 = vmatpush3.msra.mxu0 %v8717_v4  ;;  %v10239_v59 = vld [vmem:[#allocation30_spill] sm:$0xff] }
 0x1fc   :  { %5967 = vmatprep.subr.mxu1 %v4021_v5  ;;  %5978 = vmatprep.subr.mxu0 %v8727_v24  ;;  %v10240_v5 = vld [vmem:[#allocation26_spill] sm:$0xff] }
 0x1fd   :  { %5968 = vmatpush3.msra.mxu1 %v3909_v54  ;;  %5979 = vmatpush3.msra.mxu0 %v8733_v28  ;;  %v10241_v54 = vld [vmem:[#allocation15_spill] sm:$0xff] }
 0x1fe   :  { %4026 = vmatmul.mubr.f32.vlgmr.msra.gmra.mxu1 %v8958_v16  ;;  %5980 = vmatprep.subr.mxu0 %v8748_v22  ;;  %v10244_v16 = vld [vmem:[#allocation24_spill] sm:$0xff] }
 0x1ff   :  { %6007 = vmatprep.subr.mxu1 %v8643_v57  ;;  %5981 = vmatpush3.msra.mxu0 %v8754_v62 }
 0x200   :  { %6008 = vmatpush3.msra.mxu1 %v8651_v41  ;;  %5982 = vmatprep.subr.mxu0 %v8764_v33 }
 0x201   :  { %6009 = vmatprep.subr.mxu1 %v8665_v19  ;;  %5983 = vmatpush3.msra.mxu0 %v8783_v39 }
 0x202   :  { %6010 = vmatpush3.msra.mxu1 %v8673_v56  ;;  %5984 = vmatprep.subr.mxu0 %v8830_v27 }
 0x203   :  { %6011 = vmatprep.subr.mxu1 %v8678_v46  ;;  %5985 = vmatpush3.msra.mxu0 %v10226_v34 }
 0x204   :  { %6012 = vmatpush3.msra.mxu1 %v10227_v43  ;;  %5986 = vmatprep.subr.mxu0 %v10228_v26 }
 0x205   :  { %6013 = vmatprep.subr.mxu1 %v10229_v2  ;;  %5987 = vmatpush3.msra.mxu0 %v10230_v23 }
 0x206   :  { %6014 = vmatpush3.msra.mxu1 %v10231_v37  ;;  %5988 = vmatprep.subr.mxu0 %v10232_v44 }
 0x207   :  { %6015 = vmatprep.subr.mxu1 %v10233_v20  ;;  %5989 = vmatpush3.msra.mxu0 %v10234_v35 }
 0x208   :  { %6016 = vmatpush3.msra.mxu1 %v10235_v13  ;;  %5990 = vmatprep.subr.mxu0 %v8929_v29 }
 0x209   :  { %6017 = vmatprep.subr.mxu1 %v10236_v25  ;;  %5991 = vmatpush3.msra.mxu0 %v8901_v60 }
 0x20a   :  { %6018 = vmatpush3.msra.mxu1 %v10237_v12  ;;  %5992 = vmatprep.subr.mxu0 %v8956_v0 }
 0x20b   :  { %6019 = vmatprep.subr.mxu1 %v10238_v11  ;;  %5993 = vmatpush3.msra.mxu0 %v8933_v3 }
 0x20c   :  { %6020 = vmatpush3.msra.mxu1 %v10239_v59  ;;  %5994 = vmatprep.subr.mxu0 %v8978_v38 }
 0x20d   :  { %6021 = vmatprep.subr.mxu1 %v10240_v5  ;;  %5995 = vmatpush3.msra.mxu0 %v8964_v14 }
 0x20e   :  { %6022 = vmatpush3.msra.mxu1 %v10241_v54  ;;  %5996 = vmatprep.subr.mxu0 %v9009_v32 }
 0x20f   :  { %6023 = vmatprep.subr.mxu1 %v10242_v53  ;;  %5997 = vmatpush3.msra.mxu0 %v8967_v9 }
 0x210   :  { %6024 = vmatpush3.msra.mxu1 %v10243_v7  ;;  %5998 = vmatprep.subr.mxu0 %v9029_v18 }
 0x211   :  { %6025 = vmatprep.subr.mxu1 %v10244_v16  ;;  %5999 = vmatpush3.msra.mxu0 %v9033_v52  ;;  %v10246_v16 = vld [vmem:[#allocation39_spill] sm:$0xff] }
 0x212   :  { %6026 = vmatpush3.msra.mxu1 %v8865_v15  ;;  %6000 = vmatprep.subr.mxu0 %v9049_v48 }
 0x213   :  { %6027 = vmatprep.subr.mxu1 %v10245_v55  ;;  %6001 = vmatpush3.msra.mxu0 %v9042_v45  ;;  %v10247_v55 = vand.u32 4294901760, %v8660_v30  ;;  %v10252_v30 = vand.u32 4294901760, %v8711_v17  ;;  %v10257_v17 = vand.u32 4294901760, %v8998_v10 }
 0x214   :  { %6028 = vmatpush3.msra.mxu1 %v8892_v1  ;;  %6002 = vmatprep.subr.mxu0 %v9065_v47  ;;  %v10248_v1 = vand.u32 4294901760, %v8671_v6  ;;  %v10249_v47 = vld [vmem:[#allocation43_spill] sm:$0xff]  ;;  %v10253_v6 = vand.u32 4294901760, %v8717_v4  ;;  %v10259_v4 = vand.u32 4294901760, %v8754_v62  ;;  %v4549_v62 = vld [vmem:[#allocation7] sm:$0xff] }
 0x215   :  { %6029 = vmatprep.subr.mxu1 %v8925_v50  ;;  %6003 = vmatpush3.msra.mxu0 %v9058_v63  ;;  %v10250_v63 = vand.u32 4294901760, %v8694_v58  ;;  %v10254_v58 = vand.u32 4294901760, %v8727_v24  ;;  %v10260_v24 = vand.u32 4294901760, %v8764_v33  ;;  %v10269_v33 = vand.u32 4294901760, %v8901_v60 }
 0x216   :  { %4161 = vmatprep.mubr.f32.mxu0 %v8988_v21  ;;  %6030 = vmatpush3.msra.mxu1 %v10246_v16  ;;  %v10251_v16 = vand.u32 4294901760, %v8700_v31  ;;  %v10255_v31 = vand.u32 4294901760, %v8988_v21  ;;  %v10271_v21 = vand.u32 4294901760, %v8933_v3  ;;  %v4551_v3 = vld [vmem:[#allocation8 + $0x8] sm:$0xff] }
 0x217   :  { %4164 = vmatmul.mubr.f32.vlgmr.msra.gmra.mxu0 %v8998_v10  ;;  %6031 = vmatprep.subr.mxu1 %v8948_v61  ;;  %v10272_v10 = vand.u32 4294901760, %v8978_v38  ;;  %v10275_v38 = vand.u32 4294901760, %v8967_v9  ;;  %v9267_v9 = vand.u32 4294901760, %v4551_v3 }
 0x218   :  { %6042 = vmatprep.subr.mxu0 %v10247_v55  ;;  %6032 = vmatpush3.msra.mxu1 %v8921_v36  ;;  %v10270_v55 = vand.u32 4294901760, %v8956_v0  ;;  %v10274_v0 = vand.u32 4294901760, %v9009_v32 }
 0x219   :  { %6043 = vmatpush3.msra.mxu0 %v10248_v1  ;;  %6033 = vmatprep.subr.mxu1 %v10249_v47  ;;  %v10258_v1 = vand.u32 4294901760, %v8748_v22  ;;  %v10262_v22 = vand.u32 4294901760, %v8830_v27  ;;  %v10268_v27 = vand.u32 4294901760, %v8929_v29  ;;  %v4556_v29 = vsel %vm4554_vm0, %v4549_v62, 0 }
 0x21a   :  { %6044 = vmatprep.subr.mxu0 %v10250_v63  ;;  %6034 = vmatpush3.msra.mxu1 %v8994_v49  ;;  %v4552_v63 = vld [vmem:[#allocation8 + $0x10] sm:$0xff] }
 0x21b   :  { %6045 = vmatpush3.msra.mxu0 %v10251_v16  ;;  %6035 = vmatprep.subr.mxu1 %v9003_v42  ;;  %v10256_v16 = vand.u32 4294901760, %v8733_v28  ;;  %v10261_v28 = vand.u32 4294901760, %v8783_v39  ;;  %v4553_v39 = vld [vmem:[#allocation8 + $0x18] sm:$0xff] }
 0x21c   :  { %6046 = vmatprep.subr.mxu0 %v10252_v30  ;;  %6036 = vmatpush3.msra.mxu1 %v9005_v8  ;;  %v9243_v60 = vand.u32 4294901760, %v4553_v39  ;;  %v6331_v30 = vmov 0.0  }
 0x21d   :  { %6047 = vmatpush3.msra.mxu0 %v10253_v6  ;;  %6037 = vmatprep.subr.mxu1 %v9023_v51 }
 0x21e   :  { %6048 = vmatprep.subr.mxu0 %v10254_v58  ;;  %6038 = vmatpush3.msra.mxu1 %v9025_v40  ;;  %v9262_v32 = vsub.f32 %v4553_v39, %v9243_v60 }
 0x21f   :  { %4268 = vmatprep.mubr.f32.mxu1 %v10255_v31  ;;  %6049 = vmatpush3.msra.mxu0 %v10256_v16 }
 0x220   :  { %4272 = vmatmul.mubr.f32.vlgmr.msra.gmra.mxu1 %v10257_v17  ;;  %6050 = vmatprep.subr.mxu0 %v10258_v1  ;;  %v5094_v1 = vpop.f32.mrf.mxu0 }
 0x221   :  { %6077 = vmatprep.subr.mxu1 %v8643_v57  ;;  %6051 = vmatpush3.msra.mxu0 %v10259_v4  ;;  %v10263_v57 = vand.u32 4294901760, %v10226_v34  ;;  %v10273_v34 = vand.u32 4294901760, %v8964_v14  ;;  %v10276_v14 = vand.u32 4294901760, %v9029_v18 }
 0x222   :  { %6078 = vmatpush3.msra.mxu1 %v8651_v41  ;;  %6052 = vmatprep.subr.mxu0 %v10260_v24  ;;  %v10264_v41 = vand.u32 4294901760, %v10228_v26  ;;  %v9256_v26 = vand.u32 4294901760, %v4552_v63  ;;  %v5095_v4 = vpop.f32.mrf.mxu0  ;;  %v5129_v24 = vpop.f32.mrf.mxu1 }
 0x223   :  { %6079 = vmatprep.subr.mxu1 %v8665_v19  ;;  %6053 = vmatpush3.msra.mxu0 %v10261_v28  ;;  %v10265_v19 = vand.u32 4294901760, %v10230_v23  ;;  %v4550_v23 = vld [vmem:[#allocation8] sm:$0xff] }
 0x224   :  { %6080 = vmatpush3.msra.mxu1 %v8673_v56  ;;  %6054 = vmatprep.subr.mxu0 %v10262_v22  ;;  %v10266_v56 = vand.u32 4294901760, %v10232_v44  ;;  %v10281_v44 = vand.u32 4294901760, %v9042_v45  ;;  %v9291_v45 = vsub.f32 %v4551_v3, %v9267_v9  ;;  %v5164_v28 = vpop.f32.mrf.mxu0  ;;  %v5130_v22 = vpop.f32.mrf.mxu1 }
 0x225   :  { %6081 = vmatprep.subr.mxu1 %v8678_v46  ;;  %6055 = vmatpush3.msra.mxu0 %v10263_v57  ;;  %v10267_v46 = vand.u32 4294901760, %v10234_v35  ;;  %v9281_v35 = vand.u32 4294901760, %v4550_v23 }
 0x226   :  { %6082 = vmatpush3.msra.mxu1 %v10227_v43  ;;  %6056 = vmatprep.subr.mxu0 %v10264_v41  ;;  %v9251_v43 = vand.u32 4294901760, %v4556_v29  ;;  %v5165_v57 = vpop.f32.mrf.mxu0  ;;  %v5199_v41 = vpop.f32.mrf.mxu1 }
 0x227   :  { %6083 = vmatprep.subr.mxu1 %v10229_v2  ;;  %6057 = vmatpush3.msra.mxu0 %v10265_v19  ;;  %v10277_v2 = vld [vmem:[#allocation24_spill] sm:$0xff] }
 0x228   :  { %6084 = vmatpush3.msra.mxu1 %v10231_v37  ;;  %6058 = vmatprep.subr.mxu0 %v10266_v56  ;;  %v10280_v37 = vld [vmem:[#allocation27_spill] sm:$0xff]  ;;  %v9273_v18 = vsub.f32 %v4556_v29, %v9251_v43  ;;  %v5234_v19 = vpop.f32.mrf.mxu0  ;;  %v5200_v56 = vpop.f32.mrf.mxu1 }
 0x229   :  { %6085 = vmatprep.subr.mxu1 %v10233_v20  ;;  %6059 = vmatpush3.msra.mxu0 %v10267_v46  ;;  %v10282_v20 = vld [vmem:[#allocation25_spill] sm:$0xff] }
 0x22a   :  { %6086 = vmatpush3.msra.mxu1 %v10235_v13  ;;  %6060 = vmatprep.subr.mxu0 %v10268_v27  ;;  %v5235_v46 = vpop.f32.mrf.mxu0  ;;  %v5269_v27 = vpop.f32.mrf.mxu1 }
 0x22b   :  { %6087 = vmatprep.subr.mxu1 %v10236_v25  ;;  %6061 = vmatpush3.msra.mxu0 %v10269_v33  ;;  %v10285_v25 = vld [vmem:[#allocation28_spill] sm:$0xff] }
 0x22c   :  { %6088 = vmatpush3.msra.mxu1 %v10237_v12  ;;  %6062 = vmatprep.subr.mxu0 %v10270_v55  ;;  %v10286_v12 = vand.u32 4294901760, %v10285_v25  ;;  %v5304_v62 = vpop.f32.mrf.mxu0  ;;  %v5270_v33 = vpop.f32.mrf.mxu1 }
 0x22d   :  { %6089 = vmatprep.subr.mxu1 %v10238_v11  ;;  %6063 = vmatpush3.msra.mxu0 %v10271_v21  ;;  %v10287_v11 = vld [vmem:[#allocation36_spill] sm:$0xff] }
 0x22e   :  { %6090 = vmatpush3.msra.mxu1 %v10239_v59  ;;  %6064 = vmatprep.subr.mxu0 %v10272_v10  ;;  %v10288_v59 = vld [vmem:[#allocation39_spill] sm:$0xff]  ;;  %v5305_v39 = vpop.f32.mrf.mxu0  ;;  %v5339_v55 = vpop.f32.mrf.mxu1 }
 0x22f   :  { %6091 = vmatprep.subr.mxu1 %v10240_v5  ;;  %6065 = vmatpush3.msra.mxu0 %v10273_v34  ;;  %v10289_v5 = vld [vmem:[#allocation31_spill] sm:$0xff] }
 0x230   :  { %6092 = vmatpush3.msra.mxu1 %v10241_v54  ;;  %6066 = vmatprep.subr.mxu0 %v10274_v0  ;;  %v4629_v54 = vand.u32 4294901760, %v9273_v18  ;;  %v5374_v21 = vpop.f32.mrf.mxu0  ;;  %v5340_v29 = vpop.f32.mrf.mxu1 }
 0x231   :  { %6093 = vmatprep.subr.mxu1 %v10242_v53  ;;  %6067 = vmatpush3.msra.mxu0 %v10275_v38  ;;  %v10278_v53 = vand.u32 4294901760, %v9033_v52  ;;  %v9279_v52 = vsub.f32 %v4552_v63, %v9256_v26 }
 0x232   :  { %6094 = vmatpush3.msra.mxu1 %v10243_v7  ;;  %6068 = vmatprep.subr.mxu0 %v10276_v14  ;;  %v10279_v7 = vand.u32 4294901760, %v9049_v48  ;;  %v4664_v48 = vand.u32 4294901760, %v9262_v32  ;;  %v5375_v10 = vpop.f32.mrf.mxu0 }
 0x233   :  { %6095 = vmatprep.subr.mxu1 %v10277_v2  ;;  %6069 = vmatpush3.msra.mxu0 %v10278_v53  ;;  %v4671_v6 = vand.u32 4294901760, %v9279_v52 }
 0x234   :  { %6096 = vmatpush3.msra.mxu1 %v8865_v15  ;;  %6070 = vmatprep.subr.mxu0 %v10279_v7  ;;  %v10283_v15 = vld [vmem:[#allocation41_spill] sm:$0xff]  ;;  %v4665_v58 = vsub.f32 %v9262_v32, %v4664_v48  ;;  %v5444_v63 = vpop.f32.mrf.mxu0 }
 0x235   :  { %6097 = vmatprep.subr.mxu1 %v10280_v37  ;;  %6071 = vmatpush3.msra.mxu0 %v10281_v44  ;;  %v10284_v13 = vand.u32 4294901760, %v10283_v15  ;;  %v4672_v31 = vsub.f32 %v9279_v52, %v4671_v6  ;;  %v5096_v15 = vadd.f32 %v5095_v4, %v5094_v1 }
 0x236   :  { %6098 = vmatpush3.msra.mxu1 %v10282_v20  ;;  %4438 = vmatprep.mubr.f32.mxu0 %v10287_v11  ;;  %v4666_v16 = vand.u32 4294901760, %v4665_v58  ;;  %v5445_v0 = vpop.f32.mrf.mxu0  ;;  %v5131_v20 = vadd.f32 %v5130_v22, %v5129_v24 }
 0x237   :  { %6072 = vmatprep.subr.mxu0 %v10284_v13  ;;  %6099 = vmatprep.subr.mxu1 %v8925_v50  ;;  %v9299_v50 = vsub.f32 %v4550_v23, %v9281_v35  ;;  %v4673_v17 = vand.u32 4294901760, %v4672_v31  ;;  %v5166_v13 = vadd.f32 %v5165_v57, %v5164_v28  ;;  %v5446_v24 = vadd.f32 %v5445_v0, %v5444_v63 }
 0x238   :  { %6073 = vmatpush3.msra.mxu0 %v10286_v12  ;;  %6100 = vmatpush3.msra.mxu1 %v10288_v59  ;;  %v580_v12 = vadd.f32 %v5131_v20, %v5096_v15  ;;  %v5236_v59 = vadd.f32 %v5235_v46, %v5234_v19 }
 0x239   :  { %4440 = vmatmul.mubr.f32.vlgmr.msra.gmra.mxu0 %v10289_v5  ;;  %6101 = vmatprep.subr.mxu1 %v8948_v61  ;;  %v4678_v61 = vand.u32 4294901760, %v9291_v45 }
 0x23a   :  { %6142 = vmatprep.subr.mxu0 %v6331_v30  ;;  %6102 = vmatpush3.msra.mxu1 %v8921_v36  ;;  %v4630_v36 = vsub.f32 %v9273_v18, %v4629_v54 }
 0x23b   :  { %6143 = vmatpush3.msra.mxu0 %v9243_v60  ;;  %6103 = vmatprep.subr.mxu1 %v10249_v47  ;;  %v4685_v47 = vand.u32 4294901760, %v9299_v50 }
 0x23c   :  { %6144 = vmatprep.subr.mxu0 %v6331_v30  ;;  %6104 = vmatpush3.msra.mxu1 %v8994_v49  ;;  %v4679_v49 = vsub.f32 %v9291_v45, %v4678_v61 }
 0x23d   :  { %6145 = vmatpush3.msra.mxu0 %v9256_v26  ;;  %6105 = vmatprep.subr.mxu1 %v9003_v42  ;;  %v4631_v42 = vand.u32 4294901760, %v4630_v36  ;;  %v5306_v36 = vadd.f32 %v5305_v39, %v5304_v62 }
 0x23e   :  { %6146 = vmatprep.subr.mxu0 %v6331_v30  ;;  %6106 = vmatpush3.msra.mxu1 %v9005_v8  ;;  %v4686_v8 = vsub.f32 %v9299_v50, %v4685_v47 }
 0x23f   :  { %4542 = vmatprep.mubr.f32.mxu1 %v10287_v11  ;;  %6107 = vmatprep.subr.mxu1 %v9023_v51  ;;  %v5201_v11 = vadd.f32 %v5200_v56, %v5199_v41 }
 0x240   :  { %6147 = vmatpush3.msra.mxu0 %v9267_v9  ;;  %6108 = vmatpush3.msra.mxu1 %v9025_v40  ;;  %v4680_v40 = vand.u32 4294901760, %v4679_v49  ;;  %v4687_v51 = vand.u32 4294901760, %v4686_v8 }
 0x241   :  { %6148 = vmatprep.subr.mxu0 %v6331_v30  ;;  %4544 = vmatmul.mubr.f32.vlgmr.msra.gmra.mxu1 %v10289_v5 }
 0x242   :  { %6153 = vmatprep.subr.mxu1 %v6331_v30  ;;  %6149 = vmatpush3.msra.mxu0 %v9281_v35 }
 0x243   :  { %6154 = vmatpush3.msra.mxu1 %v4666_v16  ;;  %6150 = vmatprep.mubr.msk.f32.mxu0 %vm6332_vm1, %v6331_v30 }
 0x244   :  { %6155 = vmatprep.subr.mxu1 %v6331_v30  ;;  %6164 = vmatprep.subr.mxu0 %v6331_v30 }
 0x245   :  { %6151 = vmatmul.mubr.f32.vlgmr.msra.gmra.mxu0 %v4631_v42  ;;  %6156 = vmatpush3.msra.mxu1 %v4673_v17  ;;  %v5376_v17 = vadd.f32 %v5375_v10, %v5374_v21 }
 0x246   :  { %6165 = vmatpush3.msra.mxu0 %v9262_v32  ;;  %6157 = vmatprep.subr.mxu1 %v6331_v30 }
 0x247   :  { %6166 = vmatprep.subr.mxu0 %v6331_v30  ;;  %6158 = vmatpush3.msra.mxu1 %v4680_v40 }
 0x248   :  { %6167 = vmatpush3.msra.mxu0 %v9279_v52  ;;  %6159 = vmatprep.subr.mxu1 %v6331_v30 }
 0x249   :  { %6168 = vmatprep.subr.mxu0 %v6331_v30  ;;  %6160 = vmatpush3.msra.mxu1 %v4687_v51 }
 0x24a   :  { %6161 = vmatprep.mubr.msk.f32.mxu1 %vm6332_vm1, %v6331_v30  ;;  %6169 = vmatpush3.msra.mxu0 %v9291_v45  ;;  %v718_v45 = vadd.f32 %v5166_v13, %v580_v12 }
 0x24b   :  { %6162 = vmatmul.mubr.f32.vlgmr.msra.gmra.mxu1 %v9251_v43  ;;  %6170 = vmatprep.subr.mxu0 %v6331_v30 }
 0x24c   :  { %6175 = vmatprep.subr.mxu1 %v6331_v30  ;;  %6171 = vmatpush3.msra.mxu0 %v9299_v50  ;;  %v5271_v50 = vadd.f32 %v5270_v33, %v5269_v27 }
 0x24d   :  { %6172 = vmatprep.mubr.msk.f32.mxu0 %vm6332_vm1, %v6331_v30  ;;  %6176 = vmatpush3.msra.mxu1 %v9243_v60 }
 0x24e   :  { %6173 = vmatmul.mubr.f32.vlgmr.msra.gmra.mxu0 %v9273_v18  ;;  %6177 = vmatprep.subr.mxu1 %v6331_v30 }
 0x24f   :  { %6186 = vmatprep.subr.mxu0 %v6331_v30  ;;  %6178 = vmatpush3.msra.mxu1 %v9256_v26 }
 0x250   :  { %6187 = vmatpush3.msra.mxu0 %v4664_v48  ;;  %6179 = vmatprep.subr.mxu1 %v6331_v30 }
 0x251   :  { %6188 = vmatprep.subr.mxu0 %v6331_v30  ;;  %6180 = vmatpush3.msra.mxu1 %v9267_v9 }
 0x252   :  { %6189 = vmatpush3.msra.mxu0 %v4671_v6  ;;  %6181 = vmatprep.subr.mxu1 %v6331_v30 }
 0x253   :  { %6190 = vmatprep.subr.mxu0 %v6331_v30  ;;  %6182 = vmatpush3.msra.mxu1 %v9281_v35 }
 0x254   :  { %6183 = vmatprep.mubr.msk.f32.mxu1 %vm6332_vm1, %v6331_v30  ;;  %6191 = vmatpush3.msra.mxu0 %v4678_v61 }
 0x255   :  { %6184 = vmatmul.mubr.f32.vlgmr.msra.gmra.mxu1 %v4629_v54  ;;  %6192 = vmatprep.subr.mxu0 %v6331_v30 }
 0x256   :  { %6197 = vmatprep.subr.mxu1 %v6331_v30  ;;  %6193 = vmatpush3.msra.mxu0 %v4685_v47  ;;  %v5341_v47 = vadd.f32 %v5340_v29, %v5339_v55 }
 0x257   :  { %6194 = vmatprep.mubr.msk.f32.mxu0 %vm6332_vm1, %v6331_v30  ;;  %6198 = vmatpush3.msra.mxu1 %v9243_v60  ;;  %v5409_v60 = vpop.f32.mrf.mxu1 }
 0x258   :  { %6195 = vmatmul.mubr.f32.vlgmr.msra.gmra.mxu0 %v9251_v43  ;;  %6199 = vmatprep.subr.mxu1 %v6331_v30 }
 0x259   :  { %6205 = vmatprep.mubr.msk.f32.mxu1 %vm6332_vm1, %v6331_v30  ;;  %6200 = vmatpush3.msra.mxu1 %v9256_v26  ;;  %v5410_v34 = vpop.f32.mrf.mxu1 }
 0x25a   :  { %6201 = vmatprep.subr.mxu1 %v6331_v30  ;;  %v5411_v1 = vadd.f32 %v5410_v34, %v5409_v60 }
 0x25b   :  { %6202 = vmatpush3.msra.mxu1 %v9267_v9  ;;  %v5479_v3 = vpop.f32.mrf.mxu1 }
 0x25c   :  { %6203 = vmatprep.subr.mxu1 %v6331_v30  ;;  %v826_v30 = vadd.f32 %v5201_v11, %v718_v45 }
 0x25d   :  { %6204 = vmatpush3.msra.mxu1 %v9281_v35  ;;  %v5480_v38 = vpop.f32.mrf.mxu1 }
 0x25e   :  { %6206 = vmatmul.mubr.f32.vlgmr.msra.gmra.mxu1 %v9251_v43  ;;  %v5514_v43 = vpop.f32.mrf.mxu0  ;;  %v994_v61 = vadd.f32 %v5236_v59, %v826_v30  ;;  %v5481_v41 = vadd.f32 %v5480_v38, %v5479_v3 }
 0x25f   :  { %v5549_v14 = vpop.f32.mrf.mxu1 }
 0x260   :  { %v5515_v26 = vpop.f32.mrf.mxu0  ;;  %v1098_v31 = vadd.f32 %v5271_v50, %v994_v61 }
 0x261   :  { %v5550_v32 = vpop.f32.mrf.mxu1  ;;  %v5516_v27 = vadd.f32 %v5515_v26, %v5514_v43 }
 0x262   :  { %v5584_v2 = vpop.f32.mrf.mxu0  ;;  %v1210_v42 = vadd.f32 %v5306_v36, %v1098_v31  ;;  %v5551_v33 = vadd.f32 %v5550_v32, %v5549_v14 }
 0x263   :  { %v5619_v53 = vpop.f32.mrf.mxu1 }
 0x264   :  { %v5585_v23 = vpop.f32.mrf.mxu0  ;;  %v1442_v51 = vadd.f32 %v5341_v47, %v1210_v42 }
 0x265   :  { %v5620_v7 = vpop.f32.mrf.mxu1  ;;  %v5586_v21 = vadd.f32 %v5585_v23, %v5584_v2 }
 0x266   :  { %v5654_v9 = vpop.f32.mrf.mxu0  ;;  %v1580_v4 = vadd.f32 %v5376_v17, %v1442_v51  ;;  %v5621_v60 = vadd.f32 %v5620_v7, %v5619_v53 }
 0x267   :  { %v5689_v18 = vpop.f32.mrf.mxu1 }
 0x268   :  { %v5655_v37 = vpop.f32.mrf.mxu0  ;;  %v1688_v57 = vadd.f32 %v5411_v1, %v1580_v4 }
 0x269   :  { %v5690_v52 = vpop.f32.mrf.mxu1  ;;  %v5656_v63 = vadd.f32 %v5655_v37, %v5654_v9 }
 0x26a   :  { %v5724_v44 = vpop.f32.mrf.mxu0  ;;  %v1856_v46 = vadd.f32 %v5446_v24, %v1688_v57  ;;  %v5691_v3 = vadd.f32 %v5690_v52, %v5689_v18 }
 0x26b   :  { %v5759_v48 = vpop.f32.mrf.mxu1 }
 0x26c   :  { %v5725_v35 = vpop.f32.mrf.mxu0  ;;  %v1960_v62 = vadd.f32 %v5481_v41, %v1856_v46 }
 0x26d   :  { %v5760_v5 = vpop.f32.mrf.mxu1  ;;  %v5726_v43 = vadd.f32 %v5725_v35, %v5724_v44 }
 0x26e   :  { %v2072_v29 = vadd.f32 %v5516_v27, %v1960_v62  ;;  %v5761_v32 = vadd.f32 %v5760_v5, %v5759_v48 }
 0x270   :  { %v2304_v15 = vadd.f32 %v5551_v33, %v2072_v29 }
 0x271   :  { %v5794_v25 = vpop.f32.mrf.mxu0 }
 0x272   :  { %v2442_v34 = vadd.f32 %v5586_v21, %v2304_v15 }
 0x273   :  { %v5795_v54 = vpop.f32.mrf.mxu0 }
 0x274   :  { %v2550_v12 = vadd.f32 %v5621_v60, %v2442_v34  ;;  %v5796_v2 = vadd.f32 %v5795_v54, %v5794_v25 }
 0x276   :  { %v2718_v45 = vadd.f32 %v5656_v63, %v2550_v12 }
 0x278   :  { %v2822_v14 = vadd.f32 %v5691_v3, %v2718_v45 }
 0x27a   :  { %v5829_v6 = vpop.f32.mrf.mxu1  ;;  %v2934_v30 = vadd.f32 %v5726_v43, %v2822_v14 }
 0x27c   :  { %v5830_v16 = vpop.f32.mrf.mxu1  ;;  %v3166_v50 = vadd.f32 %v5761_v32, %v2934_v30 }
 0x27d   :  { %v5831_v61 = vadd.f32 %v5830_v16, %v5829_v6 }
 0x27e   :  { %v3304_v7 = vadd.f32 %v5796_v2, %v3166_v50 }
 0x280   :  { %v3412_v36 = vadd.f32 %v5831_v61, %v3304_v7 }
 0x293   :  { %v5864_v58 = vpop.f32.mrf.mxu0 }
 0x295   :  { %v5865_v49 = vpop.f32.mrf.mxu0 }
 0x296   :  { %v5866_v9 = vadd.f32 %v5865_v49, %v5864_v58 }
 0x298   :  { %v3580_v52 = vadd.f32 %v5866_v9, %v3412_v36 }
 0x29c   :  { %v5899_v8 = vpop.f32.mrf.mxu1 }
 0x29e   :  { %v5900_v28 = vpop.f32.mrf.mxu1 }
 0x29f   :  { %v5901_v31 = vadd.f32 %v5900_v28, %v5899_v8 }
 0x2a1   :  { %v3684_v42 = vadd.f32 %v5901_v31, %v3580_v52 }
 0x2b5   :  { %v5934_v40 = vpop.f32.mrf.mxu0 }
 0x2b7   :  { %v5935_v22 = vpop.f32.mrf.mxu0 }
 0x2b8   :  { %v5936_v47 = vadd.f32 %v5935_v22, %v5934_v40 }
 0x2ba   :  { %v3796_v48 = vadd.f32 %v5936_v47, %v3684_v42 }
 0x2be   :  { %v5969_v19 = vpop.f32.mrf.mxu1 }
 0x2c0   :  { %v5970_v39 = vpop.f32.mrf.mxu1 }
 0x2c1   :  { %v5971_v44 = vadd.f32 %v5970_v39, %v5969_v19 }
 0x2c3   :  { %v4028_v25 = vadd.f32 %v5971_v44, %v3796_v48 }
 0x2d7   :  { %v6004_v56 = vpop.f32.mrf.mxu0 }
 0x2d9   :  { %v6005_v55 = vpop.f32.mrf.mxu0 }
 0x2da   :  { %v6006_v5 = vadd.f32 %v6005_v55, %v6004_v56 }
 0x2dc   :  { %v4166_v16 = vadd.f32 %v6006_v5, %v4028_v25 }
 0x2e0   :  { %v6039_v10 = vpop.f32.mrf.mxu1 }
 0x2e2   :  { %v6040_v0 = vpop.f32.mrf.mxu1 }
 0x2e3   :  { %v6041_v54 = vadd.f32 %v6040_v0, %v6039_v10 }
 0x2e5   :  { %v4274_v24 = vadd.f32 %v6041_v54, %v4166_v16 }
 0x2f9   :  { %v6074_v20 = vpop.f32.mrf.mxu0 }
 0x2fb   :  { %v6075_v13 = vpop.f32.mrf.mxu0 }
 0x2fc   :  { %v6076_v4 = vadd.f32 %v6075_v13, %v6074_v20 }
 0x2fe   :  { %v4442_v28 = vadd.f32 %v6076_v4, %v4274_v24 }
 0x301   :  { %v6109_v38 = vpop.f32.mrf.mxu1 }
 0x303   :  { %v6110_v59 = vpop.f32.mrf.mxu1 }
 0x304   :  { %v6111_v8 = vadd.f32 %v6110_v59, %v6109_v38 }
 0x305   :  { %v4633_v11 = vpop.f32.mrf.mxu0 }
 0x306   :  { %v4546_v22 = vadd.f32 %v6111_v8, %v4442_v28 }
 0x307   :  { %v6152_v26 = vpop.f32.mrf.mxu0 }
 0x30b   :  { %v4724_v23 = vpop.f32.mrf.mxu1 }
 0x30c   :  { %v4725_v35 = vadd.f32 %v4724_v23, %v4633_v11 }
 0x30d   :  { %v6163_v53 = vpop.f32.mrf.mxu1 }
 0x30e   :  { %v4804_v37 = vpop.f32.mrf.mxu0 }
 0x30f   :  { %v4805_v1 = vadd.f32 %v4804_v37, %v4725_v35 }
 0x310   :  { %v6174_v18 = vpop.f32.mrf.mxu0 }
 0x315   :  { %v4881_v17 = vpop.f32.mrf.mxu1 }
 0x316   :  { %v4882_v58 = vadd.f32 %v4881_v17, %v4805_v1 }
 0x317   :  { %v6185_v51 = vpop.f32.mrf.mxu1 }
 0x318   :  { %v4964_v6 = vpop.f32.mrf.mxu0 }
 0x319   :  { %v4965_v57 = vadd.f32 %v4964_v6, %v4882_v58 }
 0x31a   :  { %v6196_v49 = vpop.f32.mrf.mxu0 }
 0x31e   :  { %v5039_v40 = vpop.f32.mrf.mxu1 }
 0x31f   :  { %v5040_v41 = vadd.f32 %v5039_v40, %v4965_v57 }
 0x320   :  { %v6207_v19 = vpop.f32.mrf.mxu1 }
 0x321   :  { %v5043_v56 = vmul.f32 %v5040_v41, %v4546_v22 }
 0x323   :  { %5044 = vst [vmem:[#allocation10] sm:$0xff] %v5043_v56 }
 0x324   :  { %6308 = shalt.err (!%p6305_p10)
}
 0x325   :  { %5054 = dma.vmem_to_hbm [thread:$0]  %s5052_s3, 128, %s9388_s4, [#allocation4]  }
 0x326   :  { %6323 = dma.done.wait [#allocation4], 128  }
 0x327   :  { %6324 = vsyncadd [#allocation4], 4294967168 }
 0x328   :  { %5058 = vsyncpa [#allocation3], 1 }
 0x329   :  { %5059 = vsyncpa [#allocation6], 1 }
 0x32a   :  { %5060 = vsyncpa [#allocation9], 1 }
 0x32b   :  { %5061 = vsyncpa [#allocation4], 1 }

</bundles_post_ra>
